<compile_context>
chip_gen: v6e
topology: v6e:2x2x1
jax: 0.10.0
libtpu: 0.0.40
codegen_flags: <defaults>
</compile_context>

<pallas_src>
import math

import jax
import jax.numpy as jnp
from jax.experimental import pallas as pl
from jax.experimental.pallas import tpu as pltpu


# ----------------------------------------------------------------------------
# helpers (glue)
# ----------------------------------------------------------------------------
def relative_bias(rel_bias_table, T, rel_max):
    d = jnp.arange(T)
    idx = jnp.clip(d[:, None] - d[None, :], -rel_max + 1, rel_max - 1) + rel_max - 1
    return rel_bias_table[idx]                       # (T, T, H)


# ----------------------------------------------------------------------------
# fused forward kernel: rotation + L EBlocks + readout, one batch element / step
# ----------------------------------------------------------------------------
def _fused_forward_kernel_factory(T, K_VEC, N, H, HIDp, L):
    KN = K_VEC * N
    f32 = jnp.float32

    def kernel(scal_ref, v_ref, kr_ref, hmask_ref, bias_ref,
               mblk_ref, w1blk_ref, w2blk_ref,
               gw1_ref, gb1_ref, gw2_ref, expand_ref,
               kdsig_ref, sumd_ref, hw_ref, o_ref):

        expand = expand_ref[...]                                  # (K_VEC, KN)

        def gated(z, gidx):
            # sigmoid gate from per-vector squared norms, batched over all T*K_VEC
            # vectors; result is already broadcast back to the (T, KN) lane layout.
            h1 = jnp.maximum(
                jnp.dot(z * z, gw1_ref[gidx], preferred_element_type=f32)
                + gb1_ref[gidx], 0.0)                             # (T, K_VEC*HIDp)
            logit = jnp.dot(h1, gw2_ref[gidx],
                            preferred_element_type=f32)           # (T, K_VEC)
            gate = jax.nn.sigmoid(logit)
            return jnp.dot(gate, expand, preferred_element_type=f32)   # (T, KN)

        # ---- ClientFront rotation: per-vector V @ K.T as one block-diag matmul
        x = jnp.dot(v_ref[0], kr_ref[...], preferred_element_type=f32)  # (T, KN)

        for l in range(L):
            # ---- SO(n)-equivariant multi-head attention (full-T matmuls) ----
            attn = jnp.zeros_like(x)
            for h in range(H):
                xm = x * hmask_ref[h]                              # keep head-h lanes
                s = jax.lax.dot_general(xm, x, (((1,), (1,)), ((), ())),
                                        preferred_element_type=f32)     # (T, T)
                s = s * scal_ref[l, h] + bias_ref[l * H + h]       # qk scale + bias + causal
                m = jnp.max(s, axis=-1, keepdims=True)
                e = jnp.exp(s - m)
                p = e / jnp.sum(e, axis=-1, keepdims=True)
                attn = attn + scal_ref[l, H + h] * jnp.dot(
                    p, xm, preferred_element_type=f32)             # (T, KN)
            y = x + attn

            # ---- gated Lie residual:  x = y + g + g @ blockdiag(Mskew) ----
            g = y * gated(y, 3 * l + 0)
            x = y + g + jnp.dot(g, mblk_ref[l], preferred_element_type=f32)

            # ---- VectorMLP:  Z = mix1·X (gated), U = mix2·Z (gated), x += Y ----
            z = jnp.dot(x, w1blk_ref[l], preferred_element_type=f32)
            z = z * gated(z, 3 * l + 1)
            u = jnp.dot(z, w2blk_ref[l], preferred_element_type=f32)
            x = x + u * gated(u, 3 * l + 2)

        # ---- ClientBack: un-rotate signal coords, squared norms, linear head ----
        dsig = jnp.dot(x, kdsig_ref[...], preferred_element_type=f32)   # (T, K_VEC*d)
        n2 = jnp.dot(dsig * dsig, sumd_ref[...],
                     preferred_element_type=f32)                        # (T, K_VEC)
        o_ref[0] = jnp.dot(n2, hw_ref[...], preferred_element_type=f32)  # (T, VOCAB)

    return kernel


# ----------------------------------------------------------------------------
# full forward (Pallas path)
# ----------------------------------------------------------------------------
def secure_transformer_pallas(tokens, params, noise, Kmat, cfg):
    f32 = jnp.float32
    d, m_noise = cfg['d'], cfg['m']
    N = d + m_noise
    K_VEC, H, HID, L = cfg['k_vec'], cfg['heads'], cfg['hidden'], cfg['layers']
    HIDp = HID + 1                                      # +1 hidden unit folds bias b2
    KN, KH = K_VEC * N, K_VEC * HIDp
    B, T = tokens.shape
    VOCAB = cfg['vocab']

    # ---- ClientFront glue: embed, L2-normalise, noise pad (plain JAX) ----
    # TODO(synk): l2_normalize is not defined in the source file; assumed F.normalize(dim=-1).
    E = params['embed'][tokens]                                   # (B, T, k, d)
    E = E / jnp.maximum(jnp.linalg.norm(E, axis=-1, keepdims=True), 1e-12)
    V = jnp.concatenate([E, noise], axis=-1)                      # (B, T, k, N)
    v2 = V.reshape(B, T, KN).astype(f32)                          # lane-dense slab

    # ---- constant structure matrices (kron-expanded, built once) ----
    eyeK = jnp.eye(K_VEC, dtype=f32)
    eyeN = jnp.eye(N, dtype=f32)
    KR = jnp.kron(eyeK, Kmat.T.astype(f32))                       # rotate:   v @ K.T
    KDsig = jnp.kron(eyeK, Kmat[:, :d].astype(f32))               # un-rotate, signal cols
    SUMd = jnp.kron(eyeK, jnp.ones((d, 1), f32))                  # per-vector norm sum
    EXPAND = jnp.kron(eyeK, jnp.ones((1, N), f32))                # gate k -> (k, n) lanes
    HMASK = jnp.kron(jnp.eye(H, dtype=f32),
                     jnp.ones((1, (K_VEC // H) * N), f32)).reshape(H, 1, KN)
    head_wt = params['head_w'].T.astype(f32)                      # (K_VEC, VOCAB)

    # TODO(synk): at large T the (L*H, T, T) bias + causal mask should be built
    # in-kernel / tiled flash-style rather than precomputed (v7x 64 MiB VMEM).
    tt = jnp.arange(T)
    causal = jnp.where(tt[None, :] > tt[:, None], -jnp.inf, 0.0).astype(f32)

    def pack_gate(gp):
        w1, b1, w2, b2 = gp
        w1p = jnp.concatenate([w1.astype(f32), jnp.zeros((1,), f32)])
        b1p = jnp.concatenate([b1.astype(f32), jnp.ones((1,), f32)])
        w2p = jnp.concatenate([w2.astype(f32), jnp.reshape(b2.astype(f32), (1,))])
        gw1 = jnp.kron(eyeK, jnp.ones((N, 1), f32) * w1p[None, :])   # (KN, KH)
        gb1 = jnp.tile(b1p, (K_VEC,)).reshape(1, KH)                 # (1, KH)
        gw2 = jnp.kron(eyeK, w2p[:, None])                            # (KH, K_VEC)
        return gw1, gb1, gw2

    scal_l, bias_l, mblk_l, w1blk_l, w2blk_l = [], [], [], [], []
    gw1_l, gb1_l, gw2_l = [], [], []
    for lp in params['layers']:
        scal_l.append(jnp.concatenate(
            [lp['qs'] * lp['ks'] / math.sqrt(N), lp['vs']]).astype(f32))
        rb = jnp.transpose(relative_bias(lp['rel_bias'], T, cfg['rel_max']),
                           (2, 0, 1)).astype(f32)                  # (H, T, T)
        bias_l.append(rb + causal[None])
        u, v, a = lp['lie']
        Mskew = (u.T @ (a[:, None] * v) - v.T @ (a[:, None] * u)).astype(f32)
        mblk_l.append(jnp.kron(eyeK, Mskew))
        w1blk_l.append(jnp.kron(lp['mix1'].T.astype(f32), eyeN))
        w2blk_l.append(jnp.kron(lp['mix2'].T.astype(f32), eyeN))
        for gp in (lp['gate'], lp['g1'], lp['g2']):
            gw1, gb1, gw2 = pack_gate(gp)
            gw1_l.append(gw1)
            gb1_l.append(gb1)
            gw2_l.append(gw2)

    scal = jnp.stack(scal_l)                                       # (L, 2H)  -> SMEM
    bias = jnp.concatenate(bias_l, axis=0)                         # (L*H, T, T)
    mblk = jnp.stack(mblk_l)                                       # (L, KN, KN)
    w1blk = jnp.stack(w1blk_l)
    w2blk = jnp.stack(w2blk_l)
    gw1 = jnp.stack(gw1_l)                                         # (3L, KN, KH)
    gb1 = jnp.stack(gb1_l)                                         # (3L, 1, KH)
    gw2 = jnp.stack(gw2_l)                                         # (3L, KH, K_VEC)

    kernel = _fused_forward_kernel_factory(T, K_VEC, N, H, HIDp, L)
    return pl.pallas_call(
        kernel,
        out_shape=jax.ShapeDtypeStruct((B, T, VOCAB), f32),
        grid=(B,),
        in_specs=[
            pl.BlockSpec(memory_space=pltpu.MemorySpace.SMEM),            # scal
            pl.BlockSpec((1, T, KN), lambda b: (b, 0, 0)),                # v2
            pl.BlockSpec((KN, KN), lambda b: (0, 0)),                     # KR
            pl.BlockSpec((H, 1, KN), lambda b: (0, 0, 0)),                # head masks
            pl.BlockSpec((L * H, T, T), lambda b: (0, 0, 0)),             # bias + causal
            pl.BlockSpec((L, KN, KN), lambda b: (0, 0, 0)),               # Lie blockdiag
            pl.BlockSpec((L, KN, KN), lambda b: (0, 0, 0)),               # mix1 blockdiag
            pl.BlockSpec((L, KN, KN), lambda b: (0, 0, 0)),               # mix2 blockdiag
            pl.BlockSpec((3 * L, KN, KH), lambda b: (0, 0, 0)),           # gate W1
            pl.BlockSpec((3 * L, 1, KH), lambda b: (0, 0, 0)),            # gate b1
            pl.BlockSpec((3 * L, KH, K_VEC), lambda b: (0, 0, 0)),        # gate W2 (+b2)
            pl.BlockSpec((K_VEC, KN), lambda b: (0, 0)),                  # gate expand
            pl.BlockSpec((KN, K_VEC * d), lambda b: (0, 0)),              # K decode (sig)
            pl.BlockSpec((K_VEC * d, K_VEC), lambda b: (0, 0)),           # signal norm sum
            pl.BlockSpec((K_VEC, VOCAB), lambda b: (0, 0)),               # head weight.T
        ],
        out_specs=pl.BlockSpec((1, T, VOCAB), lambda b: (b, 0, 0)),
        compiler_params=pltpu.CompilerParams(
            dimension_semantics=("parallel",)),
    )(scal, v2, KR, HMASK, bias, mblk, w1blk, w2blk, gw1, gb1, gw2,
      EXPAND, KDsig, SUMd, head_wt)


# ----------------------------------------------------------------------------
# pure-JAX reference (mirrors the PyTorch code)
# ----------------------------------------------------------------------------
def _gate_net_ref(z, p):
    w1, b1, w2, b2 = p
    n2 = jnp.sum(z * z, axis=-1, keepdims=True)
    h1 = jax.nn.relu(n2 * w1 + b1)
    return jax.nn.sigmoid(jnp.sum(h1 * w2, axis=-1, keepdims=True) + b2)


def eblock_ref(x, lp, cfg):
    B, T, k, n = x.shape
    H = cfg['heads']
    D = k // H
    xh = x.reshape(B, T, H, D, n)
    q = lp['qs'].reshape(1, 1, H, 1, 1) * xh
    k_ = lp['ks'].reshape(1, 1, H, 1, 1) * xh
    v = lp['vs'].reshape(1, 1, H, 1, 1) * xh
    scores = jnp.einsum('bthdn,bshdn->bhts', q, k_) / math.sqrt(n)
    bias = relative_bias(lp['rel_bias'], T, cfg['rel_max'])
    scores = scores + jnp.transpose(bias, (2, 0, 1))[None]
    tt = jnp.arange(T)
    scores = scores + jnp.where(tt[None, :] > tt[:, None], -jnp.inf, 0.0)
    attn = jax.nn.softmax(scores, axis=-1)
    out = jnp.einsum('bhts,bshdn->bthdn', attn, v).reshape(B, T, k, n)
    x = x + out

    g = x * _gate_net_ref(x, lp['gate'])
    u, vv, a = lp['lie']
    u_x = jnp.einsum('rn,btkn->btkr', u, g)
    v_x = jnp.einsum('rn,btkn->btkr', vv, g)
    upd = (jnp.einsum('r,btkr,rn->btkn', a, u_x, vv)
           - jnp.einsum('r,btkr,rn->btkn', a, v_x, u))
    x = x + (g + upd)

    Z = jnp.einsum('kl,btln->btkn', lp['mix1'], x)
    Z = Z * _gate_net_ref(Z, lp['g1'])
    U = jnp.einsum('kl,btln->btkn', lp['mix2'], Z)
    Y = U * _gate_net_ref(U, lp['g2'])
    return x + Y


def secure_transformer_ref(tokens, params, noise, Kmat, cfg):
    with jax.default_matmul_precision('float32'):
        E = params['embed'][tokens]
        E = E / jnp.maximum(jnp.linalg.norm(E, axis=-1, keepdims=True), 1e-12)
        V = jnp.concatenate([E, noise], axis=-1)
        x = jnp.einsum('ij,btkj->btki', Kmat, V)
        for lp in params['layers']:
            x = eblock_ref(x, lp, cfg)
        dec = jnp.einsum('ij,btkj->btki', Kmat.T, x)
        sig = dec[..., :cfg['d']]
        norms = jnp.sum(sig * sig, axis=-1)
        return jnp.einsum('btk,vk->btv', norms, params['head_w'])


# ----------------------------------------------------------------------------
# deterministic parameter init (shapes follow the PyTorch __init__)
# ----------------------------------------------------------------------------
def init_params(key, cfg):
    keys = iter(jax.random.split(key, 64))
    nk = lambda: next(keys)
    H, K_VEC, HID, RANK = cfg['heads'], cfg['k_vec'], cfg['hidden'], cfg['rank']
    N = cfg['d'] + cfg['m']
    f32 = jnp.float32

    def gate_net_params():
        return ((0.5 * jax.random.normal(nk(), (HID,))).astype(f32),
                (0.1 * jax.random.normal(nk(), (HID,))).astype(f32),
                (0.5 * jax.random.normal(nk(), (HID,))).astype(f32),
                (0.1 * jax.random.normal(nk(), ())).astype(f32))

    params = {'embed': (jax.random.normal(nk(), (cfg['vocab'], K_VEC, cfg['d']))
                        / math.sqrt(cfg['d'] * K_VEC)).astype(f32)}
    layers = []
    for _ in range(cfg['layers']):
        lp = {
            'qs': (jnp.ones((H,)) + 0.1 * jax.random.normal(nk(), (H,))).astype(f32),
            'ks': (jnp.ones((H,)) + 0.1 * jax.random.normal(nk(), (H,))).astype(f32),
            'vs': (jnp.ones((H,)) + 0.1 * jax.random.normal(nk(), (H,))).astype(f32),
            'rel_bias': (0.02 * jax.random.truncated_normal(
                nk(), -2.0, 2.0, (2 * cfg['rel_max'] - 1, H))).astype(f32),
            'lie': ((jax.random.normal(nk(), (RANK, N)) / math.sqrt(N)).astype(f32),
                    (jax.random.normal(nk(), (RANK, N)) / math.sqrt(N)).astype(f32),
                    (0.1 * jax.random.normal(nk(), (RANK,))).astype(f32)),
            'gate': gate_net_params(),
            'mix1': (jax.random.normal(nk(), (K_VEC, K_VEC)) / math.sqrt(K_VEC)).astype(f32),
            'mix2': (jax.random.normal(nk(), (K_VEC, K_VEC)) / math.sqrt(K_VEC)).astype(f32),
            'g1': gate_net_params(),
            'g2': gate_net_params(),
        }
        layers.append(lp)
    params['layers'] = layers
    params['head_w'] = (jax.random.normal(nk(), (cfg['vocab'], K_VEC))
                        / math.sqrt(K_VEC)).astype(f32)
    return params


# ----------------------------------------------------------------------------
if __name__ == "__main__":
    cfg = dict(vocab=128, d=4, m=4, k_vec=8, heads=4, layers=2, rank=4,
               sigma=1.0, hidden=16, rel_max=2048)
    B, T = 2, 8
    N = cfg['d'] + cfg['m']

    root = jax.random.PRNGKey(0)
    k_param, k_tok, k_noise, k_rot = jax.random.split(root, 4)

    params = init_params(k_param, cfg)
    tokens = jax.random.randint(k_tok, (B, T), 0, cfg['vocab'], dtype=jnp.int32)
    noise = cfg['sigma'] * jax.random.normal(
        k_noise, (B, T, cfg['k_vec'], cfg['m']), dtype=jnp.float32)
    A = jax.random.normal(k_rot, (N, N), dtype=jnp.float32)
    Q, R = jnp.linalg.qr(A)
    Kmat = Q * jnp.where(jnp.diag(R) >= 0, 1.0, -1.0)[None, :]   # random orthogonal K

    logits = secure_transformer_pallas(tokens, params, noise, Kmat, cfg)
    logits = jax.block_until_ready(logits)
    assert logits.shape == (B, T, cfg['vocab'])

    ref = jax.block_until_ready(secure_transformer_ref(tokens, params, noise, Kmat, cfg))
    if not jnp.allclose(logits, ref, atol=1e-2, rtol=1e-2):
        raise AssertionError(
            f"Pallas/JAX mismatch: max abs diff = {float(jnp.max(jnp.abs(logits - ref)))}")

    print("KERNEL_OK")
</pallas_src>

<mosaic_0001>
module attributes {stable_mosaic.version = 11 : i64} {
  func.func @kernel(%arg0: i32, %arg1: memref<2x8xf32, #tpu.memory_space<smem>>, %arg2: memref<1x8x64xf32, #tpu.memory_space<vmem>>, %arg3: memref<64x64xf32, #tpu.memory_space<vmem>>, %arg4: memref<4x1x64xf32, #tpu.memory_space<vmem>>, %arg5: memref<8x8x8xf32, #tpu.memory_space<vmem>>, %arg6: memref<2x64x64xf32, #tpu.memory_space<vmem>>, %arg7: memref<2x64x64xf32, #tpu.memory_space<vmem>>, %arg8: memref<2x64x64xf32, #tpu.memory_space<vmem>>, %arg9: memref<6x64x136xf32, #tpu.memory_space<vmem>>, %arg10: memref<6x1x136xf32, #tpu.memory_space<vmem>>, %arg11: memref<6x136x8xf32, #tpu.memory_space<vmem>>, %arg12: memref<8x64xf32, #tpu.memory_space<vmem>>, %arg13: memref<64x32xf32, #tpu.memory_space<vmem>>, %arg14: memref<32x8xf32, #tpu.memory_space<vmem>>, %arg15: memref<8x128xf32, #tpu.memory_space<vmem>>, %arg16: memref<1x8x128xf32, #tpu.memory_space<vmem>>) attributes {dimension_semantics = [#tpu.dimension_semantics<parallel>], iteration_bounds = array<i64: 2>, scalar_prefetch = 0 : i64, scratch_operands = 0 : i64, tpu.core_type = #tpu.core_type<tc>, window_params = [{transform_indices = @transform_0, window_bounds = array<i64: 2, 8>}, {transform_indices = @transform_1, window_bounds = array<i64: 1, 8, 64>}, {pipeline_mode = #tpu.pipeline_mode<synchronous>, transform_indices = @transform_2, window_bounds = array<i64: 64, 64>}, {pipeline_mode = #tpu.pipeline_mode<synchronous>, transform_indices = @transform_3, window_bounds = array<i64: 4, 1, 64>}, {pipeline_mode = #tpu.pipeline_mode<synchronous>, transform_indices = @transform_4, window_bounds = array<i64: 8, 8, 8>}, {pipeline_mode = #tpu.pipeline_mode<synchronous>, transform_indices = @transform_5, window_bounds = array<i64: 2, 64, 64>}, {pipeline_mode = #tpu.pipeline_mode<synchronous>, transform_indices = @transform_6, window_bounds = array<i64: 2, 64, 64>}, {pipeline_mode = #tpu.pipeline_mode<synchronous>, transform_indices = @transform_7, window_bounds = array<i64: 2, 64, 64>}, {pipeline_mode = #tpu.pipeline_mode<synchronous>, transform_indices = @transform_8, window_bounds = array<i64: 6, 64, 136>}, {pipeline_mode = #tpu.pipeline_mode<synchronous>, transform_indices = @transform_9, window_bounds = array<i64: 6, 1, 136>}, {pipeline_mode = #tpu.pipeline_mode<synchronous>, transform_indices = @transform_10, window_bounds = array<i64: 6, 136, 8>}, {pipeline_mode = #tpu.pipeline_mode<synchronous>, transform_indices = @transform_11, window_bounds = array<i64: 8, 64>}, {pipeline_mode = #tpu.pipeline_mode<synchronous>, transform_indices = @transform_12, window_bounds = array<i64: 64, 32>}, {pipeline_mode = #tpu.pipeline_mode<synchronous>, transform_indices = @transform_13, window_bounds = array<i64: 32, 8>}, {pipeline_mode = #tpu.pipeline_mode<synchronous>, transform_indices = @transform_14, window_bounds = array<i64: 8, 128>}, {transform_indices = @transform_15, window_bounds = array<i64: 1, 8, 128>}]} {
    %c0 = arith.constant 0 : index
    %c0_0 = arith.constant 0 : index
    %0 = vector.load %arg12[%c0, %c0_0] : memref<8x64xf32, #tpu.memory_space<vmem>>, vector<8x64xf32>
    %c0_1 = arith.constant 0 : index
    %c0_2 = arith.constant 0 : index
    %c0_3 = arith.constant 0 : index
    %1 = vector.load %arg2[%c0_1, %c0_2, %c0_3] : memref<1x8x64xf32, #tpu.memory_space<vmem>>, vector<1x8x64xf32>
    %2 = vector.shape_cast %1 : vector<1x8x64xf32> to vector<8x64xf32>
    %c0_4 = arith.constant 0 : index
    %c0_5 = arith.constant 0 : index
    %3 = vector.load %arg3[%c0_4, %c0_5] : memref<64x64xf32, #tpu.memory_space<vmem>>, vector<64x64xf32>
    %cst = arith.constant dense<0.000000e+00> : vector<8x64xf32>
    %4 = tpu.matmul %2, %3, %cst {dimension_numbers = #tpu.dot_dimension_numbers<[1], [0], [0], [1], [0, 0, 1, 1], [], []>} : vector<8x64xf32>, vector<64x64xf32>, vector<8x64xf32> -> vector<8x64xf32>
    %cst_6 = arith.constant 0.000000e+00 : f32
    %5 = vector.broadcast %cst_6 : f32 to vector<8x64xf32>
    %c0_7 = arith.constant 0 : index
    %c0_8 = arith.constant 0 : index
    %c0_9 = arith.constant 0 : index
    %6 = vector.load %arg4[%c0_7, %c0_8, %c0_9] : memref<4x1x64xf32, #tpu.memory_space<vmem>>, vector<1x1x64xf32>
    %7 = vector.shape_cast %6 : vector<1x1x64xf32> to vector<1x64xf32>
    %8 = vector.broadcast %7 : vector<1x64xf32> to vector<8x64xf32>
    %9 = arith.mulf %4, %8 : vector<8x64xf32>
    %cst_10 = arith.constant dense<0.000000e+00> : vector<8x8xf32>
    %10 = tpu.matmul %9, %4, %cst_10 {dimension_numbers = #tpu.dot_dimension_numbers<[1], [1], [0], [0], [0, 0, 1, 0], [], []>} : vector<8x64xf32>, vector<8x64xf32>, vector<8x8xf32> -> vector<8x8xf32>
    %c0_11 = arith.constant 0 : index
    %c0_12 = arith.constant 0 : index
    %11 = memref.load %arg1[%c0_11, %c0_12] : memref<2x8xf32, #tpu.memory_space<smem>>
    %12 = vector.broadcast %11 : f32 to vector<8x8xf32>
    %13 = arith.mulf %10, %12 : vector<8x8xf32>
    %c0_13 = arith.constant 0 : index
    %c0_14 = arith.constant 0 : index
    %c0_15 = arith.constant 0 : index
    %14 = vector.load %arg5[%c0_13, %c0_14, %c0_15] : memref<8x8x8xf32, #tpu.memory_space<vmem>>, vector<1x8x8xf32>
    %15 = vector.shape_cast %14 : vector<1x8x8xf32> to vector<8x8xf32>
    %16 = arith.addf %13, %15 : vector<8x8xf32>
    %cst_16 = arith.constant dense<0xFF800000> : vector<8xf32>
    %17 = vector.multi_reduction <maximumf>, %16, %cst_16 [1] : vector<8x8xf32> to vector<8xf32>
    %18 = vector.shape_cast %17 : vector<8xf32> to vector<8x1xf32>
    %19 = vector.broadcast %18 : vector<8x1xf32> to vector<8x8xf32>
    %20 = arith.subf %16, %19 : vector<8x8xf32>
    %21 = math.exp %20 : vector<8x8xf32>
    %cst_17 = arith.constant dense<0.000000e+00> : vector<8xf32>
    %22 = vector.multi_reduction <add>, %21, %cst_17 [1] : vector<8x8xf32> to vector<8xf32>
    %23 = vector.shape_cast %22 : vector<8xf32> to vector<8x1xf32>
    %24 = vector.broadcast %23 : vector<8x1xf32> to vector<8x8xf32>
    %25 = arith.divf %21, %24 : vector<8x8xf32>
    %c0_18 = arith.constant 0 : index
    %c4 = arith.constant 4 : index
    %26 = memref.load %arg1[%c0_18, %c4] : memref<2x8xf32, #tpu.memory_space<smem>>
    %cst_19 = arith.constant dense<0.000000e+00> : vector<8x64xf32>
    %27 = tpu.matmul %25, %9, %cst_19 {dimension_numbers = #tpu.dot_dimension_numbers<[1], [0], [0], [1], [0, 0, 1, 1], [], []>} : vector<8x8xf32>, vector<8x64xf32>, vector<8x64xf32> -> vector<8x64xf32>
    %28 = vector.broadcast %26 : f32 to vector<8x64xf32>
    %29 = arith.mulf %28, %27 : vector<8x64xf32>
    %30 = arith.addf %5, %29 : vector<8x64xf32>
    %c1 = arith.constant 1 : index
    %c0_20 = arith.constant 0 : index
    %c0_21 = arith.constant 0 : index
    %31 = vector.load %arg4[%c1, %c0_20, %c0_21] : memref<4x1x64xf32, #tpu.memory_space<vmem>>, vector<1x1x64xf32>
    %32 = vector.shape_cast %31 : vector<1x1x64xf32> to vector<1x64xf32>
    %33 = vector.broadcast %32 : vector<1x64xf32> to vector<8x64xf32>
    %34 = arith.mulf %4, %33 : vector<8x64xf32>
    %cst_22 = arith.constant dense<0.000000e+00> : vector<8x8xf32>
    %35 = tpu.matmul %34, %4, %cst_22 {dimension_numbers = #tpu.dot_dimension_numbers<[1], [1], [0], [0], [0, 0, 1, 0], [], []>} : vector<8x64xf32>, vector<8x64xf32>, vector<8x8xf32> -> vector<8x8xf32>
    %c0_23 = arith.constant 0 : index
    %c1_24 = arith.constant 1 : index
    %36 = memref.load %arg1[%c0_23, %c1_24] : memref<2x8xf32, #tpu.memory_space<smem>>
    %37 = vector.broadcast %36 : f32 to vector<8x8xf32>
    %38 = arith.mulf %35, %37 : vector<8x8xf32>
    %c1_25 = arith.constant 1 : index
    %c0_26 = arith.constant 0 : index
    %c0_27 = arith.constant 0 : index
    %39 = vector.load %arg5[%c1_25, %c0_26, %c0_27] : memref<8x8x8xf32, #tpu.memory_space<vmem>>, vector<1x8x8xf32>
    %40 = vector.shape_cast %39 : vector<1x8x8xf32> to vector<8x8xf32>
    %41 = arith.addf %38, %40 : vector<8x8xf32>
    %cst_28 = arith.constant dense<0xFF800000> : vector<8xf32>
    %42 = vector.multi_reduction <maximumf>, %41, %cst_28 [1] : vector<8x8xf32> to vector<8xf32>
    %43 = vector.shape_cast %42 : vector<8xf32> to vector<8x1xf32>
    %44 = vector.broadcast %43 : vector<8x1xf32> to vector<8x8xf32>
    %45 = arith.subf %41, %44 : vector<8x8xf32>
    %46 = math.exp %45 : vector<8x8xf32>
    %cst_29 = arith.constant dense<0.000000e+00> : vector<8xf32>
    %47 = vector.multi_reduction <add>, %46, %cst_29 [1] : vector<8x8xf32> to vector<8xf32>
    %48 = vector.shape_cast %47 : vector<8xf32> to vector<8x1xf32>
    %49 = vector.broadcast %48 : vector<8x1xf32> to vector<8x8xf32>
    %50 = arith.divf %46, %49 : vector<8x8xf32>
    %c0_30 = arith.constant 0 : index
    %c5 = arith.constant 5 : index
    %51 = memref.load %arg1[%c0_30, %c5] : memref<2x8xf32, #tpu.memory_space<smem>>
    %cst_31 = arith.constant dense<0.000000e+00> : vector<8x64xf32>
    %52 = tpu.matmul %50, %34, %cst_31 {dimension_numbers = #tpu.dot_dimension_numbers<[1], [0], [0], [1], [0, 0, 1, 1], [], []>} : vector<8x8xf32>, vector<8x64xf32>, vector<8x64xf32> -> vector<8x64xf32>
    %53 = vector.broadcast %51 : f32 to vector<8x64xf32>
    %54 = arith.mulf %53, %52 : vector<8x64xf32>
    %55 = arith.addf %30, %54 : vector<8x64xf32>
    %c2 = arith.constant 2 : index
    %c0_32 = arith.constant 0 : index
    %c0_33 = arith.constant 0 : index
    %56 = vector.load %arg4[%c2, %c0_32, %c0_33] : memref<4x1x64xf32, #tpu.memory_space<vmem>>, vector<1x1x64xf32>
    %57 = vector.shape_cast %56 : vector<1x1x64xf32> to vector<1x64xf32>
    %58 = vector.broadcast %57 : vector<1x64xf32> to vector<8x64xf32>
    %59 = arith.mulf %4, %58 : vector<8x64xf32>
    %cst_34 = arith.constant dense<0.000000e+00> : vector<8x8xf32>
    %60 = tpu.matmul %59, %4, %cst_34 {dimension_numbers = #tpu.dot_dimension_numbers<[1], [1], [0], [0], [0, 0, 1, 0], [], []>} : vector<8x64xf32>, vector<8x64xf32>, vector<8x8xf32> -> vector<8x8xf32>
    %c0_35 = arith.constant 0 : index
    %c2_36 = arith.constant 2 : index
    %61 = memref.load %arg1[%c0_35, %c2_36] : memref<2x8xf32, #tpu.memory_space<smem>>
    %62 = vector.broadcast %61 : f32 to vector<8x8xf32>
    %63 = arith.mulf %60, %62 : vector<8x8xf32>
    %c2_37 = arith.constant 2 : index
    %c0_38 = arith.constant 0 : index
    %c0_39 = arith.constant 0 : index
    %64 = vector.load %arg5[%c2_37, %c0_38, %c0_39] : memref<8x8x8xf32, #tpu.memory_space<vmem>>, vector<1x8x8xf32>
    %65 = vector.shape_cast %64 : vector<1x8x8xf32> to vector<8x8xf32>
    %66 = arith.addf %63, %65 : vector<8x8xf32>
    %cst_40 = arith.constant dense<0xFF800000> : vector<8xf32>
    %67 = vector.multi_reduction <maximumf>, %66, %cst_40 [1] : vector<8x8xf32> to vector<8xf32>
    %68 = vector.shape_cast %67 : vector<8xf32> to vector<8x1xf32>
    %69 = vector.broadcast %68 : vector<8x1xf32> to vector<8x8xf32>
    %70 = arith.subf %66, %69 : vector<8x8xf32>
    %71 = math.exp %70 : vector<8x8xf32>
    %cst_41 = arith.constant dense<0.000000e+00> : vector<8xf32>
    %72 = vector.multi_reduction <add>, %71, %cst_41 [1] : vector<8x8xf32> to vector<8xf32>
    %73 = vector.shape_cast %72 : vector<8xf32> to vector<8x1xf32>
    %74 = vector.broadcast %73 : vector<8x1xf32> to vector<8x8xf32>
    %75 = arith.divf %71, %74 : vector<8x8xf32>
    %c0_42 = arith.constant 0 : index
    %c6 = arith.constant 6 : index
    %76 = memref.load %arg1[%c0_42, %c6] : memref<2x8xf32, #tpu.memory_space<smem>>
    %cst_43 = arith.constant dense<0.000000e+00> : vector<8x64xf32>
    %77 = tpu.matmul %75, %59, %cst_43 {dimension_numbers = #tpu.dot_dimension_numbers<[1], [0], [0], [1], [0, 0, 1, 1], [], []>} : vector<8x8xf32>, vector<8x64xf32>, vector<8x64xf32> -> vector<8x64xf32>
    %78 = vector.broadcast %76 : f32 to vector<8x64xf32>
    %79 = arith.mulf %78, %77 : vector<8x64xf32>
    %80 = arith.addf %55, %79 : vector<8x64xf32>
    %c3 = arith.constant 3 : index
    %c0_44 = arith.constant 0 : index
    %c0_45 = arith.constant 0 : index
    %81 = vector.load %arg4[%c3, %c0_44, %c0_45] : memref<4x1x64xf32, #tpu.memory_space<vmem>>, vector<1x1x64xf32>
    %82 = vector.shape_cast %81 : vector<1x1x64xf32> to vector<1x64xf32>
    %83 = vector.broadcast %82 : vector<1x64xf32> to vector<8x64xf32>
    %84 = arith.mulf %4, %83 : vector<8x64xf32>
    %cst_46 = arith.constant dense<0.000000e+00> : vector<8x8xf32>
    %85 = tpu.matmul %84, %4, %cst_46 {dimension_numbers = #tpu.dot_dimension_numbers<[1], [1], [0], [0], [0, 0, 1, 0], [], []>} : vector<8x64xf32>, vector<8x64xf32>, vector<8x8xf32> -> vector<8x8xf32>
    %c0_47 = arith.constant 0 : index
    %c3_48 = arith.constant 3 : index
    %86 = memref.load %arg1[%c0_47, %c3_48] : memref<2x8xf32, #tpu.memory_space<smem>>
    %87 = vector.broadcast %86 : f32 to vector<8x8xf32>
    %88 = arith.mulf %85, %87 : vector<8x8xf32>
    %c3_49 = arith.constant 3 : index
    %c0_50 = arith.constant 0 : index
    %c0_51 = arith.constant 0 : index
    %89 = vector.load %arg5[%c3_49, %c0_50, %c0_51] : memref<8x8x8xf32, #tpu.memory_space<vmem>>, vector<1x8x8xf32>
    %90 = vector.shape_cast %89 : vector<1x8x8xf32> to vector<8x8xf32>
    %91 = arith.addf %88, %90 : vector<8x8xf32>
    %cst_52 = arith.constant dense<0xFF800000> : vector<8xf32>
    %92 = vector.multi_reduction <maximumf>, %91, %cst_52 [1] : vector<8x8xf32> to vector<8xf32>
    %93 = vector.shape_cast %92 : vector<8xf32> to vector<8x1xf32>
    %94 = vector.broadcast %93 : vector<8x1xf32> to vector<8x8xf32>
    %95 = arith.subf %91, %94 : vector<8x8xf32>
    %96 = math.exp %95 : vector<8x8xf32>
    %cst_53 = arith.constant dense<0.000000e+00> : vector<8xf32>
    %97 = vector.multi_reduction <add>, %96, %cst_53 [1] : vector<8x8xf32> to vector<8xf32>
    %98 = vector.shape_cast %97 : vector<8xf32> to vector<8x1xf32>
    %99 = vector.broadcast %98 : vector<8x1xf32> to vector<8x8xf32>
    %100 = arith.divf %96, %99 : vector<8x8xf32>
    %c0_54 = arith.constant 0 : index
    %c7 = arith.constant 7 : index
    %101 = memref.load %arg1[%c0_54, %c7] : memref<2x8xf32, #tpu.memory_space<smem>>
    %cst_55 = arith.constant dense<0.000000e+00> : vector<8x64xf32>
    %102 = tpu.matmul %100, %84, %cst_55 {dimension_numbers = #tpu.dot_dimension_numbers<[1], [0], [0], [1], [0, 0, 1, 1], [], []>} : vector<8x8xf32>, vector<8x64xf32>, vector<8x64xf32> -> vector<8x64xf32>
    %103 = vector.broadcast %101 : f32 to vector<8x64xf32>
    %104 = arith.mulf %103, %102 : vector<8x64xf32>
    %105 = arith.addf %80, %104 : vector<8x64xf32>
    %106 = arith.addf %4, %105 : vector<8x64xf32>
    %107 = arith.mulf %106, %106 : vector<8x64xf32>
    %c0_56 = arith.constant 0 : index
    %c0_57 = arith.constant 0 : index
    %c0_58 = arith.constant 0 : index
    %108 = vector.load %arg9[%c0_56, %c0_57, %c0_58] : memref<6x64x136xf32, #tpu.memory_space<vmem>>, vector<1x64x136xf32>
    %109 = vector.shape_cast %108 : vector<1x64x136xf32> to vector<64x136xf32>
    %cst_59 = arith.constant dense<0.000000e+00> : vector<8x136xf32>
    %110 = tpu.matmul %107, %109, %cst_59 {dimension_numbers = #tpu.dot_dimension_numbers<[1], [0], [0], [1], [0, 0, 1, 1], [], []>} : vector<8x64xf32>, vector<64x136xf32>, vector<8x136xf32> -> vector<8x136xf32>
    %c0_60 = arith.constant 0 : index
    %c0_61 = arith.constant 0 : index
    %c0_62 = arith.constant 0 : index
    %111 = vector.load %arg10[%c0_60, %c0_61, %c0_62] : memref<6x1x136xf32, #tpu.memory_space<vmem>>, vector<1x1x136xf32>
    %112 = vector.shape_cast %111 : vector<1x1x136xf32> to vector<1x136xf32>
    %113 = vector.broadcast %112 : vector<1x136xf32> to vector<8x136xf32>
    %114 = arith.addf %110, %113 : vector<8x136xf32>
    %cst_63 = arith.constant 0.000000e+00 : f32
    %115 = vector.broadcast %cst_63 : f32 to vector<8x136xf32>
    %116 = arith.maximumf %114, %115 : vector<8x136xf32>
    %c0_64 = arith.constant 0 : index
    %c0_65 = arith.constant 0 : index
    %c0_66 = arith.constant 0 : index
    %117 = vector.load %arg11[%c0_64, %c0_65, %c0_66] : memref<6x136x8xf32, #tpu.memory_space<vmem>>, vector<1x136x8xf32>
    %118 = vector.shape_cast %117 : vector<1x136x8xf32> to vector<136x8xf32>
    %cst_67 = arith.constant dense<0.000000e+00> : vector<8x8xf32>
    %119 = tpu.matmul %116, %118, %cst_67 {dimension_numbers = #tpu.dot_dimension_numbers<[1], [0], [0], [1], [0, 0, 1, 1], [], []>} : vector<8x136xf32>, vector<136x8xf32>, vector<8x8xf32> -> vector<8x8xf32>
    %120 = arith.negf %119 : vector<8x8xf32>
    %121 = math.exp %120 : vector<8x8xf32>
    %cst_68 = arith.constant 1.000000e+00 : f32
    %122 = vector.broadcast %cst_68 : f32 to vector<8x8xf32>
    %123 = arith.addf %122, %121 : vector<8x8xf32>
    %124 = arith.divf %122, %123 : vector<8x8xf32>
    %cst_69 = arith.constant dense<0.000000e+00> : vector<8x64xf32>
    %125 = tpu.matmul %124, %0, %cst_69 {dimension_numbers = #tpu.dot_dimension_numbers<[1], [0], [0], [1], [0, 0, 1, 1], [], []>} : vector<8x8xf32>, vector<8x64xf32>, vector<8x64xf32> -> vector<8x64xf32>
    %126 = arith.mulf %106, %125 : vector<8x64xf32>
    %127 = arith.addf %106, %126 : vector<8x64xf32>
    %c0_70 = arith.constant 0 : index
    %c0_71 = arith.constant 0 : index
    %c0_72 = arith.constant 0 : index
    %128 = vector.load %arg6[%c0_70, %c0_71, %c0_72] : memref<2x64x64xf32, #tpu.memory_space<vmem>>, vector<1x64x64xf32>
    %129 = vector.shape_cast %128 : vector<1x64x64xf32> to vector<64x64xf32>
    %cst_73 = arith.constant dense<0.000000e+00> : vector<8x64xf32>
    %130 = tpu.matmul %126, %129, %cst_73 {dimension_numbers = #tpu.dot_dimension_numbers<[1], [0], [0], [1], [0, 0, 1, 1], [], []>} : vector<8x64xf32>, vector<64x64xf32>, vector<8x64xf32> -> vector<8x64xf32>
    %131 = arith.addf %127, %130 : vector<8x64xf32>
    %c0_74 = arith.constant 0 : index
    %c0_75 = arith.constant 0 : index
    %c0_76 = arith.constant 0 : index
    %132 = vector.load %arg7[%c0_74, %c0_75, %c0_76] : memref<2x64x64xf32, #tpu.memory_space<vmem>>, vector<1x64x64xf32>
    %133 = vector.shape_cast %132 : vector<1x64x64xf32> to vector<64x64xf32>
    %cst_77 = arith.constant dense<0.000000e+00> : vector<8x64xf32>
    %134 = tpu.matmul %131, %133, %cst_77 {dimension_numbers = #tpu.dot_dimension_numbers<[1], [0], [0], [1], [0, 0, 1, 1], [], []>} : vector<8x64xf32>, vector<64x64xf32>, vector<8x64xf32> -> vector<8x64xf32>
    %135 = arith.mulf %134, %134 : vector<8x64xf32>
    %c1_78 = arith.constant 1 : index
    %c0_79 = arith.constant 0 : index
    %c0_80 = arith.constant 0 : index
    %136 = vector.load %arg9[%c1_78, %c0_79, %c0_80] : memref<6x64x136xf32, #tpu.memory_space<vmem>>, vector<1x64x136xf32>
    %137 = vector.shape_cast %136 : vector<1x64x136xf32> to vector<64x136xf32>
    %cst_81 = arith.constant dense<0.000000e+00> : vector<8x136xf32>
    %138 = tpu.matmul %135, %137, %cst_81 {dimension_numbers = #tpu.dot_dimension_numbers<[1], [0], [0], [1], [0, 0, 1, 1], [], []>} : vector<8x64xf32>, vector<64x136xf32>, vector<8x136xf32> -> vector<8x136xf32>
    %c1_82 = arith.constant 1 : index
    %c0_83 = arith.constant 0 : index
    %c0_84 = arith.constant 0 : index
    %139 = vector.load %arg10[%c1_82, %c0_83, %c0_84] : memref<6x1x136xf32, #tpu.memory_space<vmem>>, vector<1x1x136xf32>
    %140 = vector.shape_cast %139 : vector<1x1x136xf32> to vector<1x136xf32>
    %141 = vector.broadcast %140 : vector<1x136xf32> to vector<8x136xf32>
    %142 = arith.addf %138, %141 : vector<8x136xf32>
    %cst_85 = arith.constant 0.000000e+00 : f32
    %143 = vector.broadcast %cst_85 : f32 to vector<8x136xf32>
    %144 = arith.maximumf %142, %143 : vector<8x136xf32>
    %c1_86 = arith.constant 1 : index
    %c0_87 = arith.constant 0 : index
    %c0_88 = arith.constant 0 : index
    %145 = vector.load %arg11[%c1_86, %c0_87, %c0_88] : memref<6x136x8xf32, #tpu.memory_space<vmem>>, vector<1x136x8xf32>
    %146 = vector.shape_cast %145 : vector<1x136x8xf32> to vector<136x8xf32>
    %cst_89 = arith.constant dense<0.000000e+00> : vector<8x8xf32>
    %147 = tpu.matmul %144, %146, %cst_89 {dimension_numbers = #tpu.dot_dimension_numbers<[1], [0], [0], [1], [0, 0, 1, 1], [], []>} : vector<8x136xf32>, vector<136x8xf32>, vector<8x8xf32> -> vector<8x8xf32>
    %148 = arith.negf %147 : vector<8x8xf32>
    %149 = math.exp %148 : vector<8x8xf32>
    %cst_90 = arith.constant 1.000000e+00 : f32
    %150 = vector.broadcast %cst_90 : f32 to vector<8x8xf32>
    %151 = arith.addf %150, %149 : vector<8x8xf32>
    %152 = arith.divf %150, %151 : vector<8x8xf32>
    %cst_91 = arith.constant dense<0.000000e+00> : vector<8x64xf32>
    %153 = tpu.matmul %152, %0, %cst_91 {dimension_numbers = #tpu.dot_dimension_numbers<[1], [0], [0], [1], [0, 0, 1, 1], [], []>} : vector<8x8xf32>, vector<8x64xf32>, vector<8x64xf32> -> vector<8x64xf32>
    %154 = arith.mulf %134, %153 : vector<8x64xf32>
    %c0_92 = arith.constant 0 : index
    %c0_93 = arith.constant 0 : index
    %c0_94 = arith.constant 0 : index
    %155 = vector.load %arg8[%c0_92, %c0_93, %c0_94] : memref<2x64x64xf32, #tpu.memory_space<vmem>>, vector<1x64x64xf32>
    %156 = vector.shape_cast %155 : vector<1x64x64xf32> to vector<64x64xf32>
    %cst_95 = arith.constant dense<0.000000e+00> : vector<8x64xf32>
    %157 = tpu.matmul %154, %156, %cst_95 {dimension_numbers = #tpu.dot_dimension_numbers<[1], [0], [0], [1], [0, 0, 1, 1], [], []>} : vector<8x64xf32>, vector<64x64xf32>, vector<8x64xf32> -> vector<8x64xf32>
    %158 = arith.mulf %157, %157 : vector<8x64xf32>
    %c2_96 = arith.constant 2 : index
    %c0_97 = arith.constant 0 : index
    %c0_98 = arith.constant 0 : index
    %159 = vector.load %arg9[%c2_96, %c0_97, %c0_98] : memref<6x64x136xf32, #tpu.memory_space<vmem>>, vector<1x64x136xf32>
    %160 = vector.shape_cast %159 : vector<1x64x136xf32> to vector<64x136xf32>
    %cst_99 = arith.constant dense<0.000000e+00> : vector<8x136xf32>
    %161 = tpu.matmul %158, %160, %cst_99 {dimension_numbers = #tpu.dot_dimension_numbers<[1], [0], [0], [1], [0, 0, 1, 1], [], []>} : vector<8x64xf32>, vector<64x136xf32>, vector<8x136xf32> -> vector<8x136xf32>
    %c2_100 = arith.constant 2 : index
    %c0_101 = arith.constant 0 : index
    %c0_102 = arith.constant 0 : index
    %162 = vector.load %arg10[%c2_100, %c0_101, %c0_102] : memref<6x1x136xf32, #tpu.memory_space<vmem>>, vector<1x1x136xf32>
    %163 = vector.shape_cast %162 : vector<1x1x136xf32> to vector<1x136xf32>
    %164 = vector.broadcast %163 : vector<1x136xf32> to vector<8x136xf32>
    %165 = arith.addf %161, %164 : vector<8x136xf32>
    %cst_103 = arith.constant 0.000000e+00 : f32
    %166 = vector.broadcast %cst_103 : f32 to vector<8x136xf32>
    %167 = arith.maximumf %165, %166 : vector<8x136xf32>
    %c2_104 = arith.constant 2 : index
    %c0_105 = arith.constant 0 : index
    %c0_106 = arith.constant 0 : index
    %168 = vector.load %arg11[%c2_104, %c0_105, %c0_106] : memref<6x136x8xf32, #tpu.memory_space<vmem>>, vector<1x136x8xf32>
    %169 = vector.shape_cast %168 : vector<1x136x8xf32> to vector<136x8xf32>
    %cst_107 = arith.constant dense<0.000000e+00> : vector<8x8xf32>
    %170 = tpu.matmul %167, %169, %cst_107 {dimension_numbers = #tpu.dot_dimension_numbers<[1], [0], [0], [1], [0, 0, 1, 1], [], []>} : vector<8x136xf32>, vector<136x8xf32>, vector<8x8xf32> -> vector<8x8xf32>
    %171 = arith.negf %170 : vector<8x8xf32>
    %172 = math.exp %171 : vector<8x8xf32>
    %cst_108 = arith.constant 1.000000e+00 : f32
    %173 = vector.broadcast %cst_108 : f32 to vector<8x8xf32>
    %174 = arith.addf %173, %172 : vector<8x8xf32>
    %175 = arith.divf %173, %174 : vector<8x8xf32>
    %cst_109 = arith.constant dense<0.000000e+00> : vector<8x64xf32>
    %176 = tpu.matmul %175, %0, %cst_109 {dimension_numbers = #tpu.dot_dimension_numbers<[1], [0], [0], [1], [0, 0, 1, 1], [], []>} : vector<8x8xf32>, vector<8x64xf32>, vector<8x64xf32> -> vector<8x64xf32>
    %177 = arith.mulf %157, %176 : vector<8x64xf32>
    %178 = arith.addf %131, %177 : vector<8x64xf32>
    %cst_110 = arith.constant 0.000000e+00 : f32
    %179 = vector.broadcast %cst_110 : f32 to vector<8x64xf32>
    %c0_111 = arith.constant 0 : index
    %c0_112 = arith.constant 0 : index
    %c0_113 = arith.constant 0 : index
    %180 = vector.load %arg4[%c0_111, %c0_112, %c0_113] : memref<4x1x64xf32, #tpu.memory_space<vmem>>, vector<1x1x64xf32>
    %181 = vector.shape_cast %180 : vector<1x1x64xf32> to vector<1x64xf32>
    %182 = vector.broadcast %181 : vector<1x64xf32> to vector<8x64xf32>
    %183 = arith.mulf %178, %182 : vector<8x64xf32>
    %cst_114 = arith.constant dense<0.000000e+00> : vector<8x8xf32>
    %184 = tpu.matmul %183, %178, %cst_114 {dimension_numbers = #tpu.dot_dimension_numbers<[1], [1], [0], [0], [0, 0, 1, 0], [], []>} : vector<8x64xf32>, vector<8x64xf32>, vector<8x8xf32> -> vector<8x8xf32>
    %c1_115 = arith.constant 1 : index
    %c0_116 = arith.constant 0 : index
    %185 = memref.load %arg1[%c1_115, %c0_116] : memref<2x8xf32, #tpu.memory_space<smem>>
    %186 = vector.broadcast %185 : f32 to vector<8x8xf32>
    %187 = arith.mulf %184, %186 : vector<8x8xf32>
    %c4_117 = arith.constant 4 : index
    %c0_118 = arith.constant 0 : index
    %c0_119 = arith.constant 0 : index
    %188 = vector.load %arg5[%c4_117, %c0_118, %c0_119] : memref<8x8x8xf32, #tpu.memory_space<vmem>>, vector<1x8x8xf32>
    %189 = vector.shape_cast %188 : vector<1x8x8xf32> to vector<8x8xf32>
    %190 = arith.addf %187, %189 : vector<8x8xf32>
    %cst_120 = arith.constant dense<0xFF800000> : vector<8xf32>
    %191 = vector.multi_reduction <maximumf>, %190, %cst_120 [1] : vector<8x8xf32> to vector<8xf32>
    %192 = vector.shape_cast %191 : vector<8xf32> to vector<8x1xf32>
    %193 = vector.broadcast %192 : vector<8x1xf32> to vector<8x8xf32>
    %194 = arith.subf %190, %193 : vector<8x8xf32>
    %195 = math.exp %194 : vector<8x8xf32>
    %cst_121 = arith.constant dense<0.000000e+00> : vector<8xf32>
    %196 = vector.multi_reduction <add>, %195, %cst_121 [1] : vector<8x8xf32> to vector<8xf32>
    %197 = vector.shape_cast %196 : vector<8xf32> to vector<8x1xf32>
    %198 = vector.broadcast %197 : vector<8x1xf32> to vector<8x8xf32>
    %199 = arith.divf %195, %198 : vector<8x8xf32>
    %c1_122 = arith.constant 1 : index
    %c4_123 = arith.constant 4 : index
    %200 = memref.load %arg1[%c1_122, %c4_123] : memref<2x8xf32, #tpu.memory_space<smem>>
    %cst_124 = arith.constant dense<0.000000e+00> : vector<8x64xf32>
    %201 = tpu.matmul %199, %183, %cst_124 {dimension_numbers = #tpu.dot_dimension_numbers<[1], [0], [0], [1], [0, 0, 1, 1], [], []>} : vector<8x8xf32>, vector<8x64xf32>, vector<8x64xf32> -> vector<8x64xf32>
    %202 = vector.broadcast %200 : f32 to vector<8x64xf32>
    %203 = arith.mulf %202, %201 : vector<8x64xf32>
    %204 = arith.addf %179, %203 : vector<8x64xf32>
    %c1_125 = arith.constant 1 : index
    %c0_126 = arith.constant 0 : index
    %c0_127 = arith.constant 0 : index
    %205 = vector.load %arg4[%c1_125, %c0_126, %c0_127] : memref<4x1x64xf32, #tpu.memory_space<vmem>>, vector<1x1x64xf32>
    %206 = vector.shape_cast %205 : vector<1x1x64xf32> to vector<1x64xf32>
    %207 = vector.broadcast %206 : vector<1x64xf32> to vector<8x64xf32>
    %208 = arith.mulf %178, %207 : vector<8x64xf32>
    %cst_128 = arith.constant dense<0.000000e+00> : vector<8x8xf32>
    %209 = tpu.matmul %208, %178, %cst_128 {dimension_numbers = #tpu.dot_dimension_numbers<[1], [1], [0], [0], [0, 0, 1, 0], [], []>} : vector<8x64xf32>, vector<8x64xf32>, vector<8x8xf32> -> vector<8x8xf32>
    %c1_129 = arith.constant 1 : index
    %c1_130 = arith.constant 1 : index
    %210 = memref.load %arg1[%c1_129, %c1_130] : memref<2x8xf32, #tpu.memory_space<smem>>
    %211 = vector.broadcast %210 : f32 to vector<8x8xf32>
    %212 = arith.mulf %209, %211 : vector<8x8xf32>
    %c5_131 = arith.constant 5 : index
    %c0_132 = arith.constant 0 : index
    %c0_133 = arith.constant 0 : index
    %213 = vector.load %arg5[%c5_131, %c0_132, %c0_133] : memref<8x8x8xf32, #tpu.memory_space<vmem>>, vector<1x8x8xf32>
    %214 = vector.shape_cast %213 : vector<1x8x8xf32> to vector<8x8xf32>
    %215 = arith.addf %212, %214 : vector<8x8xf32>
    %cst_134 = arith.constant dense<0xFF800000> : vector<8xf32>
    %216 = vector.multi_reduction <maximumf>, %215, %cst_134 [1] : vector<8x8xf32> to vector<8xf32>
    %217 = vector.shape_cast %216 : vector<8xf32> to vector<8x1xf32>
    %218 = vector.broadcast %217 : vector<8x1xf32> to vector<8x8xf32>
    %219 = arith.subf %215, %218 : vector<8x8xf32>
    %220 = math.exp %219 : vector<8x8xf32>
    %cst_135 = arith.constant dense<0.000000e+00> : vector<8xf32>
    %221 = vector.multi_reduction <add>, %220, %cst_135 [1] : vector<8x8xf32> to vector<8xf32>
    %222 = vector.shape_cast %221 : vector<8xf32> to vector<8x1xf32>
    %223 = vector.broadcast %222 : vector<8x1xf32> to vector<8x8xf32>
    %224 = arith.divf %220, %223 : vector<8x8xf32>
    %c1_136 = arith.constant 1 : index
    %c5_137 = arith.constant 5 : index
    %225 = memref.load %arg1[%c1_136, %c5_137] : memref<2x8xf32, #tpu.memory_space<smem>>
    %cst_138 = arith.constant dense<0.000000e+00> : vector<8x64xf32>
    %226 = tpu.matmul %224, %208, %cst_138 {dimension_numbers = #tpu.dot_dimension_numbers<[1], [0], [0], [1], [0, 0, 1, 1], [], []>} : vector<8x8xf32>, vector<8x64xf32>, vector<8x64xf32> -> vector<8x64xf32>
    %227 = vector.broadcast %225 : f32 to vector<8x64xf32>
    %228 = arith.mulf %227, %226 : vector<8x64xf32>
    %229 = arith.addf %204, %228 : vector<8x64xf32>
    %c2_139 = arith.constant 2 : index
    %c0_140 = arith.constant 0 : index
    %c0_141 = arith.constant 0 : index
    %230 = vector.load %arg4[%c2_139, %c0_140, %c0_141] : memref<4x1x64xf32, #tpu.memory_space<vmem>>, vector<1x1x64xf32>
    %231 = vector.shape_cast %230 : vector<1x1x64xf32> to vector<1x64xf32>
    %232 = vector.broadcast %231 : vector<1x64xf32> to vector<8x64xf32>
    %233 = arith.mulf %178, %232 : vector<8x64xf32>
    %cst_142 = arith.constant dense<0.000000e+00> : vector<8x8xf32>
    %234 = tpu.matmul %233, %178, %cst_142 {dimension_numbers = #tpu.dot_dimension_numbers<[1], [1], [0], [0], [0, 0, 1, 0], [], []>} : vector<8x64xf32>, vector<8x64xf32>, vector<8x8xf32> -> vector<8x8xf32>
    %c1_143 = arith.constant 1 : index
    %c2_144 = arith.constant 2 : index
    %235 = memref.load %arg1[%c1_143, %c2_144] : memref<2x8xf32, #tpu.memory_space<smem>>
    %236 = vector.broadcast %235 : f32 to vector<8x8xf32>
    %237 = arith.mulf %234, %236 : vector<8x8xf32>
    %c6_145 = arith.constant 6 : index
    %c0_146 = arith.constant 0 : index
    %c0_147 = arith.constant 0 : index
    %238 = vector.load %arg5[%c6_145, %c0_146, %c0_147] : memref<8x8x8xf32, #tpu.memory_space<vmem>>, vector<1x8x8xf32>
    %239 = vector.shape_cast %238 : vector<1x8x8xf32> to vector<8x8xf32>
    %240 = arith.addf %237, %239 : vector<8x8xf32>
    %cst_148 = arith.constant dense<0xFF800000> : vector<8xf32>
    %241 = vector.multi_reduction <maximumf>, %240, %cst_148 [1] : vector<8x8xf32> to vector<8xf32>
    %242 = vector.shape_cast %241 : vector<8xf32> to vector<8x1xf32>
    %243 = vector.broadcast %242 : vector<8x1xf32> to vector<8x8xf32>
    %244 = arith.subf %240, %243 : vector<8x8xf32>
    %245 = math.exp %244 : vector<8x8xf32>
    %cst_149 = arith.constant dense<0.000000e+00> : vector<8xf32>
    %246 = vector.multi_reduction <add>, %245, %cst_149 [1] : vector<8x8xf32> to vector<8xf32>
    %247 = vector.shape_cast %246 : vector<8xf32> to vector<8x1xf32>
    %248 = vector.broadcast %247 : vector<8x1xf32> to vector<8x8xf32>
    %249 = arith.divf %245, %248 : vector<8x8xf32>
    %c1_150 = arith.constant 1 : index
    %c6_151 = arith.constant 6 : index
    %250 = memref.load %arg1[%c1_150, %c6_151] : memref<2x8xf32, #tpu.memory_space<smem>>
    %cst_152 = arith.constant dense<0.000000e+00> : vector<8x64xf32>
    %251 = tpu.matmul %249, %233, %cst_152 {dimension_numbers = #tpu.dot_dimension_numbers<[1], [0], [0], [1], [0, 0, 1, 1], [], []>} : vector<8x8xf32>, vector<8x64xf32>, vector<8x64xf32> -> vector<8x64xf32>
    %252 = vector.broadcast %250 : f32 to vector<8x64xf32>
    %253 = arith.mulf %252, %251 : vector<8x64xf32>
    %254 = arith.addf %229, %253 : vector<8x64xf32>
    %c3_153 = arith.constant 3 : index
    %c0_154 = arith.constant 0 : index
    %c0_155 = arith.constant 0 : index
    %255 = vector.load %arg4[%c3_153, %c0_154, %c0_155] : memref<4x1x64xf32, #tpu.memory_space<vmem>>, vector<1x1x64xf32>
    %256 = vector.shape_cast %255 : vector<1x1x64xf32> to vector<1x64xf32>
    %257 = vector.broadcast %256 : vector<1x64xf32> to vector<8x64xf32>
    %258 = arith.mulf %178, %257 : vector<8x64xf32>
    %cst_156 = arith.constant dense<0.000000e+00> : vector<8x8xf32>
    %259 = tpu.matmul %258, %178, %cst_156 {dimension_numbers = #tpu.dot_dimension_numbers<[1], [1], [0], [0], [0, 0, 1, 0], [], []>} : vector<8x64xf32>, vector<8x64xf32>, vector<8x8xf32> -> vector<8x8xf32>
    %c1_157 = arith.constant 1 : index
    %c3_158 = arith.constant 3 : index
    %260 = memref.load %arg1[%c1_157, %c3_158] : memref<2x8xf32, #tpu.memory_space<smem>>
    %261 = vector.broadcast %260 : f32 to vector<8x8xf32>
    %262 = arith.mulf %259, %261 : vector<8x8xf32>
    %c7_159 = arith.constant 7 : index
    %c0_160 = arith.constant 0 : index
    %c0_161 = arith.constant 0 : index
    %263 = vector.load %arg5[%c7_159, %c0_160, %c0_161] : memref<8x8x8xf32, #tpu.memory_space<vmem>>, vector<1x8x8xf32>
    %264 = vector.shape_cast %263 : vector<1x8x8xf32> to vector<8x8xf32>
    %265 = arith.addf %262, %264 : vector<8x8xf32>
    %cst_162 = arith.constant dense<0xFF800000> : vector<8xf32>
    %266 = vector.multi_reduction <maximumf>, %265, %cst_162 [1] : vector<8x8xf32> to vector<8xf32>
    %267 = vector.shape_cast %266 : vector<8xf32> to vector<8x1xf32>
    %268 = vector.broadcast %267 : vector<8x1xf32> to vector<8x8xf32>
    %269 = arith.subf %265, %268 : vector<8x8xf32>
    %270 = math.exp %269 : vector<8x8xf32>
    %cst_163 = arith.constant dense<0.000000e+00> : vector<8xf32>
    %271 = vector.multi_reduction <add>, %270, %cst_163 [1] : vector<8x8xf32> to vector<8xf32>
    %272 = vector.shape_cast %271 : vector<8xf32> to vector<8x1xf32>
    %273 = vector.broadcast %272 : vector<8x1xf32> to vector<8x8xf32>
    %274 = arith.divf %270, %273 : vector<8x8xf32>
    %c1_164 = arith.constant 1 : index
    %c7_165 = arith.constant 7 : index
    %275 = memref.load %arg1[%c1_164, %c7_165] : memref<2x8xf32, #tpu.memory_space<smem>>
    %cst_166 = arith.constant dense<0.000000e+00> : vector<8x64xf32>
    %276 = tpu.matmul %274, %258, %cst_166 {dimension_numbers = #tpu.dot_dimension_numbers<[1], [0], [0], [1], [0, 0, 1, 1], [], []>} : vector<8x8xf32>, vector<8x64xf32>, vector<8x64xf32> -> vector<8x64xf32>
    %277 = vector.broadcast %275 : f32 to vector<8x64xf32>
    %278 = arith.mulf %277, %276 : vector<8x64xf32>
    %279 = arith.addf %254, %278 : vector<8x64xf32>
    %280 = arith.addf %178, %279 : vector<8x64xf32>
    %281 = arith.mulf %280, %280 : vector<8x64xf32>
    %c3_167 = arith.constant 3 : index
    %c0_168 = arith.constant 0 : index
    %c0_169 = arith.constant 0 : index
    %282 = vector.load %arg9[%c3_167, %c0_168, %c0_169] : memref<6x64x136xf32, #tpu.memory_space<vmem>>, vector<1x64x136xf32>
    %283 = vector.shape_cast %282 : vector<1x64x136xf32> to vector<64x136xf32>
    %cst_170 = arith.constant dense<0.000000e+00> : vector<8x136xf32>
    %284 = tpu.matmul %281, %283, %cst_170 {dimension_numbers = #tpu.dot_dimension_numbers<[1], [0], [0], [1], [0, 0, 1, 1], [], []>} : vector<8x64xf32>, vector<64x136xf32>, vector<8x136xf32> -> vector<8x136xf32>
    %c3_171 = arith.constant 3 : index
    %c0_172 = arith.constant 0 : index
    %c0_173 = arith.constant 0 : index
    %285 = vector.load %arg10[%c3_171, %c0_172, %c0_173] : memref<6x1x136xf32, #tpu.memory_space<vmem>>, vector<1x1x136xf32>
    %286 = vector.shape_cast %285 : vector<1x1x136xf32> to vector<1x136xf32>
    %287 = vector.broadcast %286 : vector<1x136xf32> to vector<8x136xf32>
    %288 = arith.addf %284, %287 : vector<8x136xf32>
    %cst_174 = arith.constant 0.000000e+00 : f32
    %289 = vector.broadcast %cst_174 : f32 to vector<8x136xf32>
    %290 = arith.maximumf %288, %289 : vector<8x136xf32>
    %c3_175 = arith.constant 3 : index
    %c0_176 = arith.constant 0 : index
    %c0_177 = arith.constant 0 : index
    %291 = vector.load %arg11[%c3_175, %c0_176, %c0_177] : memref<6x136x8xf32, #tpu.memory_space<vmem>>, vector<1x136x8xf32>
    %292 = vector.shape_cast %291 : vector<1x136x8xf32> to vector<136x8xf32>
    %cst_178 = arith.constant dense<0.000000e+00> : vector<8x8xf32>
    %293 = tpu.matmul %290, %292, %cst_178 {dimension_numbers = #tpu.dot_dimension_numbers<[1], [0], [0], [1], [0, 0, 1, 1], [], []>} : vector<8x136xf32>, vector<136x8xf32>, vector<8x8xf32> -> vector<8x8xf32>
    %294 = arith.negf %293 : vector<8x8xf32>
    %295 = math.exp %294 : vector<8x8xf32>
    %cst_179 = arith.constant 1.000000e+00 : f32
    %296 = vector.broadcast %cst_179 : f32 to vector<8x8xf32>
    %297 = arith.addf %296, %295 : vector<8x8xf32>
    %298 = arith.divf %296, %297 : vector<8x8xf32>
    %cst_180 = arith.constant dense<0.000000e+00> : vector<8x64xf32>
    %299 = tpu.matmul %298, %0, %cst_180 {dimension_numbers = #tpu.dot_dimension_numbers<[1], [0], [0], [1], [0, 0, 1, 1], [], []>} : vector<8x8xf32>, vector<8x64xf32>, vector<8x64xf32> -> vector<8x64xf32>
    %300 = arith.mulf %280, %299 : vector<8x64xf32>
    %301 = arith.addf %280, %300 : vector<8x64xf32>
    %c1_181 = arith.constant 1 : index
    %c0_182 = arith.constant 0 : index
    %c0_183 = arith.constant 0 : index
    %302 = vector.load %arg6[%c1_181, %c0_182, %c0_183] : memref<2x64x64xf32, #tpu.memory_space<vmem>>, vector<1x64x64xf32>
    %303 = vector.shape_cast %302 : vector<1x64x64xf32> to vector<64x64xf32>
    %cst_184 = arith.constant dense<0.000000e+00> : vector<8x64xf32>
    %304 = tpu.matmul %300, %303, %cst_184 {dimension_numbers = #tpu.dot_dimension_numbers<[1], [0], [0], [1], [0, 0, 1, 1], [], []>} : vector<8x64xf32>, vector<64x64xf32>, vector<8x64xf32> -> vector<8x64xf32>
    %305 = arith.addf %301, %304 : vector<8x64xf32>
    %c1_185 = arith.constant 1 : index
    %c0_186 = arith.constant 0 : index
    %c0_187 = arith.constant 0 : index
    %306 = vector.load %arg7[%c1_185, %c0_186, %c0_187] : memref<2x64x64xf32, #tpu.memory_space<vmem>>, vector<1x64x64xf32>
    %307 = vector.shape_cast %306 : vector<1x64x64xf32> to vector<64x64xf32>
    %cst_188 = arith.constant dense<0.000000e+00> : vector<8x64xf32>
    %308 = tpu.matmul %305, %307, %cst_188 {dimension_numbers = #tpu.dot_dimension_numbers<[1], [0], [0], [1], [0, 0, 1, 1], [], []>} : vector<8x64xf32>, vector<64x64xf32>, vector<8x64xf32> -> vector<8x64xf32>
    %309 = arith.mulf %308, %308 : vector<8x64xf32>
    %c4_189 = arith.constant 4 : index
    %c0_190 = arith.constant 0 : index
    %c0_191 = arith.constant 0 : index
    %310 = vector.load %arg9[%c4_189, %c0_190, %c0_191] : memref<6x64x136xf32, #tpu.memory_space<vmem>>, vector<1x64x136xf32>
    %311 = vector.shape_cast %310 : vector<1x64x136xf32> to vector<64x136xf32>
    %cst_192 = arith.constant dense<0.000000e+00> : vector<8x136xf32>
    %312 = tpu.matmul %309, %311, %cst_192 {dimension_numbers = #tpu.dot_dimension_numbers<[1], [0], [0], [1], [0, 0, 1, 1], [], []>} : vector<8x64xf32>, vector<64x136xf32>, vector<8x136xf32> -> vector<8x136xf32>
    %c4_193 = arith.constant 4 : index
    %c0_194 = arith.constant 0 : index
    %c0_195 = arith.constant 0 : index
    %313 = vector.load %arg10[%c4_193, %c0_194, %c0_195] : memref<6x1x136xf32, #tpu.memory_space<vmem>>, vector<1x1x136xf32>
    %314 = vector.shape_cast %313 : vector<1x1x136xf32> to vector<1x136xf32>
    %315 = vector.broadcast %314 : vector<1x136xf32> to vector<8x136xf32>
    %316 = arith.addf %312, %315 : vector<8x136xf32>
    %cst_196 = arith.constant 0.000000e+00 : f32
    %317 = vector.broadcast %cst_196 : f32 to vector<8x136xf32>
    %318 = arith.maximumf %316, %317 : vector<8x136xf32>
    %c4_197 = arith.constant 4 : index
    %c0_198 = arith.constant 0 : index
    %c0_199 = arith.constant 0 : index
    %319 = vector.load %arg11[%c4_197, %c0_198, %c0_199] : memref<6x136x8xf32, #tpu.memory_space<vmem>>, vector<1x136x8xf32>
    %320 = vector.shape_cast %319 : vector<1x136x8xf32> to vector<136x8xf32>
    %cst_200 = arith.constant dense<0.000000e+00> : vector<8x8xf32>
    %321 = tpu.matmul %318, %320, %cst_200 {dimension_numbers = #tpu.dot_dimension_numbers<[1], [0], [0], [1], [0, 0, 1, 1], [], []>} : vector<8x136xf32>, vector<136x8xf32>, vector<8x8xf32> -> vector<8x8xf32>
    %322 = arith.negf %321 : vector<8x8xf32>
    %323 = math.exp %322 : vector<8x8xf32>
    %cst_201 = arith.constant 1.000000e+00 : f32
    %324 = vector.broadcast %cst_201 : f32 to vector<8x8xf32>
    %325 = arith.addf %324, %323 : vector<8x8xf32>
    %326 = arith.divf %324, %325 : vector<8x8xf32>
    %cst_202 = arith.constant dense<0.000000e+00> : vector<8x64xf32>
    %327 = tpu.matmul %326, %0, %cst_202 {dimension_numbers = #tpu.dot_dimension_numbers<[1], [0], [0], [1], [0, 0, 1, 1], [], []>} : vector<8x8xf32>, vector<8x64xf32>, vector<8x64xf32> -> vector<8x64xf32>
    %328 = arith.mulf %308, %327 : vector<8x64xf32>
    %c1_203 = arith.constant 1 : index
    %c0_204 = arith.constant 0 : index
    %c0_205 = arith.constant 0 : index
    %329 = vector.load %arg8[%c1_203, %c0_204, %c0_205] : memref<2x64x64xf32, #tpu.memory_space<vmem>>, vector<1x64x64xf32>
    %330 = vector.shape_cast %329 : vector<1x64x64xf32> to vector<64x64xf32>
    %cst_206 = arith.constant dense<0.000000e+00> : vector<8x64xf32>
    %331 = tpu.matmul %328, %330, %cst_206 {dimension_numbers = #tpu.dot_dimension_numbers<[1], [0], [0], [1], [0, 0, 1, 1], [], []>} : vector<8x64xf32>, vector<64x64xf32>, vector<8x64xf32> -> vector<8x64xf32>
    %332 = arith.mulf %331, %331 : vector<8x64xf32>
    %c5_207 = arith.constant 5 : index
    %c0_208 = arith.constant 0 : index
    %c0_209 = arith.constant 0 : index
    %333 = vector.load %arg9[%c5_207, %c0_208, %c0_209] : memref<6x64x136xf32, #tpu.memory_space<vmem>>, vector<1x64x136xf32>
    %334 = vector.shape_cast %333 : vector<1x64x136xf32> to vector<64x136xf32>
    %cst_210 = arith.constant dense<0.000000e+00> : vector<8x136xf32>
    %335 = tpu.matmul %332, %334, %cst_210 {dimension_numbers = #tpu.dot_dimension_numbers<[1], [0], [0], [1], [0, 0, 1, 1], [], []>} : vector<8x64xf32>, vector<64x136xf32>, vector<8x136xf32> -> vector<8x136xf32>
    %c5_211 = arith.constant 5 : index
    %c0_212 = arith.constant 0 : index
    %c0_213 = arith.constant 0 : index
    %336 = vector.load %arg10[%c5_211, %c0_212, %c0_213] : memref<6x1x136xf32, #tpu.memory_space<vmem>>, vector<1x1x136xf32>
    %337 = vector.shape_cast %336 : vector<1x1x136xf32> to vector<1x136xf32>
    %338 = vector.broadcast %337 : vector<1x136xf32> to vector<8x136xf32>
    %339 = arith.addf %335, %338 : vector<8x136xf32>
    %cst_214 = arith.constant 0.000000e+00 : f32
    %340 = vector.broadcast %cst_214 : f32 to vector<8x136xf32>
    %341 = arith.maximumf %339, %340 : vector<8x136xf32>
    %c5_215 = arith.constant 5 : index
    %c0_216 = arith.constant 0 : index
    %c0_217 = arith.constant 0 : index
    %342 = vector.load %arg11[%c5_215, %c0_216, %c0_217] : memref<6x136x8xf32, #tpu.memory_space<vmem>>, vector<1x136x8xf32>
    %343 = vector.shape_cast %342 : vector<1x136x8xf32> to vector<136x8xf32>
    %cst_218 = arith.constant dense<0.000000e+00> : vector<8x8xf32>
    %344 = tpu.matmul %341, %343, %cst_218 {dimension_numbers = #tpu.dot_dimension_numbers<[1], [0], [0], [1], [0, 0, 1, 1], [], []>} : vector<8x136xf32>, vector<136x8xf32>, vector<8x8xf32> -> vector<8x8xf32>
    %345 = arith.negf %344 : vector<8x8xf32>
    %346 = math.exp %345 : vector<8x8xf32>
    %cst_219 = arith.constant 1.000000e+00 : f32
    %347 = vector.broadcast %cst_219 : f32 to vector<8x8xf32>
    %348 = arith.addf %347, %346 : vector<8x8xf32>
    %349 = arith.divf %347, %348 : vector<8x8xf32>
    %cst_220 = arith.constant dense<0.000000e+00> : vector<8x64xf32>
    %350 = tpu.matmul %349, %0, %cst_220 {dimension_numbers = #tpu.dot_dimension_numbers<[1], [0], [0], [1], [0, 0, 1, 1], [], []>} : vector<8x8xf32>, vector<8x64xf32>, vector<8x64xf32> -> vector<8x64xf32>
    %351 = arith.mulf %331, %350 : vector<8x64xf32>
    %352 = arith.addf %305, %351 : vector<8x64xf32>
    %c0_221 = arith.constant 0 : index
    %c0_222 = arith.constant 0 : index
    %353 = vector.load %arg13[%c0_221, %c0_222] : memref<64x32xf32, #tpu.memory_space<vmem>>, vector<64x32xf32>
    %cst_223 = arith.constant dense<0.000000e+00> : vector<8x32xf32>
    %354 = tpu.matmul %352, %353, %cst_223 {dimension_numbers = #tpu.dot_dimension_numbers<[1], [0], [0], [1], [0, 0, 1, 1], [], []>} : vector<8x64xf32>, vector<64x32xf32>, vector<8x32xf32> -> vector<8x32xf32>
    %355 = arith.mulf %354, %354 : vector<8x32xf32>
    %c0_224 = arith.constant 0 : index
    %c0_225 = arith.constant 0 : index
    %356 = vector.load %arg14[%c0_224, %c0_225] : memref<32x8xf32, #tpu.memory_space<vmem>>, vector<32x8xf32>
    %cst_226 = arith.constant dense<0.000000e+00> : vector<8x8xf32>
    %357 = tpu.matmul %355, %356, %cst_226 {dimension_numbers = #tpu.dot_dimension_numbers<[1], [0], [0], [1], [0, 0, 1, 1], [], []>} : vector<8x32xf32>, vector<32x8xf32>, vector<8x8xf32> -> vector<8x8xf32>
    %c0_227 = arith.constant 0 : index
    %c0_228 = arith.constant 0 : index
    %358 = vector.load %arg15[%c0_227, %c0_228] : memref<8x128xf32, #tpu.memory_space<vmem>>, vector<8x128xf32>
    %cst_229 = arith.constant dense<0.000000e+00> : vector<8x128xf32>
    %359 = tpu.matmul %357, %358, %cst_229 {dimension_numbers = #tpu.dot_dimension_numbers<[1], [0], [0], [1], [0, 0, 1, 1], [], []>} : vector<8x8xf32>, vector<8x128xf32>, vector<8x128xf32> -> vector<8x128xf32>
    %c0_230 = arith.constant 0 : index
    %c0_231 = arith.constant 0 : index
    %c0_232 = arith.constant 0 : index
    %360 = vector.load %arg16[%c0_230, %c0_231, %c0_232] : memref<1x8x128xf32, #tpu.memory_space<vmem>>, vector<1x8x128xf32>
    %361 = vector.shape_cast %360 : vector<1x8x128xf32> to vector<8x128xf32>
    %362 = vector.shape_cast %359 : vector<8x128xf32> to vector<1x8x128xf32>
    tpu.vector_store %arg16[%c0_230, %c0_231, %c0_232], %362 {strides = array<i32>} : memref<1x8x128xf32, #tpu.memory_space<vmem>>, vector<1x8x128xf32>,
    return
  }
  func.func @transform_0(%arg0: i32) -> (i32, i32) {
    %c0_i32 = arith.constant 0 : i32
    %c0_i32_0 = arith.constant 0 : i32
    %c0_i32_1 = arith.constant 0 : i32
    return %c0_i32, %c0_i32_0 : i32, i32
  }
  func.func @transform_1(%arg0: i32) -> (i32, i32, i32) {
    %c0_i32 = arith.constant 0 : i32
    %c0_i32_0 = arith.constant 0 : i32
    %c0_i32_1 = arith.constant 0 : i32
    return %arg0, %c0_i32, %c0_i32_0 : i32, i32, i32
  }
  func.func @transform_2(%arg0: i32) -> (i32, i32) {
    %c0_i32 = arith.constant 0 : i32
    %c0_i32_0 = arith.constant 0 : i32
    %c0_i32_1 = arith.constant 0 : i32
    return %c0_i32, %c0_i32_0 : i32, i32
  }
  func.func @transform_3(%arg0: i32) -> (i32, i32, i32) {
    %c0_i32 = arith.constant 0 : i32
    %c0_i32_0 = arith.constant 0 : i32
    %c0_i32_1 = arith.constant 0 : i32
    %c0_i32_2 = arith.constant 0 : i32
    return %c0_i32, %c0_i32_0, %c0_i32_1 : i32, i32, i32
  }
  func.func @transform_4(%arg0: i32) -> (i32, i32, i32) {
    %c0_i32 = arith.constant 0 : i32
    %c0_i32_0 = arith.constant 0 : i32
    %c0_i32_1 = arith.constant 0 : i32
    %c0_i32_2 = arith.constant 0 : i32
    return %c0_i32, %c0_i32_0, %c0_i32_1 : i32, i32, i32
  }
  func.func @transform_5(%arg0: i32) -> (i32, i32, i32) {
    %c0_i32 = arith.constant 0 : i32
    %c0_i32_0 = arith.constant 0 : i32
    %c0_i32_1 = arith.constant 0 : i32
    %c0_i32_2 = arith.constant 0 : i32
    return %c0_i32, %c0_i32_0, %c0_i32_1 : i32, i32, i32
  }
  func.func @transform_6(%arg0: i32) -> (i32, i32, i32) {
    %c0_i32 = arith.constant 0 : i32
    %c0_i32_0 = arith.constant 0 : i32
    %c0_i32_1 = arith.constant 0 : i32
    %c0_i32_2 = arith.constant 0 : i32
    return %c0_i32, %c0_i32_0, %c0_i32_1 : i32, i32, i32
  }
  func.func @transform_7(%arg0: i32) -> (i32, i32, i32) {
    %c0_i32 = arith.constant 0 : i32
    %c0_i32_0 = arith.constant 0 : i32
    %c0_i32_1 = arith.constant 0 : i32
    %c0_i32_2 = arith.constant 0 : i32
    return %c0_i32, %c0_i32_0, %c0_i32_1 : i32, i32, i32
  }
  func.func @transform_8(%arg0: i32) -> (i32, i32, i32) {
    %c0_i32 = arith.constant 0 : i32
    %c0_i32_0 = arith.constant 0 : i32
    %c0_i32_1 = arith.constant 0 : i32
    %c0_i32_2 = arith.constant 0 : i32
    return %c0_i32, %c0_i32_0, %c0_i32_1 : i32, i32, i32
  }
  func.func @transform_9(%arg0: i32) -> (i32, i32, i32) {
    %c0_i32 = arith.constant 0 : i32
    %c0_i32_0 = arith.constant 0 : i32
    %c0_i32_1 = arith.constant 0 : i32
    %c0_i32_2 = arith.constant 0 : i32
    return %c0_i32, %c0_i32_0, %c0_i32_1 : i32, i32, i32
  }
  func.func @transform_10(%arg0: i32) -> (i32, i32, i32) {
    %c0_i32 = arith.constant 0 : i32
    %c0_i32_0 = arith.constant 0 : i32
    %c0_i32_1 = arith.constant 0 : i32
    %c0_i32_2 = arith.constant 0 : i32
    return %c0_i32, %c0_i32_0, %c0_i32_1 : i32, i32, i32
  }
  func.func @transform_11(%arg0: i32) -> (i32, i32) {
    %c0_i32 = arith.constant 0 : i32
    %c0_i32_0 = arith.constant 0 : i32
    %c0_i32_1 = arith.constant 0 : i32
    return %c0_i32, %c0_i32_0 : i32, i32
  }
  func.func @transform_12(%arg0: i32) -> (i32, i32) {
    %c0_i32 = arith.constant 0 : i32
    %c0_i32_0 = arith.constant 0 : i32
    %c0_i32_1 = arith.constant 0 : i32
    return %c0_i32, %c0_i32_0 : i32, i32
  }
  func.func @transform_13(%arg0: i32) -> (i32, i32) {
    %c0_i32 = arith.constant 0 : i32
    %c0_i32_0 = arith.constant 0 : i32
    %c0_i32_1 = arith.constant 0 : i32
    return %c0_i32, %c0_i32_0 : i32, i32
  }
  func.func @transform_14(%arg0: i32) -> (i32, i32) {
    %c0_i32 = arith.constant 0 : i32
    %c0_i32_0 = arith.constant 0 : i32
    %c0_i32_1 = arith.constant 0 : i32
    return %c0_i32, %c0_i32_0 : i32, i32
  }
  func.func @transform_15(%arg0: i32) -> (i32, i32, i32) {
    %c0_i32 = arith.constant 0 : i32
    %c0_i32_0 = arith.constant 0 : i32
    %c0_i32_1 = arith.constant 0 : i32
    return %arg0, %c0_i32, %c0_i32_0 : i32, i32, i32
  }
}

</mosaic_0001>

<bundles_post_ra>
// kernel: tpu_custom_call.1
= control target key start
LH: loop header
LB: loop body
LE: loop exit
PB: predicated region body
PF: predicated region fallthrough
CT: control target
= control target key end

     0   :  { %s7293_s0 = inlined_call_operand.hbm [shape: f32[2,8], index: 0, kind: input, shape index: {}]   ;;  %s7294_s1 = inlined_call_operand.hbm [shape: f32[2,8,64], index: 1, kind: input, shape index: {}]   ;;  %s7295_s2 = inlined_call_operand.hbm [shape: f32[64,64], index: 2, kind: input, shape index: {}]   ;;  %s7296_s3 = inlined_call_operand.hbm [shape: f32[4,1,64], index: 3, kind: input, shape index: {}]   ;;  %s7297_s4 = inlined_call_operand.hbm [shape: f32[8,8,8], index: 4, kind: input, shape index: {}]   ;;  %s7298_s5 = inlined_call_operand.vmem [shape: f32[2,64,64], index: 5, kind: input, shape index: {}]   ;;  %s7299_s6 = inlined_call_operand.vmem [shape: f32[2,64,64], index: 6, kind: input, shape index: {}]   ;;  %s7300_s7 = inlined_call_operand.hbm [shape: f32[2,64,64], index: 7, kind: input, shape index: {}]   ;;  %s7301_s8 = inlined_call_operand.vmem [shape: f32[6,64,136], index: 8, kind: input, shape index: {}]   ;;  %s7302_s9 = inlined_call_operand.vmem [shape: f32[6,1,136], index: 9, kind: input, shape index: {}]   ;;  %s7303_s10 = inlined_call_operand.vmem [shape: f32[6,136,8], index: 10, kind: input, shape index: {}]   ;;  %s7304_s11 = inlined_call_operand.hbm [shape: f32[8,64], index: 11, kind: input, shape index: {}]   ;;  %s7305_s12 = inlined_call_operand.vmem [shape: f32[64,32], index: 12, kind: input, shape index: {}]   ;;  %s7306_s13 = inlined_call_operand.vmem [shape: f32[32,8], index: 13, kind: input, shape index: {}]   ;;  %s7307_s14 = inlined_call_operand.hbm [shape: f32[8,128], index: 14, kind: input, shape index: {}]   ;;  %s7308_s15 = inlined_call_operand.hbm [shape: f32[2,8,128], index: 15, kind: output, shape index: {}]  }
   0x1   :  { %7317 = sst [smem:[#allocation24_spill]] %s7293_s0 }
   0x2   :  { %7318 = sst [smem:[#allocation25_spill]] %s7295_s2 }
   0x3   :  { %7319 = sst [smem:[#allocation26_spill]] %s7296_s3 }
   0x4   :  { %7320 = sst [smem:[#allocation27_spill]] %s7297_s4 }
   0x5   :  { %7321 = sst [smem:[#allocation28_spill]] %s7300_s7 }
   0x6   :  { %7322 = sst [smem:[#allocation29_spill]] %s7304_s11 }
   0x7   :  { %7323 = sst [smem:[#allocation30_spill]] %s7306_s13 }
   0x8   :  { %7324 = sst [smem:[#allocation31_spill]] %s7307_s14 }
   0x9   :  { %7325 = sst [smem:[#allocation32_spill]] %s7308_s15 }
   0xa   :  { %20 = vsyncpa [#allocation5], 0 }
   0xb   :  { %21 = vsyncpa [#allocation3], 0 }
   0xc   :  { %23 = vsyncpa [#allocation3 + $0x1], 0 }
   0xd   :  { %24 = vsyncpa [#allocation8], 0 }
   0xe   :  { %25 = vsyncpa [#allocation11], 0 }
   0xf   :  { %26 = vsyncpa [#allocation14], 0 }
  0x10   :  { %27 = vsyncpa [#allocation4], 0 }
  0x11   :  { %29 = vsyncpa [#allocation4 + $0x1], 0  ;;  %s5866_s18 = smov 0   ;;  %s5868_s19 = smov 0  }
  0x12   :  { %s5870_s20 = smov 0   ;;  %s5872_s21 = smov 0  }
  0x13 LB: > { %s5771_s22 = smov [#allocation7]   ;;  %s5887_s24 = sadd.s32 4294967295, %s5769_s21   ;;  %s5769_s21 = sphi %s5872_s21, %s7362_s21   ;;  %s5765_s20 = sphi %s5870_s20, %s7361_s20   ;;  %s5761_s19 = sphi %s5868_s19, %s7360_s19   ;;  %s5757_s18 = sphi %s5866_s18, %s7359_s18  }
  0x14   : > { %s407_s23 = sshll.u32 %s5771_s22, 4  ;;  %p4621_p0 = scmp.ge.s32.totalorder %s5769_s21, 1  ;;  %s408_s23 = int_to_ptr.vmem [resolvable:$true] %s407_s23 }
  0x15   : > { %p7313_p1 = scmp.eq.s32.totalorder %s5887_s24, 0  ;;  %p386_p2 = scmp.lt.s32.totalorder %s5769_s21, 3 }
  0x16   : > { %s5772_s26 = smov [#allocation10]   ;;  %s5773_s29 = smov [#allocation13]  }
  0x17   : > { %p5892_p3 = pnand %p4621_p0, %p386_p2  ;;  %s433_s27 = sshll.u32 %s5772_s26, 4  ;;  %s5905_s27 = int_to_ptr.vmem [resolvable:$true] %s433_s27 }
  0x18   : > { %s475_s30 = sshll.u32 %s5773_s29, 4  ;;  %s5505_s17 = scalar_lea.vmem %s408_s23, 1024  ;;  %s5907_s30 = int_to_ptr.vmem [resolvable:$true] %s475_s30 }
  0x19   : > { %s7326_s25 = scalar_select %p5892_p3, 1, 0 }
  0x1a   : > { %p5342_p5 = pneg %p5892_p3  ;;  %p5506_p8 = scmp.ne.s32.totalorder %s408_s23, %s5505_s17 }
  0x1b   : > { %p5513_p11 = scmp.lt.s32.totalorder %s408_s23, %s408_s23  ;;  %p5514_p12 = scmp.lt.s32.totalorder %s5505_s17, %s5505_s17 }
  0x1c   : > { %p5901_p6 = pnand %p5342_p5, %p7313_p1 }
  0x1d   : > { %p5515_p13 = por %p5514_p12, %p5513_p11 }
  0x1e   : > { %p5911_p7 = pneg %p5901_p6 }
  0x20   : > { %p5508_p9 = pnand %p5506_p8, %p5911_p7 }
  0x22   : > { %p5509_p10 = pneg %p5508_p9 }
  0x24   : > { %p5516_p0 = pnand %p5515_p13, %p5509_p10 }
  0x26   : > { %5519 = shalt.err (!%p5516_p0)
}
  0x27   : > { %s7311_s22 = smov 128   ;;  %s7312_s26 = smov 8  }
  0x28   : > { %s7329_s2 = sld [smem:[#allocation25_spill]]  ;;  %s5531_s13 = scalar_lea.vmem %s5905_s27, 1024 }
  0x29   : > { %p5532_p2 = scmp.ne.s32.totalorder %s5905_s27, %s5531_s13  ;;  %p5539_p9 = scmp.lt.s32.totalorder %s5905_s27, %s5905_s27 }
  0x2a   : > { %p5540_p10 = scmp.lt.s32.totalorder %s5531_s13, %s5531_s13 }
  0x2b   : > { %p5534_p5 = pnand %p5532_p2, %p5911_p7 }
  0x2c   : > { %p5541_p11 = por %p5540_p10, %p5539_p9 }
  0x2d   : > { %p5535_p8 = pneg %p5534_p5 }
  0x2e   : > { %5348 = dma.hbm_to_vmem [thread:$0]  (!%p5901_p6), %s7329_s2, 1024, %s408_s23, [#allocation8], %s7311_s22, %s7311_s22, %s7312_s26  }
  0x2f   : > { %p5542_p12 = pnand %p5541_p11, %p5535_p8 }
  0x31   : > { %5545 = shalt.err (!%p5542_p12)
}
  0x32   : > { %s7330_s4 = sld [smem:[#allocation27_spill]]  ;;  %s5557_s23 = scalar_lea.vmem %s5907_s30, 128 }
  0x33   : > { %p5558_p13 = scmp.ne.s32.totalorder %s5907_s30, %s5557_s23  ;;  %p5565_p5 = scmp.lt.s32.totalorder %s5907_s30, %s5907_s30 }
  0x34   : > { %p5566_p8 = scmp.lt.s32.totalorder %s5557_s23, %s5557_s23 }
  0x35   : > { %p5560_p0 = pnand %p5558_p13, %p5911_p7 }
  0x36   : > { %p5567_p9 = por %p5566_p8, %p5565_p5 }
  0x37   : > { %p5561_p2 = pneg %p5560_p0 }
  0x38   : > { %5354 = dma.hbm_to_vmem [thread:$0]  (!%p5901_p6), %s7330_s4, 1024, %s5905_s27, [#allocation11], %s7311_s22, %s7311_s22, %s7312_s26  }
  0x39   : > { %p5568_p10 = pnand %p5567_p9, %p5561_p2 }
  0x3b   : > { %5571 = shalt.err (!%p5568_p10)
}
  0x3c   : > { %s7331_s11 = sld [smem:[#allocation29_spill]]  ;;  %s5776_s27 = smov [#allocation2]  }
  0x3d   : > { %s7332_s0 = sld [smem:[#allocation24_spill]]  ;;  %s5777_s22 = smov [#allocation9]  }
  0x3e   : > { %s420_s23 = sshll.u32 %s5777_s22, 4  ;;  %s421_s23 = int_to_ptr.vmem [resolvable:$true] %s420_s23 }
  0x3f   : > { %s5594_s26 = scalar_lea.vmem %s421_s23, 64  ;;  %p5602_p0 = scmp.lt.s32.totalorder %s421_s23, %s421_s23 }
  0x40   : > { %p5595_p11 = scmp.ne.s32.totalorder %s421_s23, %s5594_s26  ;;  %p5603_p2 = scmp.lt.s32.totalorder %s5594_s26, %s5594_s26 }
  0x42   : > { %5360 = dma.hbm_to_vmem [thread:$0]  (!%p5901_p6), %s7331_s11, 128, %s5907_s30, [#allocation14]  }
  0x43   : > { %5345 = dma.hbm_to_smem (!%p5901_p6), %s7332_s0, 32, %s5776_s27, [#allocation5]  }
  0x44   : > { %p5597_p12 = pnand %p5595_p11, %p5911_p7  ;;  %p5604_p5 = por %p5603_p2, %p5602_p0 }
  0x46   : > { %p5598_p13 = pneg %p5597_p12 }
  0x48   : > { %p5605_p8 = pnand %p5604_p5, %p5598_p13 }
  0x4a   : > { %5608 = shalt.err (!%p5605_p8)
}
  0x4b   : > { %s5778_s30 = smov 16   ;;  %s5779_s13 = smov 1  }
  0x4c   : > { %s7333_s3 = sld [smem:[#allocation26_spill]]  ;;  %s5780_s22 = smov [#allocation12]  }
  0x4d   : > { %s452_s17 = sshll.u32 %s5780_s22, 4  ;;  %s5781_s15 = smov [#allocation15]   ;;  %s453_s17 = int_to_ptr.vmem [resolvable:$true] %s452_s17 }
  0x4e   : > { %s492_s0 = sshll.u32 %s5781_s15, 4  ;;  %s5620_s2 = scalar_lea.vmem %s453_s17, 2048  ;;  %s493_s0 = int_to_ptr.vmem [resolvable:$true] %s492_s0 }
  0x4f   : > { %p5621_p9 = scmp.ne.s32.totalorder %s453_s17, %s5620_s2  ;;  %p5628_p12 = scmp.lt.s32.totalorder %s453_s17, %s453_s17 }
  0x50   : > { %p5629_p13 = scmp.lt.s32.totalorder %s5620_s2, %s5620_s2 }
  0x51   : > { %p5623_p10 = pnand %p5621_p9, %p5911_p7 }
  0x52   : > { %5351 = dma.hbm_to_vmem [thread:$0]  (!%p5901_p6), %s7333_s3, 64, %s421_s23, [#allocation8], %s5778_s30, %s5778_s30, %s5779_s13  }
  0x53   : > { %p5624_p11 = pneg %p5623_p10  ;;  %p5630_p0 = por %p5629_p13, %p5628_p12 }
  0x55   : > { %p5631_p2 = pnand %p5630_p0, %p5624_p11 }
  0x57   : > { %5634 = shalt.err (!%p5631_p2)
}
  0x58   : > { %s7334_s26 = smov 8   ;;  %s7335_s29 = smov 128  }
  0x59   : > { %s7336_s7 = sld [smem:[#allocation28_spill]]  ;;  %s5646_s13 = scalar_lea.vmem %s493_s0, 128 }
  0x5a   : > { %p5647_p5 = scmp.ne.s32.totalorder %s493_s0, %s5646_s13  ;;  %p5654_p10 = scmp.lt.s32.totalorder %s493_s0, %s493_s0 }
  0x5b   : > { %p5655_p12 = scmp.lt.s32.totalorder %s5646_s13, %s5646_s13 }
  0x5c   : > { %p5649_p8 = pnand %p5647_p5, %p5911_p7 }
  0x5d   : > { %p5656_p11 = por %p5655_p12, %p5654_p10 }
  0x5e   : > { %p5650_p9 = pneg %p5649_p8 }
  0x5f   : > { %5357 = dma.hbm_to_vmem [thread:$0]  (!%p5901_p6), %s7336_s7, 2048, %s453_s17, [#allocation11], %s7335_s29, %s7335_s29, %s7334_s26  }
  0x60   : > { %p5657_p13 = pnand %p5656_p11, %p5650_p9 }
  0x62   : > { %5660 = shalt.err (!%p5657_p13)
}
  0x63   : > { %s7337_s14 = sld [smem:[#allocation31_spill]]  ;;  %s4620_s16 = sadd.s32 4294967294, %s5769_s21  }
  0x64   : > { %s5983_s28 = sadd.s32 1, %s5769_s21   ;;  %s63_s22 = sadd.s32 1, %s5765_s20 }
  0x65   : > { %s60_s17 = ssub.s32 %s5769_s21, %s5983_s28  ;;  %p70_p7 = scmp.ne.s32.totalorder %s5765_s20, %s5761_s19 }
  0x66   : > { %p61_p0 = scmp.eq.s32.totalorder %s60_s17, 0  ;;  %p71_p2 = scmp.eq.s32.totalorder %s5769_s21, 0 }
  0x67   : > { %p76_p5 = scmp.ne.s32.totalorder %s5761_s19, %s5757_s18  ;;  %p373_p8 = scmp.eq.s32.totalorder %s5887_s24, 1 }
  0x68   : > { %s5995_s15 = scalar_select %p61_p0, %s5765_s20, %s63_s22  }
  0x69   : > { %5363 = dma.hbm_to_vmem [thread:$0]  (!%p5901_p6), %s7337_s14, 128, %s493_s0, [#allocation14]  }
  0x6a   : > { %7338 = sst [smem:[#allocation23_spill]] %s5995_s15  ;;  %p72_p9 = por %p71_p2, %p70_p7 }
  0x6b   : > { %p5999_p10 = por %p7313_p1, %p76_p5  ;;  %p6003_p6 = por %p373_p8, %p70_p7 }
  0x6c   : > { %p379_p12 = scmp.eq.s32.totalorder %s4620_s16, 1  ;;  %p5379_p11 = scmp.lt.s32.totalorder %s5769_s21, 2 }
  0x6d   : > { %s7339_s26 = scalar_select %p5999_p10, 1, 0 }
  0x6e   : > { %s7340_s0 = scalar_select %p6003_p6, 1, 0 }
  0x6f   : > { %s503_s29 = sand.u32 1, %s5765_s20   ;;  %p6009_p13 = por %p379_p12, %p76_p5 }
  0x70   : > { %s4630_s30 = sshll.u32 %s503_s29, 3  ;;  %s4631_s13 = sshll.u32 %s5769_s21, 7 }
  0x71   : > { %s7341_s23 = scalar_select %p6009_p13, 1, 0 }
  0x72   : > { %s6017_s22 = scalar_lea.hbm %s7294_s1, %s4631_s13  ;;  %s507_s17 = scalar_lea.vmem [#allocation6], %s4630_s30 }
  0x73   : > { %s514_s3 = sshll.u32 %s507_s17, 4  ;;  %p6019_p7 = pnand %p5379_p11, %p72_p9  ;;  %s515_s3 = int_to_ptr.vmem [resolvable:$true] %s514_s3 }
  0x74   : > { %s504_s4 = scalar_lea.sflag [#allocation3], %s503_s29  ;;  %s5661_s7 = scalar_lea.hbm %s6017_s22, 128 }
  0x75   : > { %p5662_p0 = scmp.ne.s32.totalorder %s6017_s22, %s5661_s7  ;;  %p5663_p2 = pneg %p6019_p7 }
  0x76   : > { %s5666_s27 = scalar_lea.hbm %s7294_s1, 256  ;;  %p5667_p9 = scmp.lt.s32.totalorder %s6017_s22, %s7294_s1 }
  0x77   : > { %p5664_p5 = pnand %p5663_p2, %p5662_p0  ;;  %p5668_p12 = scmp.lt.s32.totalorder %s5666_s27, %s5661_s7 }
  0x79   : > { %p5665_p8 = pneg %p5664_p5  ;;  %p5669_p11 = por %p5668_p12, %p5667_p9 }
  0x7b   : > { %p5670_p4 = pnand %p5669_p11, %p5665_p8 }
  0x7d   : > { %5673 = shalt.err (!%p5670_p4)
}
  0x7e   : > { %s5674_s17 = scalar_lea.vmem %s515_s3, 128  ;;  %s5782_s29 = smov [#allocation6]  }
  0x7f   : > { %p5675_p1 = scmp.ne.s32.totalorder %s515_s3, %s5674_s17  ;;  %s5679_s14 = sshll.u32 %s5782_s29, 4  ;;  %s5680_s14 = int_to_ptr.vmem [resolvable:$false] %s5679_s14 }
  0x80   : > { %s5681_s15 = scalar_lea.vmem %s5680_s14, 256  ;;  %p5682_p0 = scmp.lt.s32.totalorder %s515_s3, %s5680_s14 }
  0x81   : > { %p5677_p13 = pnand %p5675_p1, %p5663_p2  ;;  %p5683_p5 = scmp.lt.s32.totalorder %s5681_s15, %s5674_s17 }
  0x83   : > { %p5678_p6 = pneg %p5677_p13  ;;  %p5684_p10 = por %p5683_p5, %p5682_p0 }
  0x85   : > { %p5685_p3 = pnand %p5684_p10, %p5678_p6 }
  0x87   : > { %5688 = shalt.err (!%p5685_p3)
}
  0x88   : > { %5367 = dma.hbm_to_vmem [thread:$0]  (!%p6019_p7), %s6017_s22, 128, %s515_s3, %s504_s4  }
  0x89   : > { %p7343_p8 = scmp.ne.s32.totalorder %s7326_s25, 0 }
  0x8a   : > { %p7344_p4 = scmp.eq.s32.totalorder (!%p7343_p8), %s5887_s24, 0 }
  0x8b   : > { %523 = sbr.rel (%p7343_p8) target bundleno = 9345 (0x2481), region = 80 }
  0x90   : > { %5732 = dma.done.wait (%p7344_p4), [#allocation5], 32   ;;  %p7345_p1 = pmov %p7344_p4 }
  0x91   : > { %s6044_s7 = sand.u32 1, %s5761_s19   ;;  %p7346_p3 = scmp.ne.s32.totalorder %s7339_s26, 0 }
  0x92   : > { %5734 = vsyncadd (%p7345_p1), [#allocation5], 4294967264  ;;  %s4634_s11 = sshll.u32 %s6044_s7, 3  ;;  %s530_s14 = scalar_lea.sflag [#allocation3], %s6044_s7 }
  0x93   : > { %s6050_s3 = scalar_lea.vmem [#allocation6], %s4634_s11 }
  0x94   : > { %5736 = dma.done.wait (%p7346_p3), %s530_s14, 128  }
  0x95   : > { %5738 = vsyncadd (%p7346_p3), %s530_s14, 4294967168  ;;  %p7347_p10 = pmov %p7345_p1 }
  0x96   : > { %p7348_p6 = pmov %p7345_p1 }
  0x97   : > { %5740 = dma.done.wait (%p7347_p10), [#allocation8], 1088  }
  0x98   : > { %5742 = vsyncadd (%p7348_p6), [#allocation8], 4294966208  ;;  %p7349_p13 = pmov %p7345_p1 }
  0x99   : > { %p7350_p7 = pmov %p7345_p1 }
  0x9a   : > { %5744 = dma.done.wait (%p7349_p13), [#allocation11], 3072  }
  0x9b   : > { %5746 = vsyncadd (%p7350_p7), [#allocation11], 4294964224  ;;  %p7351_p2 = pmov %p7345_p1 }
  0x9c   : > { %p7352_p9 = pmov %p7345_p1 }
  0x9d   : > { %5748 = dma.done.wait (%p7351_p2), [#allocation14], 256  }
  0x9e   : > { %5750 = vsyncadd (%p7352_p9), [#allocation14], 4294967040 }
  0x9f   : > { %562 = sfence }
  0xa0   : > { %v614_v0 = vld [vmem:[#allocation7 + $0x38] sm:$0xff]  ;;  %v5783_v1 = vmov 0.0   ;;  %v613_v2 = vld [vmem:[#allocation7 + $0x30] sm:$0xff]  ;;  %vm5784_vm0 = vmmov 0   ;;  %v612_v3 = vld [vmem:[#allocation7 + $0x28] sm:$0xff]  ;;  %vm615_vm1 = vcmask 523264  }
  0xa1   : > { %5032 = vmatprep.subr.mxu0 %v5783_v1  ;;  %5048 = vmatprep.mubr.msk.f32.mxu0 %vm5784_vm0, %v5783_v1  ;;  %v611_v4 = vld [vmem:[#allocation7 + $0x20] sm:$0xff]  ;;  %v610_v5 = vld [vmem:[#allocation7 + $0x18] sm:$0xff]  ;;  %v609_v6 = vld [vmem:[#allocation7 + $0x10] sm:$0xff]  ;;  %s773_s4 = sld [smem:[#allocation2]]  ;;  %vm778_vm2 = vcmask 64512   ;;  %vm4318_vm3 = vcmask 261120  }
  0xa2   : > { %5033 = vmatpush3.msra.mxu0 %v614_v0  ;;  %5051 = vmatprep.subr.mxu1 %v5783_v1  ;;  %v608_v7 = vld [vmem:[#allocation7 + $0x8] sm:$0xff]  ;;  %v607_v8 = vld [vmem:[#allocation7] sm:$0xff]  ;;  %v606_v9 = vld [vmem:[%s6050_s3] sm:$0xff]  ;;  %s4663_s25 = sld [smem:[#allocation2 + $0x3]]  ;;  %p7355_p11 = scmp.ne.s32.totalorder %s7340_s0, 0 }
  0xa3   : > { %5034 = vmatprep.subr.mxu0 %v5783_v1  ;;  %5053 = vmatprep.mubr.msk.f32.mxu1 %vm5784_vm0, %v5783_v1  ;;  %v4643_v10 = vld [vmem:[#allocation9] ss:$0 sm:$0xff]  ;;  %v4654_v11 = vld [vmem:[#allocation9 + $0x2] ss:$0 sm:$0xff]  ;;  %v4660_v16 = vld [vmem:[#allocation9 + $0x3] ss:$0 sm:$0xff] }
  0xa4   : > { %5035 = vmatpush3.msra.mxu0 %v613_v2  ;;  %v776_v21 = vld [vmem:[#allocation10] sm:$0xff]  ;;  %v1305_v34 = vld [vmem:[#allocation10 + $0x18] sm:$0xff]  ;;  %s4657_s15 = sld [smem:[#allocation2 + $0x2]]  ;;  %v953_v49 = vld [vmem:[#allocation10 + $0x8] sm:$0xff] }
  0xa5   : > { %5036 = vmatprep.subr.mxu0 %v5783_v1  ;;  %v4648_v42 = vld [vmem:[#allocation9 + $0x1] ss:$0 sm:$0xff]  ;;  %s4651_s26 = sld [smem:[#allocation2 + $0x1]]  ;;  %v1129_v53 = vld [vmem:[#allocation10 + $0x10] sm:$0xff] }
  0xa6   : > { %5037 = vmatpush3.msra.mxu0 %v612_v3  ;;  %s4652_s13 = sld [smem:[#allocation2 + $0x5]] }
  0xa7   : > { %5038 = vmatprep.subr.mxu0 %v5783_v1  ;;  %v774_v18 = vstv %s773_s4  ;;  %s4646_s2 = sld [smem:[#allocation2 + $0x4]] }
  0xa8   : > { %5039 = vmatpush3.msra.mxu0 %v611_v4  ;;  %v1302_v32 = vstv %s4663_s25  ;;  %s4658_s27 = sld [smem:[#allocation2 + $0x6]] }
  0xa9   : > { %5040 = vmatprep.subr.mxu0 %v5783_v1  ;;  %s4664_s30 = sld [smem:[#allocation2 + $0x7]] }
  0xaa   : > { %5041 = vmatpush3.msra.mxu0 %v610_v5  ;;  %v1126_v45 = vstv %s4657_s15  ;;  %s4761_s17 = sld [smem:[#allocation2 + $0x82]] }
  0xab   : > { %5042 = vmatprep.subr.mxu0 %v5783_v1  ;;  %v950_v47 = vstv %s4651_s26  ;;  %s4762_s29 = sld [smem:[#allocation2 + $0x86]]  ;;  %s4468_s26 = scalar_lea.sflag [#allocation4], %s6044_s7 }
  0xac   : > { %5043 = vmatpush3.msra.mxu0 %v609_v6  ;;  %s4766_s14 = sld [smem:[#allocation2 + $0x83]] }
  0xad   : > { %5044 = vmatprep.subr.mxu0 %v5783_v1  ;;  %s4767_s25 = sld [smem:[#allocation2 + $0x87]] }
  0xae   : > { %5045 = vmatpush3.msra.mxu0 %v608_v7  ;;  %s7353_s15 = sld [smem:[#allocation30_spill]] }
  0xaf   : > { %5046 = vmatprep.subr.mxu0 %v5783_v1  ;;  %s7354_s4 = sld [smem:[#allocation32_spill]] }
  0xb0   : > { %5047 = vmatpush3.msra.mxu0 %v607_v8 }
  0xb1   : > { %5049 = vmatmul.mubr.msk.f32.vlgmr.msra.gmra.mxu0 %vm615_vm1, %v606_v9  ;;  %5071 = vmatprep.subr.mxu0 %v5783_v1 }
  0xb2   : > { %5073 = vmatprep.mubr.msk.f32.mxu0 %vm5784_vm0, %v5783_v1 }
 0x171   : > { %v6086_v12 = vpop.f32.mrf.mxu0 }
 0x172   : > { %5052 = vmatpush3.xpose.msk.msra.mxu1 %vm615_vm1, %v6086_v12  ;;  %5072 = vmatpush3.xpose.msk.msra.mxu0 %vm615_vm1, %v6086_v12  ;;  %v696_v13 = vmul.f32 %v4643_v10, %v6086_v12  ;;  %v6094_v14 = vmul.f32 %v4654_v11, %v6086_v12  ;;  %v6106_v17 = vmul.f32 %v4660_v16, %v6086_v12 }
 0x173   : > { %v5050_v15 = vpop.f32.mrf.mxu0  ;;  %5056 = vmatprep.subr.mxu1 %v5783_v1  ;;  %5081 = vmatprep.subr.mxu0 %v5783_v1  ;;  %v875_v43 = vmul.f32 %v4648_v42, %v6086_v12  ;;  %v1510_v42 = vld [vmem:[%s7303_s10 + $0x48] sm:$0xff] }
 0x175   : > { %5054 = vmatmul.mubr.msk.f32.vlgmr.msra.gmra.mxu1 %vm615_vm1, %v696_v13  ;;  %5074 = vmatmul.mubr.msk.f32.vlgmr.msra.gmra.mxu0 %vm615_vm1, %v6094_v14 }
 0x176   : > { %5057 = vmatpush3.msra.mxu1 %v696_v13  ;;  %5082 = vmatpush3.xpose.msk.msra.mxu0 %vm615_vm1, %v6086_v12 }
 0x177   : > { %5083 = vmatprep.mubr.msk.f32.mxu0 %vm5784_vm0, %v5783_v1  ;;  %5058 = vmatprep.mubr.msk.f32.mxu1 %vm5784_vm0, %v5783_v1 }
 0x178   : > { %5061 = vmatprep.subr.mxu1 %v5783_v1 }
 0x179   : > { %5084 = vmatmul.mubr.msk.f32.vlgmr.msra.gmra.mxu0 %vm615_vm1, %v6106_v17 }
 0x17a   : > { %1492 = vmatprep.mubr.f32.mxu0 %v5783_v1 }
 0x235   : > { %v769_v19 = vpop.f32.mrf.mxu1  ;;  %v1121_v20 = vpop.f32.mrf.mxu0 }
 0x236   : > { %v775_v22 = vmul.f32 %v774_v18, %v769_v19  ;;  %v1127_v50 = vmul.f32 %v1126_v45, %v1121_v20  ;;  %v1508_v45 = vld [vmem:[%s7303_s10 + $0x38] sm:$0xff] }
 0x237   : > { %v5055_v23 = vpop.f32.mrf.mxu1  ;;  %v5075_v24 = vpop.f32.mrf.mxu0 }
 0x238   : > { %v777_v25 = vadd.f32 %v776_v21, %v775_v22  ;;  %v1130_v56 = vadd.f32 %v1129_v53, %v1127_v50  ;;  %v1411_v22 = vld [vmem:[%s7301_s8 + $0x70] sm:$0xff]  ;;  %v1409_v23 = vld [vmem:[%s7301_s8 + $0x60] sm:$0xff]  ;;  %v1408_v24 = vld [vmem:[%s7301_s8 + $0x58] sm:$0xff]  ;;  %v864_v53 = vstv %s4646_s2  ;;  %s4756_s2 = sld [smem:[#allocation2 + $0x81]] }
 0x239   : > { %v1297_v26 = vpop.f32.mrf.mxu0 }
 0x23a   : > { %v779_v27 = vsel %vm778_vm2, %v777_v25, -inf  ;;  %v1303_v33 = vmul.f32 %v1302_v32, %v1297_v26  ;;  %v1131_v57 = vsel %vm778_vm2, %v1130_v56, -inf  ;;  %v1406_v26 = vld [vmem:[%s7301_s8 + $0x48] sm:$0xff]  ;;  %v1400_v32 = vld [vmem:[%s7301_s8 + $0x18] sm:$0xff] }
 0x23b   : > { %780 = vmax.xlane.f32.xlu0 %v779_v27  ;;  %v5085_v28 = vpop.f32.mrf.mxu0  ;;  %v1405_v27 = vld [vmem:[%s7301_s8 + $0x40] sm:$0xff] }
 0x23c   : > { %v1306_v37 = vadd.f32 %v1305_v34, %v1303_v33  ;;  %v1404_v28 = vld [vmem:[%s7301_s8 + $0x38] sm:$0xff]  ;;  %v1399_v33 = vld [vmem:[%s7301_s8 + $0x10] sm:$0xff]  ;;  %v1398_v34 = vld [vmem:[%s7301_s8 + $0x8] sm:$0xff] }
 0x23e   : > { %v1307_v38 = vsel %vm778_vm2, %v1306_v37, -inf }
 0x2c4   : > { %v781_v29 = vpop.xlane.xlu0 %780 }
 0x2c5   : > { %v782_v30 = vsub.f32 %v777_v25, %v781_v29  ;;  %v1407_v25 = vld [vmem:[%s7301_s8 + $0x50] sm:$0xff] }
 0x2c6   : > { %v1403_v29 = vld [vmem:[%s7301_s8 + $0x30] sm:$0xff] }
 0x2c7   : > { %v783_v31 = vmul.f32 1.442695, %v782_v30  ;;  %v1402_v30 = vld [vmem:[%s7301_s8 + $0x28] sm:$0xff] }
 0x2c9   : > { %5433 = vpow2.f32 %v783_v31  ;;  %v1401_v31 = vld [vmem:[%s7301_s8 + $0x20] sm:$0xff] }
 0x2d6   : > { %v5434_v35 = vpop.eup %5433 }
 0x2d7   : > { %v785_v36 = vsel %vm778_vm2, %v5434_v35, 0.0 }
 0x2d8   : > { %786 = vadd.xlane.f32.xlu0 %v785_v36  ;;  %v1516_v36 = vld [vmem:[%s7303_s10 + $0x78] sm:$0xff] }
 0x2dc   : > { %1308 = vmax.xlane.f32.xlu0 %v1307_v38  ;;  %v1514_v38 = vld [vmem:[%s7303_s10 + $0x68] sm:$0xff] }
 0x361   : > { %v787_v39 = vpop.xlane.xlu0 %786 }
 0x362   : > { %5435 = vrcp.f32 %v787_v39  ;;  %v1513_v39 = vld [vmem:[%s7303_s10 + $0x60] sm:$0xff] }
 0x365   : > { %v1309_v58 = vpop.xlane.xlu0 %1308 }
 0x366   : > { %v1310_v59 = vsub.f32 %v1306_v37, %v1309_v58  ;;  %v1515_v37 = vld [vmem:[%s7303_s10 + $0x70] sm:$0xff] }
 0x368   : > { %v1311_v62 = vmul.f32 1.442695, %v1310_v59 }
 0x36f   : > { %v5436_v40 = vpop.eup %5435 }
 0x370   : > { %v789_v41 = vmul.f32 %v5436_v40, %v5434_v35  ;;  %v1397_v35 = vld [vmem:[%s7301_s8] sm:$0xff]  ;;  %v1512_v40 = vld [vmem:[%s7303_s10 + $0x58] sm:$0xff] }
 0x372   : > { %5059 = vmatmul.mubr.msk.f32.vlgmr.msra.gmra.mxu1 %vm778_vm2, %v789_v41  ;;  %v1511_v41 = vld [vmem:[%s7303_s10 + $0x50] sm:$0xff] }
 0x373   : > { %5062 = vmatpush3.xpose.msk.msra.mxu1 %vm615_vm1, %v6086_v12  ;;  %5063 = vmatprep.mubr.msk.f32.mxu1 %vm5784_vm0, %v5783_v1 }
 0x374   : > { %5066 = vmatprep.subr.mxu1 %v5783_v1 }
 0x376   : > { %5064 = vmatmul.mubr.msk.f32.vlgmr.msra.gmra.mxu1 %vm615_vm1, %v875_v43 }
 0x377   : > { %5067 = vmatpush3.msra.mxu1 %v875_v43  ;;  %5068 = vmatprep.mubr.msk.f32.mxu1 %vm5784_vm0, %v5783_v1  ;;  %v1509_v43 = vld [vmem:[%s7303_s10 + $0x40] sm:$0xff] }
 0x378   : > { %5076 = vmatprep.subr.mxu1 %v5783_v1 }
 0x432   : > { %v6128_v44 = vpop.f32.mrf.mxu1 }
 0x434   : > { %v5060_v46 = vpop.f32.mrf.mxu1 }
 0x435   : > { %v1507_v46 = vld [vmem:[%s7303_s10 + $0x30] sm:$0xff] }
 0x436   : > { %v945_v48 = vpop.f32.mrf.mxu1 }
 0x437   : > { %v951_v51 = vmul.f32 %v950_v47, %v945_v48  ;;  %v1506_v47 = vld [vmem:[%s7303_s10 + $0x28] sm:$0xff]  ;;  %v1505_v48 = vld [vmem:[%s7303_s10 + $0x20] sm:$0xff] }
 0x438   : > { %v5065_v52 = vpop.f32.mrf.mxu1 }
 0x439   : > { %v954_v54 = vadd.f32 %v953_v49, %v951_v51  ;;  %v1504_v49 = vld [vmem:[%s7303_s10 + $0x18] sm:$0xff]  ;;  %v1040_v51 = vstv %s4652_s13  ;;  %s4751_s13 = sld [smem:[#allocation2 + $0x80]] }
 0x43b   : > { %v955_v55 = vsel %vm778_vm2, %v954_v54, -inf }
 0x43c   : > { %956 = vmax.xlane.f32.xlu1 %v955_v55 }
 0x440   : > { %1132 = vmax.xlane.f32.xlu1 %v1131_v57  ;;  %v865_v57 = vmul.f32 %v864_v53, %v6128_v44  ;;  %v1503_v44 = vld [vmem:[%s7303_s10 + $0x10] sm:$0xff]  ;;  %v4683_v53 = vld [vmem:[%s7301_s8 + $0xd8] sm:$0xff] }
 0x4c5   : > { %v957_v60 = vpop.xlane.xlu1 %956 }
 0x4c6   : > { %v958_v61 = vsub.f32 %v954_v54, %v957_v60  ;;  %v1216_v54 = vstv %s4658_s27  ;;  %v1392_v60 = vstv %s4664_s30  ;;  %s4752_s27 = sld [smem:[#allocation2 + $0x84]] }
 0x4c7   : > { %s4757_s30 = sld [smem:[#allocation2 + $0x85]] }
 0x4c8   : > { %v959_v63 = vmul.f32 1.442695, %v958_v61 }
 0x4c9   : > { %v1133_v0 = vpop.xlane.xlu1 %1132 }
 0x4ca   : > { %5437 = vpow2.f32 %v959_v63  ;;  %v1134_v2 = vsub.f32 %v1130_v56, %v1133_v0 }
 0x4cb   : > { %5439 = vpow2.f32 %v1311_v62 }
 0x4cc   : > { %v1135_v3 = vmul.f32 1.442695, %v1134_v2 }
 0x4ce   : > { %5441 = vpow2.f32 %v1135_v3 }
 0x4d7   : > { %v5438_v4 = vpop.eup %5437 }
 0x4d8   : > { %v961_v5 = vsel %vm778_vm2, %v5438_v4, 0.0  ;;  %v5440_v6 = vpop.eup %5439 }
 0x4d9   : > { %962 = vadd.xlane.f32.xlu1 %v961_v5  ;;  %v1313_v9 = vsel %vm778_vm2, %v5440_v6, 0.0 }
 0x4db   : > { %v5442_v7 = vpop.eup %5441 }
 0x4dc   : > { %v1137_v8 = vsel %vm778_vm2, %v5442_v7, 0.0 }
 0x4dd   : > { %1138 = vadd.xlane.f32.xlu0 %v1137_v8  ;;  %1314 = vadd.xlane.f32.xlu1 %v1313_v9  ;;  %v1415_v8 = vlaneseq }
 0x4df   : > { %v1416_v9 = vshrl.u32 %v1415_v8, 7  ;;  %v4701_v8 = vld [vmem:[%s7303_s10 + $0xe0] sm:$0xff] }
 0x562   : > { %v963_v10 = vpop.xlane.xlu1 %962 }
 0x563   : > { %5443 = vrcp.f32 %v963_v10  ;;  %v6272_v10 = vsub.s32 0, %v1416_v9 }
 0x566   : > { %v1139_v11 = vpop.xlane.xlu0 %1138  ;;  %v1315_v13 = vpop.xlane.xlu1 %1314 }
 0x567   : > { %5445 = vrcp.f32 %v1139_v11  ;;  %v1413_v11 = vld [vmem:[%s7302_s9] sm:$0x3] }
 0x568   : > { %5447 = vrcp.f32 %v1315_v13  ;;  %v6277_v13 = vsub.s32 1, %v1416_v9  ;;  %v4700_v9 = vld [vmem:[%s7303_s10 + $0xd8] sm:$0xff] }
 0x570   : > { %v5444_v15 = vpop.eup %5443 }
 0x571   : > { %v965_v16 = vmul.f32 %v5444_v15, %v5438_v4  ;;  %v1418_v15 = vrot.slane %v1413_v11, %v6272_v10 }
 0x573   : > { %5069 = vmatmul.mubr.msk.f32.vlgmr.msra.gmra.mxu1 %vm778_vm2, %v965_v16  ;;  %v1422_v16 = vrot.slane %v1413_v11, %v6277_v13  ;;  %v4699_v11 = vld [vmem:[%s7303_s10 + $0xd0] sm:$0xff] }
 0x574   : > { %5077 = vmatpush3.msra.mxu1 %v6094_v14  ;;  %5078 = vmatprep.mubr.msk.f32.mxu1 %vm5784_vm0, %v5783_v1  ;;  %v5446_v18 = vpop.eup %5445  ;;  %v1412_v14 = vld [vmem:[%s7301_s8 + $0x78] sm:$0xff] }
 0x575   : > { %5086 = vmatprep.subr.mxu1 %v5783_v1  ;;  %v1141_v19 = vmul.f32 %v5446_v18, %v5442_v7  ;;  %v5448_v20 = vpop.eup %5447  ;;  %1444 = vmatprep.subr.mxu0 %v1412_v14  ;;  %v1517_v7 = vld [vmem:[%s7303_s10 + $0x80] sm:$0xff] }
 0x576   : > { %v1317_v21 = vmul.f32 %v5448_v20, %v5440_v6  ;;  %1445 = vmatpush1.msra.mxu0 %v1411_v22  ;;  %v1501_v6 = vld [vmem:[%s7303_s10] sm:$0xff] }
 0x577   : > { %5079 = vmatmul.mubr.msk.f32.vlgmr.msra.gmra.mxu1 %vm778_vm2, %v1141_v19 }
 0x578   : > { %5087 = vmatpush3.msra.mxu1 %v6106_v17  ;;  %5088 = vmatprep.mubr.msk.f32.mxu1 %vm5784_vm0, %v5783_v1  ;;  %v1410_v17 = vld [vmem:[%s7301_s8 + $0x68] sm:$0xff] }
 0x579   : > { %1521 = vmatprep.subr.mxu1 %v5783_v1  ;;  %1446 = vmatprep.subr.mxu0 %v1410_v17  ;;  %v6284_v17 = vld [vmem:[#allocation13] sm:$0xff] }
 0x57a   : > { %1447 = vmatpush1.msra.mxu0 %v1409_v23 }
 0x57b   : > { %5089 = vmatmul.mubr.msk.f32.vlgmr.msra.gmra.mxu1 %vm778_vm2, %v1317_v21  ;;  %1448 = vmatprep.subr.mxu0 %v1408_v24 }
 0x57c   : > { %1449 = vmatpush1.msra.mxu0 %v1407_v25  ;;  %1522 = vmatpush1.msra.mxu1 %v1516_v36  ;;  %v1672_v36 = vld [vmem:[%s7298_s5] sm:$0xff] }
 0x57d   : > { %1450 = vmatprep.subr.mxu0 %v1406_v26  ;;  %1523 = vmatprep.subr.mxu1 %v5783_v1 }
 0x57e   : > { %1451 = vmatpush1.msra.mxu0 %v1405_v27  ;;  %1524 = vmatpush1.msra.mxu1 %v1515_v37  ;;  %v1761_v37 = vld [vmem:[%s7299_s6 + $0x38] sm:$0xff] }
 0x57f   : > { %1452 = vmatprep.subr.mxu0 %v1404_v28  ;;  %1525 = vmatprep.subr.mxu1 %v5783_v1  ;;  %v1679_v28 = vld [vmem:[%s7298_s5 + $0x38] sm:$0xff] }
 0x580   : > { %1453 = vmatpush1.msra.mxu0 %v1403_v29  ;;  %1526 = vmatpush1.msra.mxu1 %v1514_v38  ;;  %v1760_v38 = vld [vmem:[%s7299_s6 + $0x30] sm:$0xff] }
 0x581   : > { %1454 = vmatprep.subr.mxu0 %v1402_v30  ;;  %1527 = vmatprep.subr.mxu1 %v5783_v1  ;;  %v1678_v30 = vld [vmem:[%s7298_s5 + $0x30] sm:$0xff] }
 0x582   : > { %1455 = vmatpush1.msra.mxu0 %v1401_v31  ;;  %1528 = vmatpush1.msra.mxu1 %v1513_v39  ;;  %v1677_v31 = vld [vmem:[%s7298_s5 + $0x28] sm:$0xff] }
 0x583   : > { %1456 = vmatprep.subr.mxu0 %v1400_v32  ;;  %1529 = vmatprep.subr.mxu1 %v5783_v1  ;;  %v1676_v32 = vld [vmem:[%s7298_s5 + $0x20] sm:$0xff]  ;;  %v1759_v39 = vld [vmem:[%s7299_s6 + $0x28] sm:$0xff] }
 0x584   : > { %1457 = vmatpush1.msra.mxu0 %v1399_v33  ;;  %1530 = vmatpush1.msra.mxu1 %v1512_v40  ;;  %v1675_v33 = vld [vmem:[%s7298_s5 + $0x18] sm:$0xff]  ;;  %v1758_v40 = vld [vmem:[%s7299_s6 + $0x20] sm:$0xff] }
 0x585   : > { %1458 = vmatprep.subr.mxu0 %v1398_v34  ;;  %1531 = vmatprep.subr.mxu1 %v5783_v1  ;;  %v1674_v34 = vld [vmem:[%s7298_s5 + $0x10] sm:$0xff] }
 0x586   : > { %1459 = vmatpush1.msra.mxu0 %v1397_v35  ;;  %1532 = vmatpush1.msra.mxu1 %v1511_v41  ;;  %v1673_v35 = vld [vmem:[%s7298_s5 + $0x8] sm:$0xff]  ;;  %v1757_v41 = vld [vmem:[%s7299_s6 + $0x18] sm:$0xff] }
 0x587   : > { %5091 = vmatprep.subr.mxu0 %v5783_v1  ;;  %1533 = vmatprep.subr.mxu1 %v5783_v1 }
 0x588   : > { %1534 = vmatpush1.msra.mxu1 %v1510_v42  ;;  %v1756_v42 = vld [vmem:[%s7299_s6 + $0x10] sm:$0xff] }
 0x589   : > { %1535 = vmatprep.subr.mxu1 %v5783_v1 }
 0x58a   : > { %1536 = vmatpush1.msra.mxu1 %v1509_v43 }
 0x58b   : > { %1537 = vmatprep.subr.mxu1 %v5783_v1 }
 0x58c   : > { %1538 = vmatpush1.msra.mxu1 %v1508_v45 }
 0x58d   : > { %1539 = vmatprep.subr.mxu1 %v5783_v1 }
 0x58e   : > { %1540 = vmatpush1.msra.mxu1 %v1507_v46 }
 0x58f   : > { %1541 = vmatprep.subr.mxu1 %v5783_v1 }
 0x590   : > { %1542 = vmatpush1.msra.mxu1 %v1506_v47  ;;  %v1755_v47 = vld [vmem:[%s7299_s6 + $0x8] sm:$0xff] }
 0x591   : > { %1543 = vmatprep.subr.mxu1 %v5783_v1 }
 0x592   : > { %1544 = vmatpush1.msra.mxu1 %v1505_v48  ;;  %v1754_v48 = vld [vmem:[%s7299_s6] sm:$0xff] }
 0x593   : > { %1545 = vmatprep.subr.mxu1 %v5783_v1 }
 0x594   : > { %1546 = vmatpush1.msra.mxu1 %v1504_v49  ;;  %v4687_v49 = vld [vmem:[%s7301_s8 + $0xf8] sm:$0xff] }
 0x595   : > { %1547 = vmatprep.subr.mxu1 %v5783_v1 }
 0x596   : > { %1548 = vmatpush1.msra.mxu1 %v1503_v44  ;;  %v4705_v44 = vld [vmem:[%s7303_s10 + $0x100] sm:$0xff] }
 0x597   : > { %1549 = vmatprep.subr.mxu1 %v5783_v1 }
 0x633   : > { %v1036_v50 = vpop.f32.mrf.mxu1 }
 0x634   : > { %v1041_v55 = vmul.f32 %v1040_v51, %v1036_v50  ;;  %v4686_v50 = vld [vmem:[%s7301_s8 + $0xf0] sm:$0xff]  ;;  %v4685_v51 = vld [vmem:[%s7301_s8 + $0xe8] sm:$0xff] }
 0x635   : > { %v5070_v52 = vpop.f32.mrf.mxu1 }
 0x636   : > { %v1042_v61 = vadd.f32 %v1041_v55, %v865_v57  ;;  %v4684_v52 = vld [vmem:[%s7301_s8 + $0xe0] sm:$0xff]  ;;  %v4681_v55 = vld [vmem:[%s7301_s8 + $0xc8] sm:$0xff]  ;;  %v4679_v57 = vld [vmem:[%s7301_s8 + $0xb8] sm:$0xff] }
 0x637   : > { %v1212_v56 = vpop.f32.mrf.mxu1 }
 0x638   : > { %v1217_v58 = vmul.f32 %v1216_v54, %v1212_v56  ;;  %v4682_v54 = vld [vmem:[%s7301_s8 + $0xd0] sm:$0xff]  ;;  %v4680_v56 = vld [vmem:[%s7301_s8 + $0xc0] sm:$0xff] }
 0x639   : > { %v5080_v59 = vpop.f32.mrf.mxu1 }
 0x63a   : > { %v1218_v63 = vadd.f32 %v1217_v58, %v1042_v61  ;;  %v4678_v58 = vld [vmem:[%s7301_s8 + $0xb0] sm:$0xff]  ;;  %v4677_v59 = vld [vmem:[%s7301_s8 + $0xa8] sm:$0xff]  ;;  %v4675_v61 = vld [vmem:[%s7301_s8 + $0x98] sm:$0xff] }
 0x63b   : > { %v1388_v62 = vpop.f32.mrf.mxu1 }
 0x63c   : > { %v1393_v0 = vmul.f32 %v1392_v60, %v1388_v62  ;;  %v4676_v60 = vld [vmem:[%s7301_s8 + $0xa0] sm:$0xff] }
 0x63d   : > { %v5090_v2 = vpop.f32.mrf.mxu1 }
 0x63e   : > { %v1394_v3 = vadd.f32 %v1393_v0, %v1218_v63 }
 0x640   : > { %v6249_v4 = vadd.f32 %v1394_v3, %v6086_v12  ;;  %v1502_v12 = vld [vmem:[%s7303_s10 + $0x8] sm:$0xff]  ;;  %v4674_v3 = vld [vmem:[%s7301_s8 + $0x90] sm:$0xff] }
 0x641   : > { %1550 = vmatpush1.msra.mxu1 %v1502_v12  ;;  %v4704_v12 = vld [vmem:[%s7303_s10 + $0xf8] sm:$0xff] }
 0x642   : > { %v1396_v5 = vmul.f32 %v6249_v4, %v6249_v4  ;;  %1551 = vmatprep.subr.mxu1 %v5783_v1 }
 0x643   : > { %1552 = vmatpush1.msra.mxu1 %v1501_v6  ;;  %v4703_v6 = vld [vmem:[%s7303_s10 + $0xf0] sm:$0xff] }
 0x644   : > { %4666 = vmatmul.mubr.msk.f32.vlgmr.msra.gmra.mxu0 %vm615_vm1, %v1396_v5  ;;  %1583 = vmatprep.subr.mxu1 %v5783_v1  ;;  %v4673_v5 = vld [vmem:[%s7301_s8 + $0x88] sm:$0xff] }
 0x645   : > { %5093 = vmatprep.mubr.msk.f32.mxu0 %vm5784_vm0, %v5783_v1  ;;  %1584 = vmatpush2.msra.mxu1 %v1517_v7  ;;  %v4702_v7 = vld [vmem:[%s7303_s10 + $0xe8] sm:$0xff] }
 0x646   : > { %5115 = vmatprep.subr.mxu1 %v5783_v1  ;;  %5092 = vmatpush3.msra.mxu0 %v6284_v17 }
 0x647   : > { %5096 = vmatprep.subr.mxu0 %v5783_v1 }
 0x704   : > { %v1494_v18 = vpop.f32.mrf.mxu0 }
 0x705   : > { %v1495_v19 = vadd.f32 %v1494_v18, %v1418_v15  ;;  %v4698_v15 = vld [vmem:[%s7303_s10 + $0xc8] sm:$0xff]  ;;  %v4696_v18 = vld [vmem:[%s7303_s10 + $0xb8] sm:$0xff] }
 0x706   : > { %v1496_v20 = vpop.f32.mrf.mxu0 }
 0x707   : > { %v1497_v21 = vadd.f32 %v1496_v20, %v1422_v16  ;;  %v1499_v22 = vmax.f32 %v1495_v19, 0.0  ;;  %v4697_v16 = vld [vmem:[%s7303_s10 + $0xc0] sm:$0xff]  ;;  %v4695_v19 = vld [vmem:[%s7303_s10 + $0xb0] sm:$0xff]  ;;  %v4694_v20 = vld [vmem:[%s7303_s10 + $0xa8] sm:$0xff] }
 0x709   : > { %v1500_v14 = vmax.f32 %v1497_v21, 0.0  ;;  %v4693_v21 = vld [vmem:[%s7303_s10 + $0xa0] sm:$0xff] }
 0x70b   : > { %4667 = vmatprep.mubr.msk.f32.mxu1 %vm778_vm2, %v1500_v14 }
 0x70c   : > { %1586 = vmatmul.mubr.f32.vlgmr.msra.gmra.mxu1 %v1499_v22 }
 0x70d   : > { %5131 = vmatprep.mubr.msk.f32.mxu1 %vm5784_vm0, %v5783_v1  ;;  %5116 = vmatpush3.msra.mxu1 %v1761_v37 }
 0x70e   : > { %5117 = vmatprep.subr.mxu1 %v5783_v1 }
 0x70f   : > { %5118 = vmatpush3.msra.mxu1 %v1760_v38 }
 0x710   : > { %5119 = vmatprep.subr.mxu1 %v5783_v1 }
 0x711   : > { %5120 = vmatpush3.msra.mxu1 %v1759_v39 }
 0x712   : > { %5121 = vmatprep.subr.mxu1 %v5783_v1 }
 0x713   : > { %5122 = vmatpush3.msra.mxu1 %v1758_v40 }
 0x714   : > { %5123 = vmatprep.subr.mxu1 %v5783_v1 }
 0x715   : > { %5124 = vmatpush3.msra.mxu1 %v1757_v41 }
 0x716   : > { %5125 = vmatprep.subr.mxu1 %v5783_v1 }
 0x717   : > { %5126 = vmatpush3.msra.mxu1 %v1756_v42  ;;  %v2120_v42 = vld [vmem:[#allocation12 + $0x38] sm:$0xff] }
 0x718   : > { %5127 = vmatprep.subr.mxu1 %v5783_v1 }
 0x719   : > { %5128 = vmatpush3.msra.mxu1 %v1755_v47  ;;  %v2117_v47 = vld [vmem:[#allocation12 + $0x20] sm:$0xff] }
 0x71a   : > { %5129 = vmatprep.subr.mxu1 %v5783_v1 }
 0x71b   : > { %5130 = vmatpush3.msra.mxu1 %v1754_v48  ;;  %v2116_v48 = vld [vmem:[#allocation12 + $0x18] sm:$0xff] }
 0x71c   : > { %1963 = vmatprep.subr.mxu1 %v5783_v1 }
 0x7cc   : > { %v1587_v23 = vpop.f32.mrf.mxu1 }
 0x7cd   : > { %v4668_v24 = vmul.f32 -1.442695, %v1587_v23 }
 0x7ce   : > { %v1589_v25 = vpop.f32.mrf.mxu1 }
 0x7cf   : > { %5449 = vpow2.f32 %v4668_v24  ;;  %v4692_v24 = vld [vmem:[%s7303_s10 + $0x98] sm:$0xff]  ;;  %v4691_v25 = vld [vmem:[%s7303_s10 + $0x90] sm:$0xff] }
 0x7dc   : > { %v5450_v26 = vpop.eup %5449 }
 0x7dd   : > { %v1594_v27 = vadd.f32 1.0, %v5450_v26  ;;  %v4690_v26 = vld [vmem:[%s7303_s10 + $0x88] sm:$0xff] }
 0x7df   : > { %5451 = vrcp.f32 %v1594_v27  ;;  %v4706_v27 = vld [vmem:[%s7303_s10 + $0x108] sm:$0xff] }
 0x7ec   : > { %v5452_v29 = vpop.eup %5451 }
 0x7ed   : > { %5094 = vmatmul.mubr.msk.f32.vlgmr.msra.gmra.mxu0 %vm778_vm2, %v5452_v29 }
 0x7ee   : > { %5097 = vmatpush3.msra.mxu0 %v1679_v28  ;;  %5112 = vmatprep.mubr.msk.f32.mxu0 %vm5784_vm0, %v5783_v1  ;;  %v4688_v28 = vld [vmem:[%s7302_s9 + $0x2] sm:$0x3] }
 0x7ef   : > { %5098 = vmatprep.subr.mxu0 %v5783_v1  ;;  %v1859_v29 = vrot.slane %v4688_v28, %v6272_v10 }
 0x7f0   : > { %5099 = vmatpush3.msra.mxu0 %v1678_v30  ;;  %v1863_v30 = vrot.slane %v4688_v28, %v6277_v13  ;;  %v4730_v28 = vld [vmem:[%s7303_s10 + $0x118] sm:$0xff] }
 0x7f1   : > { %5100 = vmatprep.subr.mxu0 %v5783_v1 }
 0x7f2   : > { %5101 = vmatpush3.msra.mxu0 %v1677_v31 }
 0x7f3   : > { %5102 = vmatprep.subr.mxu0 %v5783_v1 }
 0x7f4   : > { %5103 = vmatpush3.msra.mxu0 %v1676_v32 }
 0x7f5   : > { %5104 = vmatprep.subr.mxu0 %v5783_v1 }
 0x7f6   : > { %5105 = vmatpush3.msra.mxu0 %v1675_v33 }
 0x7f7   : > { %5106 = vmatprep.subr.mxu0 %v5783_v1 }
 0x7f8   : > { %5107 = vmatpush3.msra.mxu0 %v1674_v34 }
 0x7f9   : > { %5108 = vmatprep.subr.mxu0 %v5783_v1 }
 0x7fa   : > { %5109 = vmatpush3.msra.mxu0 %v1673_v35 }
 0x7fb   : > { %5110 = vmatprep.subr.mxu0 %v5783_v1 }
 0x7fc   : > { %5111 = vmatpush3.msra.mxu0 %v1672_v36 }
 0x7fd   : > { %1885 = vmatprep.subr.mxu0 %v4687_v49  ;;  %v2115_v49 = vld [vmem:[#allocation12 + $0x10] sm:$0xff] }
 0x8ad   : > { %v1666_v43 = vpop.f32.mrf.mxu0 }
 0x8ae   : > { %v1670_v45 = vmul.f32 %v1666_v43, %v6249_v4 }
 0x8af   : > { %v5095_v46 = vpop.f32.mrf.mxu0 }
 0x8b0   : > { %5113 = vmatmul.mubr.msk.f32.vlgmr.msra.gmra.mxu0 %vm615_vm1, %v1670_v45  ;;  %v1671_v62 = vadd.f32 %v1670_v45, %v6249_v4  ;;  %v4672_v4 = vld [vmem:[%s7301_s8 + $0x80] sm:$0xff] }
 0x8b1   : > { %1933 = vmatprep.mubr.f32.mxu0 %v5783_v1  ;;  %1886 = vmatpush1.msra.mxu0 %v4686_v50  ;;  %v2119_v45 = vld [vmem:[#allocation12 + $0x30] sm:$0xff]  ;;  %v2118_v46 = vld [vmem:[#allocation12 + $0x28] sm:$0xff] }
 0x8b2   : > { %1887 = vmatprep.subr.mxu0 %v4685_v51  ;;  %v2114_v50 = vld [vmem:[#allocation12 + $0x8] sm:$0xff]  ;;  %v2113_v51 = vld [vmem:[#allocation12] sm:$0xff] }
 0x8b3   : > { %1888 = vmatpush1.msra.mxu0 %v4684_v52  ;;  %v4726_v52 = vld [vmem:[%s7301_s8 + $0x178] sm:$0xff] }
 0x8b4   : > { %1889 = vmatprep.subr.mxu0 %v4683_v53 }
 0x8b5   : > { %1890 = vmatpush1.msra.mxu0 %v4682_v54 }
 0x8b6   : > { %1891 = vmatprep.subr.mxu0 %v4681_v55  ;;  %v4725_v55 = vld [vmem:[%s7301_s8 + $0x170] sm:$0xff] }
 0x8b7   : > { %1892 = vmatpush1.msra.mxu0 %v4680_v56 }
 0x8b8   : > { %1893 = vmatprep.subr.mxu0 %v4679_v57  ;;  %v4724_v57 = vld [vmem:[%s7301_s8 + $0x168] sm:$0xff] }
 0x8b9   : > { %1894 = vmatpush1.msra.mxu0 %v4678_v58  ;;  %v4723_v58 = vld [vmem:[%s7301_s8 + $0x160] sm:$0xff] }
 0x8ba   : > { %1895 = vmatprep.subr.mxu0 %v4677_v59  ;;  %v4722_v59 = vld [vmem:[%s7301_s8 + $0x158] sm:$0xff] }
 0x8bb   : > { %1896 = vmatpush1.msra.mxu0 %v4676_v60  ;;  %v4721_v60 = vld [vmem:[%s7301_s8 + $0x150] sm:$0xff] }
 0x8bc   : > { %1897 = vmatprep.subr.mxu0 %v4675_v61  ;;  %v4720_v61 = vld [vmem:[%s7301_s8 + $0x148] sm:$0xff] }
 0x8bd   : > { %1898 = vmatpush1.msra.mxu0 %v4674_v3  ;;  %v4716_v3 = vld [vmem:[%s7301_s8 + $0x128] sm:$0xff] }
 0x8be   : > { %1899 = vmatprep.subr.mxu0 %v4673_v5  ;;  %v4715_v5 = vld [vmem:[%s7301_s8 + $0x120] sm:$0xff] }
 0x8bf   : > { %1900 = vmatpush1.msra.mxu0 %v4672_v4  ;;  %v4714_v4 = vld [vmem:[%s7301_s8 + $0x118] sm:$0xff] }
 0x8c0   : > { %5134 = vmatprep.subr.mxu0 %v5783_v1 }
 0x970   : > { %v1749_v63 = vpop.f32.mrf.mxu0 }
 0x971   : > { %v6397_v0 = vadd.f32 %v1749_v63, %v1671_v62  ;;  %v4719_v62 = vld [vmem:[%s7301_s8 + $0x140] sm:$0xff]  ;;  %v4718_v63 = vld [vmem:[%s7301_s8 + $0x138] sm:$0xff] }
 0x972   : > { %v5114_v2 = vpop.f32.mrf.mxu0 }
 0x973   : > { %5132 = vmatmul.mubr.msk.f32.vlgmr.msra.gmra.mxu1 %vm615_vm1, %v6397_v0  ;;  %v4717_v2 = vld [vmem:[%s7301_s8 + $0x130] sm:$0xff] }
 0x974   : > { %1964 = vmatpush1.msra.mxu1 %v4705_v44  ;;  %v4713_v44 = vld [vmem:[%s7301_s8 + $0x110] sm:$0xff] }
 0x975   : > { %1965 = vmatprep.subr.mxu1 %v5783_v1 }
 0x976   : > { %1966 = vmatpush1.msra.mxu1 %v4704_v12  ;;  %v4712_v12 = vld [vmem:[%s7301_s8 + $0x108] sm:$0xff] }
 0x977   : > { %1967 = vmatprep.subr.mxu1 %v5783_v1 }
 0x978   : > { %1968 = vmatpush1.msra.mxu1 %v4703_v6  ;;  %v4711_v6 = vld [vmem:[%s7301_s8 + $0x100] sm:$0xff] }
 0x979   : > { %1969 = vmatprep.subr.mxu1 %v5783_v1 }
 0x97a   : > { %1970 = vmatpush1.msra.mxu1 %v4702_v7  ;;  %v4744_v7 = vld [vmem:[%s7303_s10 + $0x188] sm:$0xff] }
 0x97b   : > { %1971 = vmatprep.subr.mxu1 %v5783_v1 }
 0x97c   : > { %1972 = vmatpush1.msra.mxu1 %v4701_v8  ;;  %v4743_v8 = vld [vmem:[%s7303_s10 + $0x180] sm:$0xff] }
 0x97d   : > { %1973 = vmatprep.subr.mxu1 %v5783_v1 }
 0x97e   : > { %1974 = vmatpush1.msra.mxu1 %v4700_v9  ;;  %v4742_v9 = vld [vmem:[%s7303_s10 + $0x178] sm:$0xff] }
 0x97f   : > { %1975 = vmatprep.subr.mxu1 %v5783_v1 }
 0x980   : > { %1976 = vmatpush1.msra.mxu1 %v4699_v11  ;;  %v4741_v11 = vld [vmem:[%s7303_s10 + $0x170] sm:$0xff] }
 0x981   : > { %1977 = vmatprep.subr.mxu1 %v5783_v1 }
 0x982   : > { %1978 = vmatpush1.msra.mxu1 %v4698_v15  ;;  %v4740_v15 = vld [vmem:[%s7303_s10 + $0x168] sm:$0xff] }
 0x983   : > { %1979 = vmatprep.subr.mxu1 %v5783_v1 }
 0x984   : > { %1980 = vmatpush1.msra.mxu1 %v4697_v16  ;;  %v4739_v16 = vld [vmem:[%s7303_s10 + $0x160] sm:$0xff] }
 0x985   : > { %1981 = vmatprep.subr.mxu1 %v5783_v1 }
 0x986   : > { %1982 = vmatpush1.msra.mxu1 %v4696_v18  ;;  %v4738_v18 = vld [vmem:[%s7303_s10 + $0x158] sm:$0xff] }
 0x987   : > { %1983 = vmatprep.subr.mxu1 %v5783_v1 }
 0x988   : > { %1984 = vmatpush1.msra.mxu1 %v4695_v19  ;;  %v4737_v19 = vld [vmem:[%s7303_s10 + $0x150] sm:$0xff] }
 0x989   : > { %1985 = vmatprep.subr.mxu1 %v5783_v1 }
 0x98a   : > { %1986 = vmatpush1.msra.mxu1 %v4694_v20  ;;  %v4736_v20 = vld [vmem:[%s7303_s10 + $0x148] sm:$0xff] }
 0x98b   : > { %1987 = vmatprep.subr.mxu1 %v5783_v1 }
 0x98c   : > { %1988 = vmatpush1.msra.mxu1 %v4693_v21  ;;  %v4735_v21 = vld [vmem:[%s7303_s10 + $0x140] sm:$0xff] }
 0x98d   : > { %1989 = vmatprep.subr.mxu1 %v5783_v1 }
 0x98e   : > { %1990 = vmatpush1.msra.mxu1 %v4692_v24 }
 0x98f   : > { %1991 = vmatprep.subr.mxu1 %v5783_v1 }
 0x990   : > { %1992 = vmatpush1.msra.mxu1 %v4691_v25 }
 0x991   : > { %1993 = vmatprep.subr.mxu1 %v5783_v1 }
 0x992   : > { %1994 = vmatpush1.msra.mxu1 %v4690_v26 }
 0x993   : > { %2025 = vmatprep.subr.mxu1 %v5783_v1 }
 0x994   : > { %2026 = vmatpush2.msra.mxu1 %v4706_v27  ;;  %v4731_v27 = vld [vmem:[%s7303_s10 + $0x120] sm:$0xff] }
 0x995   : > { %2322 = vmatprep.subr.mxu1 %v5783_v1 }
 0xa33   : > { %v6463_v14 = vpop.f32.mrf.mxu1 }
 0xa34   : > { %v1835_v22 = vmul.f32 %v6463_v14, %v6463_v14 }
 0xa35   : > { %v5133_v23 = vpop.f32.mrf.mxu1 }
 0xa36   : > { %4689 = vmatmul.mubr.msk.f32.vlgmr.msra.gmra.mxu0 %vm615_vm1, %v1835_v22  ;;  %v4733_v22 = vld [vmem:[%s7303_s10 + $0x130] sm:$0xff]  ;;  %v4732_v23 = vld [vmem:[%s7303_s10 + $0x128] sm:$0xff] }
 0xa37   : > { %5135 = vmatpush3.msra.mxu0 %v6284_v17  ;;  %5136 = vmatprep.mubr.msk.f32.mxu0 %vm5784_vm0, %v5783_v1 }
 0xa38   : > { %5139 = vmatprep.subr.mxu0 %v5783_v1 }
 0xaf6   : > { %v1935_v31 = vpop.f32.mrf.mxu0 }
 0xaf7   : > { %v1936_v32 = vadd.f32 %v1935_v31, %v1859_v29  ;;  %v4745_v29 = vld [vmem:[%s7303_s10 + $0x190] sm:$0xff] }
 0xaf8   : > { %v1937_v33 = vpop.f32.mrf.mxu0 }
 0xaf9   : > { %v1938_v34 = vadd.f32 %v1937_v33, %v1863_v30  ;;  %v1940_v36 = vmax.f32 %v1936_v32, 0.0  ;;  %v4727_v30 = vld [vmem:[%s7302_s9 + $0x4] sm:$0x3] }
 0xafa   : > { %v2218_v31 = vrot.slane %v4727_v30, %v6272_v10  ;;  %v2222_v32 = vrot.slane %v4727_v30, %v6277_v13 }
 0xafb   : > { %v1941_v35 = vmax.f32 %v1938_v34, 0.0 }
 0xafd   : > { %4707 = vmatprep.mubr.msk.f32.mxu1 %vm778_vm2, %v1941_v35 }
 0xafe   : > { %2028 = vmatmul.mubr.f32.vlgmr.msra.gmra.mxu1 %v1940_v36 }
 0xaff   : > { %2323 = vmatpush1.msra.mxu1 %v4744_v7 }
 0xb00   : > { %2324 = vmatprep.subr.mxu1 %v5783_v1 }
 0xb01   : > { %2325 = vmatpush1.msra.mxu1 %v4743_v8  ;;  %v2719_v8 = vstv %s4756_s2 }
 0xb02   : > { %2326 = vmatprep.subr.mxu1 %v5783_v1 }
 0xb03   : > { %2327 = vmatpush1.msra.mxu1 %v4742_v9 }
 0xb04   : > { %2328 = vmatprep.subr.mxu1 %v5783_v1 }
 0xb05   : > { %2329 = vmatpush1.msra.mxu1 %v4741_v11  ;;  %v2722_v11 = vld [vmem:[#allocation10 + $0x28] sm:$0xff] }
 0xb06   : > { %2330 = vmatprep.subr.mxu1 %v5783_v1 }
 0xb07   : > { %2331 = vmatpush1.msra.mxu1 %v4740_v15 }
 0xb08   : > { %2332 = vmatprep.subr.mxu1 %v5783_v1 }
 0xb09   : > { %2333 = vmatpush1.msra.mxu1 %v4739_v16 }
 0xb0a   : > { %2334 = vmatprep.subr.mxu1 %v5783_v1 }
 0xb0b   : > { %2335 = vmatpush1.msra.mxu1 %v4738_v18 }
 0xb0c   : > { %2336 = vmatprep.subr.mxu1 %v5783_v1 }
 0xb0d   : > { %2337 = vmatpush1.msra.mxu1 %v4737_v19 }
 0xb0e   : > { %2338 = vmatprep.subr.mxu1 %v5783_v1 }
 0xb0f   : > { %2339 = vmatpush1.msra.mxu1 %v4736_v20 }
 0xb10   : > { %2340 = vmatprep.subr.mxu1 %v5783_v1 }
 0xb11   : > { %2341 = vmatpush1.msra.mxu1 %v4735_v21 }
 0xb12   : > { %2342 = vmatprep.subr.mxu1 %v5783_v1 }
 0xbbe   : > { %v2029_v37 = vpop.f32.mrf.mxu1 }
 0xbbf   : > { %v4708_v38 = vmul.f32 -1.442695, %v2029_v37 }
 0xbc0   : > { %v2031_v39 = vpop.f32.mrf.mxu1 }
 0xbc1   : > { %5453 = vpow2.f32 %v4708_v38 }
 0xbce   : > { %v5454_v40 = vpop.eup %5453 }
 0xbcf   : > { %v2036_v41 = vadd.f32 1.0, %v5454_v40 }
 0xbd1   : > { %5455 = vrcp.f32 %v2036_v41 }
 0xbde   : > { %v5456_v43 = vpop.eup %5455 }
 0xbdf   : > { %5137 = vmatmul.mubr.msk.f32.vlgmr.msra.gmra.mxu0 %vm778_vm2, %v5456_v43 }
 0xbe0   : > { %5140 = vmatpush3.msra.mxu0 %v2120_v42  ;;  %5155 = vmatprep.mubr.msk.f32.mxu0 %vm5784_vm0, %v5783_v1 }
 0xbe1   : > { %5141 = vmatprep.subr.mxu0 %v5783_v1 }
 0xbe2   : > { %5142 = vmatpush3.msra.mxu0 %v2119_v45 }
 0xbe3   : > { %5143 = vmatprep.subr.mxu0 %v5783_v1 }
 0xbe4   : > { %5144 = vmatpush3.msra.mxu0 %v2118_v46 }
 0xbe5   : > { %5145 = vmatprep.subr.mxu0 %v5783_v1 }
 0xbe6   : > { %5146 = vmatpush3.msra.mxu0 %v2117_v47 }
 0xbe7   : > { %5147 = vmatprep.subr.mxu0 %v5783_v1 }
 0xbe8   : > { %5148 = vmatpush3.msra.mxu0 %v2116_v48 }
 0xbe9   : > { %5149 = vmatprep.subr.mxu0 %v5783_v1 }
 0xbea   : > { %5150 = vmatpush3.msra.mxu0 %v2115_v49 }
 0xbeb   : > { %5151 = vmatprep.subr.mxu0 %v5783_v1 }
 0xbec   : > { %5152 = vmatpush3.msra.mxu0 %v2114_v50  ;;  %v5489_v50 = vld [vmem:[#allocation9 + $0x3] ss:$0 sm:$0xff] }
 0xbed   : > { %5153 = vmatprep.subr.mxu0 %v5783_v1 }
 0xbee   : > { %5154 = vmatpush3.msra.mxu0 %v2113_v51 }
 0xbef   : > { %2244 = vmatprep.subr.mxu0 %v4726_v52  ;;  %v5490_v52 = vld [vmem:[#allocation9] ss:$0 sm:$0xff] }
 0xc9f   : > { %v2108_v53 = vpop.f32.mrf.mxu0 }
 0xca0   : > { %v2112_v54 = vmul.f32 %v2108_v53, %v6463_v14  ;;  %v4734_v14 = vld [vmem:[%s7303_s10 + $0x138] sm:$0xff] }
 0xca1   : > { %v5138_v56 = vpop.f32.mrf.mxu0  ;;  %2343 = vmatpush1.msra.mxu1 %v4734_v14 }
 0xca2   : > { %5156 = vmatmul.mubr.msk.f32.vlgmr.msra.gmra.mxu0 %vm615_vm1, %v2112_v54  ;;  %2344 = vmatprep.subr.mxu1 %v5783_v1 }
 0xca3   : > { %2245 = vmatpush1.msra.mxu0 %v4725_v55  ;;  %2292 = vmatprep.mubr.f32.mxu0 %v5783_v1  ;;  %v2554_v55 = vld [vmem:[#allocation10 + $0x20] sm:$0xff] }
 0xca4   : > { %2246 = vmatprep.subr.mxu0 %v4724_v57  ;;  %2345 = vmatpush1.msra.mxu1 %v4733_v22 }
 0xca5   : > { %2247 = vmatpush1.msra.mxu0 %v4723_v58  ;;  %2346 = vmatprep.subr.mxu1 %v5783_v1 }
 0xca6   : > { %2248 = vmatprep.subr.mxu0 %v4722_v59  ;;  %2347 = vmatpush1.msra.mxu1 %v4732_v23 }
 0xca7   : > { %2249 = vmatpush1.msra.mxu0 %v4721_v60  ;;  %2348 = vmatprep.subr.mxu1 %v5783_v1 }
 0xca8   : > { %2250 = vmatprep.subr.mxu0 %v4720_v61  ;;  %2349 = vmatpush1.msra.mxu1 %v4731_v27  ;;  %v5492_v27 = vld [vmem:[#allocation9 + $0x2] ss:$0 sm:$0xff] }
 0xca9   : > { %2251 = vmatpush1.msra.mxu0 %v4719_v62  ;;  %2350 = vmatprep.subr.mxu1 %v5783_v1 }
 0xcaa   : > { %2252 = vmatprep.subr.mxu0 %v4718_v63  ;;  %2351 = vmatpush1.msra.mxu1 %v4730_v28 }
 0xcab   : > { %2253 = vmatpush1.msra.mxu0 %v4717_v2  ;;  %2352 = vmatprep.subr.mxu1 %v5783_v1 }
 0xcac   : > { %2254 = vmatprep.subr.mxu0 %v4716_v3 }
 0xcad   : > { %2255 = vmatpush1.msra.mxu0 %v4715_v5 }
 0xcae   : > { %2256 = vmatprep.subr.mxu0 %v4714_v4 }
 0xcaf   : > { %2257 = vmatpush1.msra.mxu0 %v4713_v44  ;;  %v5491_v44 = vld [vmem:[#allocation9 + $0x1] ss:$0 sm:$0xff] }
 0xcb0   : > { %2258 = vmatprep.subr.mxu0 %v4712_v12 }
 0xcb1   : > { %2259 = vmatpush1.msra.mxu0 %v4711_v6 }
 0xcb2   : > { %5158 = vmatprep.subr.mxu0 %v5783_v1 }
 0xd62   : > { %v2190_v24 = vpop.f32.mrf.mxu0 }
 0xd63   : > { %v2194_v25 = vmul.f32 %v2190_v24, %v2190_v24 }
 0xd64   : > { %v5157_v26 = vpop.f32.mrf.mxu0 }
 0xd65   : > { %4728 = vmatmul.mubr.msk.f32.vlgmr.msra.gmra.mxu0 %vm615_vm1, %v2194_v25 }
 0xd66   : > { %5159 = vmatpush3.msra.mxu0 %v6284_v17  ;;  %5160 = vmatprep.mubr.msk.f32.mxu0 %vm5784_vm0, %v5783_v1  ;;  %v4729_v17 = vld [vmem:[%s7303_s10 + $0x110] sm:$0xff] }
 0xd67   : > { %5163 = vmatprep.subr.mxu0 %v5783_v1  ;;  %2353 = vmatpush1.msra.mxu1 %v4729_v17  ;;  %v2641_v17 = vstv %s4752_s27 }
 0xd68   : > { %2384 = vmatprep.subr.mxu1 %v5783_v1 }
 0xd69   : > { %2385 = vmatpush2.msra.mxu1 %v4745_v29  ;;  %v2809_v29 = vstv %s4757_s30  ;;  %s604_s30 = scalar_lea.vmem [#allocation16], %s4634_s11 }
 0xd6a   : > { %5198 = vmatprep.subr.mxu1 %v5783_v1 }
 0xe25   : > { %v2294_v33 = vpop.f32.mrf.mxu0 }
 0xe26   : > { %v2295_v34 = vadd.f32 %v2294_v33, %v2218_v31 }
 0xe27   : > { %v2296_v35 = vpop.f32.mrf.mxu0 }
 0xe28   : > { %v2297_v36 = vadd.f32 %v2296_v35, %v2222_v32  ;;  %v2299_v38 = vmax.f32 %v2295_v34, 0.0  ;;  %v2887_v34 = vstv %s4761_s17  ;;  %s4481_s17 = sshll.u32 %s604_s30, 4  ;;  %s7247_s17 = int_to_ptr.vmem [resolvable:$true] %s4481_s17 }
 0xe29   : > { %s5689_s22 = scalar_lea.vmem %s7247_s17, 128 }
 0xe2a   : > { %v2300_v37 = vmax.f32 %v2297_v36, 0.0  ;;  %p5690_p12 = scmp.ne.s32.totalorder %s7247_s17, %s5689_s22 }
 0xe2c   : > { %4746 = vmatprep.mubr.msk.f32.mxu1 %vm778_vm2, %v2300_v37  ;;  %v2890_v37 = vld [vmem:[#allocation10 + $0x30] sm:$0xff]  ;;  %p5691_p0 = pnand %p5690_p12, %p7355_p11 }
 0xe2d   : > { %2387 = vmatmul.mubr.f32.vlgmr.msra.gmra.mxu1 %v2299_v38 }
 0xe2e   : > { %5200 = vmatprep.mubr.msk.f32.mxu1 %vm5784_vm0, %v5783_v1  ;;  %p5692_p5 = pneg %p5691_p0 }
 0xeed   : > { %v2388_v39 = vpop.f32.mrf.mxu1 }
 0xeee   : > { %v4747_v40 = vmul.f32 -1.442695, %v2388_v39 }
 0xeef   : > { %v2390_v41 = vpop.f32.mrf.mxu1 }
 0xef0   : > { %5457 = vpow2.f32 %v4747_v40 }
 0xefd   : > { %v5458_v42 = vpop.eup %5457 }
 0xefe   : > { %v2395_v43 = vadd.f32 1.0, %v5458_v42 }
 0xf00   : > { %5459 = vrcp.f32 %v2395_v43 }
 0xf0d   : > { %v5460_v45 = vpop.eup %5459 }
 0xf0e   : > { %5161 = vmatmul.mubr.msk.f32.vlgmr.msra.gmra.mxu0 %vm778_vm2, %v5460_v45 }
 0xf0f   : > { %5165 = vmatprep.mubr.msk.f32.mxu0 %vm5784_vm0, %v5783_v1 }
 0xfce   : > { %v2467_v46 = vpop.f32.mrf.mxu0 }
 0xfcf   : > { %v2471_v47 = vmul.f32 %v2467_v46, %v2190_v24 }
 0xfd0   : > { %v5162_v48 = vpop.f32.mrf.mxu0 }
 0xfd1   : > { %v6641_v49 = vadd.f32 %v2471_v47, %v6397_v0  ;;  %v2551_v0 = vstv %s4751_s13 }
 0xfd3   : > { %5164 = vmatpush3.xpose.msk.msra.mxu0 %vm615_vm1, %v6641_v49  ;;  %v6646_v51 = vmul.f32 %v5489_v50, %v6641_v49  ;;  %v2473_v53 = vmul.f32 %v5490_v52, %v6641_v49  ;;  %v2644_v12 = vmul.f32 %v5491_v44, %v6641_v49  ;;  %v2812_v28 = vmul.f32 %v5492_v27, %v6641_v49  ;;  %v4784_v44 = vld [vmem:[%s7301_s8 + $0x1f8] sm:$0xff]  ;;  %v4802_v27 = vld [vmem:[%s7303_s10 + $0x210] sm:$0xff] }
 0xfd4   : > { %5168 = vmatprep.subr.mxu0 %v5783_v1 }
 0xfd5   : > { %5199 = vmatpush3.msra.mxu1 %v6646_v51 }
 0xfd6   : > { %5166 = vmatmul.mubr.msk.f32.vlgmr.msra.gmra.mxu0 %vm615_vm1, %v2473_v53  ;;  %3277 = vmatprep.subr.mxu1 %v5783_v1 }
 0xfd7   : > { %5169 = vmatpush3.msra.mxu0 %v2473_v53  ;;  %5170 = vmatprep.mubr.msk.f32.mxu0 %vm5784_vm0, %v5783_v1  ;;  %v2977_v53 = vstv %s4762_s29  ;;  %s4906_s29 = sshll.u32 %s5887_s24, 7  ;;  %s5785_s24 = smov [#allocation16]  }
 0xfd8   : > { %5173 = vmatprep.subr.mxu0 %v5783_v1  ;;  %s5693_s11 = sshll.u32 %s5785_s24, 4  ;;  %s5694_s11 = int_to_ptr.vmem [resolvable:$false] %s5693_s11 }
 0xfd9   : > { %s5695_s16 = scalar_lea.vmem %s5694_s11, 256  ;;  %p5696_p8 = scmp.lt.s32.totalorder %s7247_s17, %s5694_s11 }
 0xfda   : > { %p5697_p4 = scmp.lt.s32.totalorder %s5695_s16, %s5689_s22 }
 0xfdc   : > { %p5698_p1 = por %p5697_p4, %p5696_p8 }
 0xfde   : > { %p5699_p3 = pnand %p5698_p1, %p5692_p5 }
0x1096   : > { %v2546_v54 = vpop.f32.mrf.mxu0 }
0x1097   : > { %v2552_v56 = vmul.f32 %v2551_v0, %v2546_v54 }
0x1098   : > { %v5167_v57 = vpop.f32.mrf.mxu0 }
0x1099   : > { %v2555_v58 = vadd.f32 %v2554_v55, %v2552_v56  ;;  %v3055_v56 = vstv %s4766_s14 }
0x109b   : > { %v2556_v59 = vsel %vm778_vm2, %v2555_v58, -inf }
0x109c   : > { %2557 = vmax.xlane.f32.xlu0 %v2556_v59  ;;  %v3058_v59 = vld [vmem:[#allocation10 + $0x38] sm:$0xff] }
0x1125   : > { %v2558_v60 = vpop.xlane.xlu0 %2557 }
0x1126   : > { %v2559_v61 = vsub.f32 %v2555_v58, %v2558_v60 }
0x1128   : > { %v2560_v62 = vmul.f32 1.442695, %v2559_v61 }
0x112a   : > { %5461 = vpow2.f32 %v2560_v62 }
0x1137   : > { %v5462_v63 = vpop.eup %5461 }
0x1138   : > { %v2562_v2 = vsel %vm778_vm2, %v5462_v63, 0.0 }
0x1139   : > { %2563 = vadd.xlane.f32.xlu1 %v2562_v2 }
0x11c2   : > { %v2564_v3 = vpop.xlane.xlu1 %2563 }
0x11c3   : > { %5463 = vrcp.f32 %v2564_v3 }
0x11d0   : > { %v5464_v5 = vpop.eup %5463 }
0x11d1   : > { %v2566_v4 = vmul.f32 %v5464_v5, %v5462_v63 }
0x11d3   : > { %5171 = vmatmul.mubr.msk.f32.vlgmr.msra.gmra.mxu0 %vm778_vm2, %v2566_v4 }
0x11d4   : > { %5174 = vmatpush3.xpose.msk.msra.mxu0 %vm615_vm1, %v6641_v49  ;;  %5175 = vmatprep.mubr.msk.f32.mxu0 %vm5784_vm0, %v5783_v1 }
0x11d5   : > { %5178 = vmatprep.subr.mxu0 %v5783_v1 }
0x11d7   : > { %5176 = vmatmul.mubr.msk.f32.vlgmr.msra.gmra.mxu0 %vm615_vm1, %v2644_v12 }
0x11d8   : > { %5179 = vmatpush3.msra.mxu0 %v2644_v12  ;;  %5180 = vmatprep.mubr.msk.f32.mxu0 %vm5784_vm0, %v5783_v1  ;;  %v4783_v12 = vld [vmem:[%s7301_s8 + $0x1f0] sm:$0xff] }
0x11d9   : > { %5183 = vmatprep.subr.mxu0 %v5783_v1 }
0x1293   : > { %v2637_v6 = vpop.f32.mrf.mxu0 }
0x1294   : > { %v2642_v31 = vmul.f32 %v2641_v17, %v2637_v6  ;;  %v4782_v6 = vld [vmem:[%s7301_s8 + $0x1e8] sm:$0xff]  ;;  %v4800_v17 = vld [vmem:[%s7303_s10 + $0x200] sm:$0xff] }
0x1295   : > { %v5172_v7 = vpop.f32.mrf.mxu0 }
0x1296   : > { %v4781_v7 = vld [vmem:[%s7301_s8 + $0x1e0] sm:$0xff] }
0x1297   : > { %v2714_v9 = vpop.f32.mrf.mxu0 }
0x1298   : > { %v2720_v15 = vmul.f32 %v2719_v8, %v2714_v9  ;;  %v4780_v8 = vld [vmem:[%s7301_s8 + $0x1d8] sm:$0xff]  ;;  %v4779_v9 = vld [vmem:[%s7301_s8 + $0x1d0] sm:$0xff] }
0x1299   : > { %v5177_v16 = vpop.f32.mrf.mxu0 }
0x129a   : > { %v2723_v18 = vadd.f32 %v2722_v11, %v2720_v15  ;;  %v4778_v11 = vld [vmem:[%s7301_s8 + $0x1c8] sm:$0xff] }
0x129c   : > { %v2724_v19 = vsel %vm778_vm2, %v2723_v18, -inf }
0x129d   : > { %2725 = vmax.xlane.f32.xlu0 %v2724_v19  ;;  %v4777_v19 = vld [vmem:[%s7301_s8 + $0x1c0] sm:$0xff] }
0x1326   : > { %v2726_v20 = vpop.xlane.xlu0 %2725 }
0x1327   : > { %v2727_v21 = vsub.f32 %v2723_v18, %v2726_v20  ;;  %v4776_v20 = vld [vmem:[%s7301_s8 + $0x1b8] sm:$0xff] }
0x1329   : > { %v2728_v14 = vmul.f32 1.442695, %v2727_v21  ;;  %v4775_v21 = vld [vmem:[%s7301_s8 + $0x1b0] sm:$0xff] }
0x132b   : > { %5465 = vpow2.f32 %v2728_v14  ;;  %v4774_v14 = vld [vmem:[%s7301_s8 + $0x1a8] sm:$0xff] }
0x1338   : > { %v5466_v22 = vpop.eup %5465 }
0x1339   : > { %v2730_v23 = vsel %vm778_vm2, %v5466_v22, 0.0 }
0x133a   : > { %2731 = vadd.xlane.f32.xlu1 %v2730_v23  ;;  %v4772_v23 = vld [vmem:[%s7301_s8 + $0x198] sm:$0xff] }
0x13c3   : > { %v2732_v24 = vpop.xlane.xlu1 %2731 }
0x13c4   : > { %5467 = vrcp.f32 %v2732_v24  ;;  %v4771_v24 = vld [vmem:[%s7301_s8 + $0x190] sm:$0xff] }
0x13d1   : > { %v5468_v25 = vpop.eup %5467 }
0x13d2   : > { %v2734_v26 = vmul.f32 %v5468_v25, %v5466_v22  ;;  %v4773_v22 = vld [vmem:[%s7301_s8 + $0x1a0] sm:$0xff]  ;;  %v4770_v25 = vld [vmem:[%s7301_s8 + $0x188] sm:$0xff] }
0x13d4   : > { %5181 = vmatmul.mubr.msk.f32.vlgmr.msra.gmra.mxu0 %vm778_vm2, %v2734_v26  ;;  %v4769_v26 = vld [vmem:[%s7301_s8 + $0x180] sm:$0xff] }
0x13d5   : > { %5184 = vmatpush3.xpose.msk.msra.mxu0 %vm615_vm1, %v6641_v49  ;;  %5185 = vmatprep.mubr.msk.f32.mxu0 %vm5784_vm0, %v5783_v1 }
0x13d6   : > { %5188 = vmatprep.subr.mxu0 %v5783_v1 }
0x13d8   : > { %5186 = vmatmul.mubr.msk.f32.vlgmr.msra.gmra.mxu0 %vm615_vm1, %v2812_v28 }
0x13d9   : > { %5189 = vmatpush3.msra.mxu0 %v2812_v28  ;;  %5190 = vmatprep.mubr.msk.f32.mxu0 %vm5784_vm0, %v5783_v1  ;;  %v4801_v28 = vld [vmem:[%s7303_s10 + $0x208] sm:$0xff] }
0x13da   : > { %5193 = vmatprep.subr.mxu0 %v5783_v1 }
0x1494   : > { %v2805_v30 = vpop.f32.mrf.mxu0 }
0x1495   : > { %v2810_v32 = vmul.f32 %v2809_v29, %v2805_v30  ;;  %v4799_v29 = vld [vmem:[%s7303_s10 + $0x1f8] sm:$0xff]  ;;  %v4798_v30 = vld [vmem:[%s7303_s10 + $0x1f0] sm:$0xff] }
0x1496   : > { %v5182_v33 = vpop.f32.mrf.mxu0 }
0x1497   : > { %v2811_v35 = vadd.f32 %v2810_v32, %v2642_v31  ;;  %v4797_v31 = vld [vmem:[%s7303_s10 + $0x1e8] sm:$0xff]  ;;  %v4796_v32 = vld [vmem:[%s7303_s10 + $0x1e0] sm:$0xff]  ;;  %v4795_v33 = vld [vmem:[%s7303_s10 + $0x1d8] sm:$0xff] }
0x1498   : > { %v2882_v36 = vpop.f32.mrf.mxu0 }
0x1499   : > { %v2888_v38 = vmul.f32 %v2887_v34, %v2882_v36  ;;  %v4794_v34 = vld [vmem:[%s7303_s10 + $0x1d0] sm:$0xff]  ;;  %v4792_v36 = vld [vmem:[%s7303_s10 + $0x1c0] sm:$0xff] }
0x149a   : > { %v5187_v39 = vpop.f32.mrf.mxu0 }
0x149b   : > { %v2891_v40 = vadd.f32 %v2890_v37, %v2888_v38  ;;  %v4791_v37 = vld [vmem:[%s7303_s10 + $0x1b8] sm:$0xff]  ;;  %v4790_v38 = vld [vmem:[%s7303_s10 + $0x1b0] sm:$0xff]  ;;  %v3145_v39 = vstv %s4767_s25  ;;  %s7252_s25 = scalar_lea.hbm %s7354_s4, %s4906_s29 }
0x149d   : > { %v2892_v41 = vsel %vm778_vm2, %v2891_v40, -inf }
0x149e   : > { %2893 = vmax.xlane.f32.xlu0 %v2892_v41 }
0x1527   : > { %v2894_v42 = vpop.xlane.xlu0 %2893 }
0x1528   : > { %v2895_v43 = vsub.f32 %v2891_v40, %v2894_v42 }
0x152a   : > { %v2896_v45 = vmul.f32 1.442695, %v2895_v43 }
0x152c   : > { %5469 = vpow2.f32 %v2896_v45 }
0x1539   : > { %v5470_v46 = vpop.eup %5469 }
0x153a   : > { %v2898_v47 = vsel %vm778_vm2, %v5470_v46, 0.0 }
0x153b   : > { %2899 = vadd.xlane.f32.xlu1 %v2898_v47  ;;  %v6805_v47 = vld [vmem:[#allocation13] sm:$0xff] }
0x15c4   : > { %v2900_v48 = vpop.xlane.xlu1 %2899 }
0x15c5   : > { %5471 = vrcp.f32 %v2900_v48  ;;  %v4789_v48 = vld [vmem:[%s7303_s10 + $0x1a8] sm:$0xff] }
0x15d2   : > { %v5472_v50 = vpop.eup %5471 }
0x15d3   : > { %v2902_v52 = vmul.f32 %v5472_v50, %v5470_v46  ;;  %v4787_v50 = vld [vmem:[%s7303_s10 + $0x198] sm:$0xff] }
0x15d5   : > { %5191 = vmatmul.mubr.msk.f32.vlgmr.msra.gmra.mxu0 %vm778_vm2, %v2902_v52  ;;  %v4803_v52 = vld [vmem:[%s7303_s10 + $0x218] sm:$0xff] }
0x15d6   : > { %5194 = vmatpush3.xpose.msk.msra.mxu0 %vm615_vm1, %v6641_v49  ;;  %5195 = vmatprep.mubr.msk.f32.mxu0 %vm5784_vm0, %v5783_v1 }
0x15d7   : > { %3199 = vmatprep.subr.mxu0 %v4784_v44  ;;  %v4812_v44 = vld [vmem:[%s7298_s5 + $0x68] sm:$0xff] }
0x15d9   : > { %5196 = vmatmul.mubr.msk.f32.vlgmr.msra.gmra.mxu0 %vm615_vm1, %v6646_v51 }
0x15da   : > { %3247 = vmatprep.mubr.f32.mxu0 %v5783_v1  ;;  %3200 = vmatpush1.msra.mxu0 %v4783_v12  ;;  %v4811_v12 = vld [vmem:[%s7298_s5 + $0x60] sm:$0xff] }
0x15db   : > { %3201 = vmatprep.subr.mxu0 %v4782_v6  ;;  %v4810_v6 = vld [vmem:[%s7298_s5 + $0x58] sm:$0xff] }
0x15dc   : > { %3202 = vmatpush1.msra.mxu0 %v4781_v7  ;;  %v4809_v7 = vld [vmem:[%s7298_s5 + $0x50] sm:$0xff] }
0x15dd   : > { %3203 = vmatprep.subr.mxu0 %v4780_v8  ;;  %v4808_v8 = vld [vmem:[%s7298_s5 + $0x48] sm:$0xff] }
0x15de   : > { %3204 = vmatpush1.msra.mxu0 %v4779_v9  ;;  %v4807_v9 = vld [vmem:[%s7298_s5 + $0x40] sm:$0xff] }
0x15df   : > { %3205 = vmatprep.subr.mxu0 %v4778_v11 }
0x15e0   : > { %3206 = vmatpush1.msra.mxu0 %v4777_v19  ;;  %v4822_v19 = vld [vmem:[%s7299_s6 + $0x70] sm:$0xff] }
0x15e1   : > { %3207 = vmatprep.subr.mxu0 %v4776_v20  ;;  %v4821_v20 = vld [vmem:[%s7299_s6 + $0x68] sm:$0xff] }
0x15e2   : > { %3208 = vmatpush1.msra.mxu0 %v4775_v21  ;;  %v4820_v21 = vld [vmem:[%s7299_s6 + $0x60] sm:$0xff] }
0x15e3   : > { %3209 = vmatprep.subr.mxu0 %v4774_v14  ;;  %v4819_v14 = vld [vmem:[%s7299_s6 + $0x58] sm:$0xff] }
0x15e4   : > { %3210 = vmatpush1.msra.mxu0 %v4773_v22  ;;  %v4818_v22 = vld [vmem:[%s7299_s6 + $0x50] sm:$0xff] }
0x15e5   : > { %3211 = vmatprep.subr.mxu0 %v4772_v23  ;;  %v4817_v23 = vld [vmem:[%s7299_s6 + $0x48] sm:$0xff] }
0x15e6   : > { %3212 = vmatpush1.msra.mxu0 %v4771_v24  ;;  %v4816_v24 = vld [vmem:[%s7299_s6 + $0x40] sm:$0xff] }
0x15e7   : > { %3213 = vmatprep.subr.mxu0 %v4770_v25  ;;  %v4840_v25 = vld [vmem:[%s7301_s8 + $0x278] sm:$0xff] }
0x15e8   : > { %3214 = vmatpush1.msra.mxu0 %v4769_v26  ;;  %v4839_v26 = vld [vmem:[%s7301_s8 + $0x270] sm:$0xff] }
0x15e9   : > { %5203 = vmatprep.subr.mxu0 %v5783_v1 }
0x1695   : > { %v2973_v0 = vpop.f32.mrf.mxu0 }
0x1696   : > { %v2978_v54 = vmul.f32 %v2977_v53, %v2973_v0  ;;  %v4785_v53 = vld [vmem:[%s7302_s9 + $0x6] sm:$0x3] }
0x1697   : > { %v5192_v55 = vpop.f32.mrf.mxu0  ;;  %v3173_v0 = vrot.slane %v4785_v53, %v6272_v10 }
0x1698   : > { %v6692_v57 = vadd.f32 %v2978_v54, %v2811_v35  ;;  %v4793_v35 = vld [vmem:[%s7303_s10 + $0x1c8] sm:$0xff]  ;;  %v3177_v54 = vrot.slane %v4785_v53, %v6277_v13 }
0x1699   : > { %v3050_v58 = vpop.f32.mrf.mxu0  ;;  %v4852_v53 = vld [vmem:[%s7303_s10 + $0x268] sm:$0xff] }
0x169a   : > { %v3056_v60 = vmul.f32 %v3055_v56, %v3050_v58 }
0x169b   : > { %v5197_v61 = vpop.f32.mrf.mxu0 }
0x169c   : > { %v3059_v62 = vadd.f32 %v3058_v59, %v3056_v60 }
0x169e   : > { %v3060_v63 = vsel %vm778_vm2, %v3059_v62, -inf }
0x169f   : > { %3061 = vmax.xlane.f32.xlu0 %v3060_v63 }
0x1728   : > { %v3062_v51 = vpop.xlane.xlu0 %3061 }
0x1729   : > { %v3063_v2 = vsub.f32 %v3059_v62, %v3062_v51 }
0x172b   : > { %v3064_v3 = vmul.f32 1.442695, %v3063_v2 }
0x172d   : > { %5473 = vpow2.f32 %v3064_v3  ;;  %v4814_v3 = vld [vmem:[%s7298_s5 + $0x78] sm:$0xff] }
0x173a   : > { %v5474_v5 = vpop.eup %5473 }
0x173b   : > { %v3066_v4 = vsel %vm778_vm2, %v5474_v5, 0.0 }
0x173c   : > { %3067 = vadd.xlane.f32.xlu1 %v3066_v4  ;;  %v4813_v4 = vld [vmem:[%s7298_s5 + $0x70] sm:$0xff] }
0x17c5   : > { %v3068_v15 = vpop.xlane.xlu1 %3067 }
0x17c6   : > { %5475 = vrcp.f32 %v3068_v15 }
0x17d3   : > { %v5476_v16 = vpop.eup %5475 }
0x17d4   : > { %v3070_v18 = vmul.f32 %v5476_v16, %v5474_v5  ;;  %v4823_v16 = vld [vmem:[%s7299_s6 + $0x78] sm:$0xff] }
0x17d6   : > { %5201 = vmatmul.mubr.msk.f32.vlgmr.msra.gmra.mxu1 %vm778_vm2, %v3070_v18 }
0x17d7   : > { %3278 = vmatpush1.msra.mxu1 %v4802_v27  ;;  %v4838_v27 = vld [vmem:[%s7301_s8 + $0x268] sm:$0xff] }
0x17d8   : > { %3279 = vmatprep.subr.mxu1 %v5783_v1 }
0x17d9   : > { %3280 = vmatpush1.msra.mxu1 %v4801_v28  ;;  %v4837_v28 = vld [vmem:[%s7301_s8 + $0x260] sm:$0xff] }
0x17da   : > { %3281 = vmatprep.subr.mxu1 %v5783_v1 }
0x17db   : > { %3282 = vmatpush1.msra.mxu1 %v4800_v17  ;;  %v4836_v17 = vld [vmem:[%s7301_s8 + $0x258] sm:$0xff] }
0x17dc   : > { %3283 = vmatprep.subr.mxu1 %v5783_v1 }
0x17dd   : > { %3284 = vmatpush1.msra.mxu1 %v4799_v29  ;;  %v4835_v29 = vld [vmem:[%s7301_s8 + $0x250] sm:$0xff] }
0x17de   : > { %3285 = vmatprep.subr.mxu1 %v5783_v1 }
0x17df   : > { %3286 = vmatpush1.msra.mxu1 %v4798_v30  ;;  %v4834_v30 = vld [vmem:[%s7301_s8 + $0x248] sm:$0xff] }
0x17e0   : > { %3287 = vmatprep.subr.mxu1 %v5783_v1 }
0x17e1   : > { %3288 = vmatpush1.msra.mxu1 %v4797_v31  ;;  %v4833_v31 = vld [vmem:[%s7301_s8 + $0x240] sm:$0xff] }
0x17e2   : > { %3289 = vmatprep.subr.mxu1 %v5783_v1 }
0x17e3   : > { %3290 = vmatpush1.msra.mxu1 %v4796_v32  ;;  %v4832_v32 = vld [vmem:[%s7301_s8 + $0x238] sm:$0xff] }
0x17e4   : > { %3291 = vmatprep.subr.mxu1 %v5783_v1 }
0x17e5   : > { %3292 = vmatpush1.msra.mxu1 %v4795_v33  ;;  %v4831_v33 = vld [vmem:[%s7301_s8 + $0x230] sm:$0xff] }
0x17e6   : > { %3293 = vmatprep.subr.mxu1 %v5783_v1 }
0x17e7   : > { %3294 = vmatpush1.msra.mxu1 %v4794_v34  ;;  %v4830_v34 = vld [vmem:[%s7301_s8 + $0x228] sm:$0xff] }
0x17e8   : > { %3295 = vmatprep.subr.mxu1 %v5783_v1 }
0x17e9   : > { %3296 = vmatpush1.msra.mxu1 %v4793_v35  ;;  %v4829_v35 = vld [vmem:[%s7301_s8 + $0x220] sm:$0xff] }
0x17ea   : > { %3297 = vmatprep.subr.mxu1 %v5783_v1 }
0x17eb   : > { %3298 = vmatpush1.msra.mxu1 %v4792_v36  ;;  %v4828_v36 = vld [vmem:[%s7301_s8 + $0x218] sm:$0xff] }
0x17ec   : > { %3299 = vmatprep.subr.mxu1 %v5783_v1 }
0x17ed   : > { %3300 = vmatpush1.msra.mxu1 %v4791_v37 }
0x17ee   : > { %3301 = vmatprep.subr.mxu1 %v5783_v1 }
0x17ef   : > { %3302 = vmatpush1.msra.mxu1 %v4790_v38 }
0x17f0   : > { %3303 = vmatprep.subr.mxu1 %v5783_v1 }
0x17f1   : > { %3304 = vmatpush1.msra.mxu1 %v4789_v48  ;;  %v4856_v48 = vld [vmem:[%s7303_s10 + $0x288] sm:$0xff] }
0x17f2   : > { %3305 = vmatprep.subr.mxu1 %v5783_v1 }
0x1896   : > { %v3141_v40 = vpop.f32.mrf.mxu1 }
0x1897   : > { %v3146_v41 = vmul.f32 %v3145_v39, %v3141_v40 }
0x1898   : > { %v5202_v42 = vpop.f32.mrf.mxu1 }
0x1899   : > { %v3147_v43 = vadd.f32 %v3146_v41, %v6692_v57  ;;  %v4827_v41 = vld [vmem:[%s7301_s8 + $0x210] sm:$0xff]  ;;  %v4826_v42 = vld [vmem:[%s7301_s8 + $0x208] sm:$0xff] }
0x189b   : > { %v6800_v45 = vadd.f32 %v3147_v43, %v6641_v49  ;;  %v4788_v49 = vld [vmem:[%s7303_s10 + $0x1a0] sm:$0xff] }
0x189c   : > { %3306 = vmatpush1.msra.mxu1 %v4788_v49  ;;  %v4825_v43 = vld [vmem:[%s7301_s8 + $0x200] sm:$0xff] }
0x189d   : > { %v3149_v46 = vmul.f32 %v6800_v45, %v6800_v45  ;;  %3307 = vmatprep.subr.mxu1 %v5783_v1  ;;  %v4855_v49 = vld [vmem:[%s7303_s10 + $0x280] sm:$0xff] }
0x189e   : > { %3308 = vmatpush1.msra.mxu1 %v4787_v50  ;;  %v4854_v50 = vld [vmem:[%s7303_s10 + $0x278] sm:$0xff] }
0x189f   : > { %4786 = vmatmul.mubr.msk.f32.vlgmr.msra.gmra.mxu0 %vm615_vm1, %v3149_v46  ;;  %3339 = vmatprep.subr.mxu1 %v5783_v1  ;;  %v4857_v46 = vld [vmem:[%s7303_s10 + $0x290] sm:$0xff] }
0x18a0   : > { %5204 = vmatpush3.msra.mxu0 %v6805_v47  ;;  %5205 = vmatprep.mubr.msk.f32.mxu0 %vm5784_vm0, %v5783_v1 }
0x18a1   : > { %5208 = vmatprep.subr.mxu0 %v5783_v1  ;;  %3340 = vmatpush2.msra.mxu1 %v4803_v52  ;;  %v4853_v52 = vld [vmem:[%s7303_s10 + $0x270] sm:$0xff] }
0x18a2   : > { %3643 = vmatprep.subr.mxu1 %v4840_v25  ;;  %v3874_v25 = vld [vmem:[#allocation12 + $0x50] sm:$0xff] }
0x195f   : > { %v3249_v55 = vpop.f32.mrf.mxu0 }
0x1960   : > { %v3250_v56 = vadd.f32 %v3249_v55, %v3173_v0  ;;  %v4851_v0 = vld [vmem:[%s7303_s10 + $0x260] sm:$0xff]  ;;  %v4849_v55 = vld [vmem:[%s7303_s10 + $0x250] sm:$0xff] }
0x1961   : > { %v3251_v57 = vpop.f32.mrf.mxu0 }
0x1962   : > { %v3252_v58 = vadd.f32 %v3251_v57, %v3177_v54  ;;  %v3254_v60 = vmax.f32 %v3250_v56, 0.0  ;;  %v4850_v54 = vld [vmem:[%s7303_s10 + $0x258] sm:$0xff]  ;;  %v4848_v56 = vld [vmem:[%s7303_s10 + $0x248] sm:$0xff]  ;;  %v4847_v57 = vld [vmem:[%s7303_s10 + $0x240] sm:$0xff] }
0x1964   : > { %v3255_v59 = vmax.f32 %v3252_v58, 0.0  ;;  %v4846_v58 = vld [vmem:[%s7303_s10 + $0x238] sm:$0xff] }
0x1966   : > { %4804 = vmatprep.mubr.msk.f32.mxu1 %vm778_vm2, %v3255_v59 }
0x1967   : > { %3342 = vmatmul.mubr.f32.vlgmr.msra.gmra.mxu1 %v3254_v60 }
0x1968   : > { %3691 = vmatprep.mubr.f32.mxu1 %v5783_v1  ;;  %3644 = vmatpush1.msra.mxu1 %v4839_v26  ;;  %v3873_v26 = vld [vmem:[#allocation12 + $0x48] sm:$0xff] }
0x1969   : > { %3645 = vmatprep.subr.mxu1 %v4838_v27  ;;  %v3872_v27 = vld [vmem:[#allocation12 + $0x40] sm:$0xff] }
0x196a   : > { %3646 = vmatpush1.msra.mxu1 %v4837_v28  ;;  %v4879_v28 = vld [vmem:[%s7301_s8 + $0x2f8] sm:$0xff] }
0x196b   : > { %3647 = vmatprep.subr.mxu1 %v4836_v17 }
0x196c   : > { %3648 = vmatpush1.msra.mxu1 %v4835_v29 }
0x196d   : > { %3649 = vmatprep.subr.mxu1 %v4834_v30  ;;  %v4878_v30 = vld [vmem:[%s7301_s8 + $0x2f0] sm:$0xff] }
0x196e   : > { %3650 = vmatpush1.msra.mxu1 %v4833_v31 }
0x196f   : > { %3651 = vmatprep.subr.mxu1 %v4832_v32  ;;  %v4877_v32 = vld [vmem:[%s7301_s8 + $0x2e8] sm:$0xff] }
0x1970   : > { %3652 = vmatpush1.msra.mxu1 %v4831_v33  ;;  %v4876_v33 = vld [vmem:[%s7301_s8 + $0x2e0] sm:$0xff] }
0x1971   : > { %3653 = vmatprep.subr.mxu1 %v4830_v34  ;;  %v4875_v34 = vld [vmem:[%s7301_s8 + $0x2d8] sm:$0xff] }
0x1972   : > { %3654 = vmatpush1.msra.mxu1 %v4829_v35  ;;  %v4874_v35 = vld [vmem:[%s7301_s8 + $0x2d0] sm:$0xff] }
0x1973   : > { %3655 = vmatprep.subr.mxu1 %v4828_v36  ;;  %v4873_v36 = vld [vmem:[%s7301_s8 + $0x2c8] sm:$0xff] }
0x1974   : > { %3656 = vmatpush1.msra.mxu1 %v4827_v41  ;;  %v4869_v41 = vld [vmem:[%s7301_s8 + $0x2a8] sm:$0xff] }
0x1975   : > { %3657 = vmatprep.subr.mxu1 %v4826_v42  ;;  %v4868_v42 = vld [vmem:[%s7301_s8 + $0x2a0] sm:$0xff] }
0x1976   : > { %3658 = vmatpush1.msra.mxu1 %v4825_v43  ;;  %v4867_v43 = vld [vmem:[%s7301_s8 + $0x298] sm:$0xff] }
0x1977   : > { %5246 = vmatprep.subr.mxu1 %v5783_v1 }
0x1a27   : > { %v3343_v61 = vpop.f32.mrf.mxu1 }
0x1a28   : > { %v4805_v62 = vmul.f32 -1.442695, %v3343_v61 }
0x1a29   : > { %v3345_v63 = vpop.f32.mrf.mxu1 }
0x1a2a   : > { %5477 = vpow2.f32 %v4805_v62  ;;  %v4845_v62 = vld [vmem:[%s7303_s10 + $0x230] sm:$0xff]  ;;  %v4844_v63 = vld [vmem:[%s7303_s10 + $0x228] sm:$0xff] }
0x1a37   : > { %v5478_v51 = vpop.eup %5477 }
0x1a38   : > { %v3350_v2 = vadd.f32 1.0, %v5478_v51  ;;  %v4843_v51 = vld [vmem:[%s7303_s10 + $0x220] sm:$0xff] }
0x1a3a   : > { %5479 = vrcp.f32 %v3350_v2  ;;  %v4859_v2 = vld [vmem:[%s7303_s10 + $0x2a0] sm:$0xff] }
0x1a47   : > { %v5480_v5 = vpop.eup %5479 }
0x1a48   : > { %5206 = vmatmul.mubr.msk.f32.vlgmr.msra.gmra.mxu0 %vm778_vm2, %v5480_v5 }
0x1a49   : > { %5209 = vmatpush3.msra.mxu0 %v4814_v3  ;;  %5224 = vmatprep.mubr.msk.f32.mxu0 %vm5784_vm0, %v5783_v1  ;;  %v4841_v3 = vld [vmem:[%s7302_s9 + $0x8] sm:$0x3] }
0x1a4a   : > { %5210 = vmatprep.subr.mxu0 %v5783_v1  ;;  %v3617_v5 = vrot.slane %v4841_v3, %v6272_v10 }
0x1a4b   : > { %5211 = vmatpush3.msra.mxu0 %v4813_v4  ;;  %v3621_v4 = vrot.slane %v4841_v3, %v6277_v13  ;;  %v4883_v3 = vld [vmem:[%s7303_s10 + $0x2b0] sm:$0xff] }
0x1a4c   : > { %5212 = vmatprep.subr.mxu0 %v5783_v1 }
0x1a4d   : > { %5213 = vmatpush3.msra.mxu0 %v4812_v44 }
0x1a4e   : > { %5214 = vmatprep.subr.mxu0 %v5783_v1 }
0x1a4f   : > { %5215 = vmatpush3.msra.mxu0 %v4811_v12 }
0x1a50   : > { %5216 = vmatprep.subr.mxu0 %v5783_v1 }
0x1a51   : > { %5217 = vmatpush3.msra.mxu0 %v4810_v6 }
0x1a52   : > { %5218 = vmatprep.subr.mxu0 %v5783_v1 }
0x1a53   : > { %5219 = vmatpush3.msra.mxu0 %v4809_v7 }
0x1a54   : > { %5220 = vmatprep.subr.mxu0 %v5783_v1 }
0x1a55   : > { %5221 = vmatpush3.msra.mxu0 %v4808_v8 }
0x1a56   : > { %5222 = vmatprep.subr.mxu0 %v5783_v1 }
0x1a57   : > { %5223 = vmatpush3.msra.mxu0 %v4807_v9 }
0x1a58   : > { %5227 = vmatprep.subr.mxu0 %v5783_v1 }
0x1b08   : > { %v3422_v11 = vpop.f32.mrf.mxu0 }
0x1b09   : > { %v3426_v15 = vmul.f32 %v3422_v11, %v6800_v45 }
0x1b0a   : > { %v5207_v18 = vpop.f32.mrf.mxu0 }
0x1b0b   : > { %5225 = vmatmul.mubr.msk.f32.vlgmr.msra.gmra.mxu0 %vm615_vm1, %v3426_v15  ;;  %v3427_v37 = vadd.f32 %v3426_v15, %v6800_v45  ;;  %v4858_v45 = vld [vmem:[%s7303_s10 + $0x298] sm:$0xff] }
0x1b0c   : > { %5228 = vmatpush3.msra.mxu0 %v4823_v16  ;;  %5243 = vmatprep.mubr.msk.f32.mxu0 %vm5784_vm0, %v5783_v1 }
0x1b0d   : > { %5229 = vmatprep.subr.mxu0 %v5783_v1 }
0x1b0e   : > { %5230 = vmatpush3.msra.mxu0 %v4822_v19 }
0x1b0f   : > { %5231 = vmatprep.subr.mxu0 %v5783_v1 }
0x1b10   : > { %5232 = vmatpush3.msra.mxu0 %v4821_v20  ;;  %v3879_v20 = vld [vmem:[#allocation12 + $0x78] sm:$0xff] }
0x1b11   : > { %5233 = vmatprep.subr.mxu0 %v5783_v1 }
0x1b12   : > { %5234 = vmatpush3.msra.mxu0 %v4820_v21 }
0x1b13   : > { %5235 = vmatprep.subr.mxu0 %v5783_v1 }
0x1b14   : > { %5236 = vmatpush3.msra.mxu0 %v4819_v14  ;;  %v3878_v14 = vld [vmem:[#allocation12 + $0x70] sm:$0xff] }
0x1b15   : > { %5237 = vmatprep.subr.mxu0 %v5783_v1 }
0x1b16   : > { %5238 = vmatpush3.msra.mxu0 %v4818_v22  ;;  %v3877_v22 = vld [vmem:[#allocation12 + $0x68] sm:$0xff] }
0x1b17   : > { %5239 = vmatprep.subr.mxu0 %v5783_v1 }
0x1b18   : > { %5240 = vmatpush3.msra.mxu0 %v4817_v23  ;;  %v3876_v23 = vld [vmem:[#allocation12 + $0x60] sm:$0xff] }
0x1b19   : > { %5241 = vmatprep.subr.mxu0 %v5783_v1 }
0x1b1a   : > { %5242 = vmatpush3.msra.mxu0 %v4816_v24  ;;  %v3875_v24 = vld [vmem:[#allocation12 + $0x58] sm:$0xff] }
0x1b1b   : > { %3721 = vmatprep.subr.mxu0 %v5783_v1 }
0x1bcb   : > { %v3506_v38 = vpop.f32.mrf.mxu0 }
0x1bcc   : > { %v6944_v39 = vadd.f32 %v3506_v38, %v3427_v37  ;;  %v4872_v37 = vld [vmem:[%s7301_s8 + $0x2c0] sm:$0xff]  ;;  %v4871_v38 = vld [vmem:[%s7301_s8 + $0x2b8] sm:$0xff] }
0x1bcd   : > { %v5226_v40 = vpop.f32.mrf.mxu0 }
0x1bce   : > { %5244 = vmatmul.mubr.msk.f32.vlgmr.msra.gmra.mxu0 %vm615_vm1, %v6944_v39  ;;  %v4870_v40 = vld [vmem:[%s7301_s8 + $0x2b0] sm:$0xff] }
0x1bcf   : > { %3722 = vmatpush1.msra.mxu0 %v4858_v45  ;;  %v4866_v45 = vld [vmem:[%s7301_s8 + $0x290] sm:$0xff] }
0x1bd0   : > { %3723 = vmatprep.subr.mxu0 %v5783_v1 }
0x1bd1   : > { %3724 = vmatpush1.msra.mxu0 %v4857_v46  ;;  %v4865_v46 = vld [vmem:[%s7301_s8 + $0x288] sm:$0xff] }
0x1bd2   : > { %3725 = vmatprep.subr.mxu0 %v5783_v1 }
0x1bd3   : > { %3726 = vmatpush1.msra.mxu0 %v4856_v48  ;;  %v4864_v48 = vld [vmem:[%s7301_s8 + $0x280] sm:$0xff] }
0x1bd4   : > { %3727 = vmatprep.subr.mxu0 %v5783_v1 }
0x1bd5   : > { %3728 = vmatpush1.msra.mxu0 %v4855_v49  ;;  %v4897_v49 = vld [vmem:[%s7303_s10 + $0x320] sm:$0xff] }
0x1bd6   : > { %3729 = vmatprep.subr.mxu0 %v5783_v1 }
0x1bd7   : > { %3730 = vmatpush1.msra.mxu0 %v4854_v50  ;;  %v4896_v50 = vld [vmem:[%s7303_s10 + $0x318] sm:$0xff] }
0x1bd8   : > { %3731 = vmatprep.subr.mxu0 %v5783_v1 }
0x1bd9   : > { %3732 = vmatpush1.msra.mxu0 %v4853_v52  ;;  %v4895_v52 = vld [vmem:[%s7303_s10 + $0x310] sm:$0xff] }
0x1bda   : > { %3733 = vmatprep.subr.mxu0 %v5783_v1 }
0x1bdb   : > { %3734 = vmatpush1.msra.mxu0 %v4852_v53  ;;  %v4894_v53 = vld [vmem:[%s7303_s10 + $0x308] sm:$0xff] }
0x1bdc   : > { %3735 = vmatprep.subr.mxu0 %v5783_v1 }
0x1bdd   : > { %3736 = vmatpush1.msra.mxu0 %v4851_v0  ;;  %v4893_v0 = vld [vmem:[%s7303_s10 + $0x300] sm:$0xff] }
0x1bde   : > { %3737 = vmatprep.subr.mxu0 %v5783_v1 }
0x1bdf   : > { %3738 = vmatpush1.msra.mxu0 %v4850_v54  ;;  %v4892_v54 = vld [vmem:[%s7303_s10 + $0x2f8] sm:$0xff] }
0x1be0   : > { %3739 = vmatprep.subr.mxu0 %v5783_v1 }
0x1be1   : > { %3740 = vmatpush1.msra.mxu0 %v4849_v55  ;;  %v4891_v55 = vld [vmem:[%s7303_s10 + $0x2f0] sm:$0xff] }
0x1be2   : > { %3741 = vmatprep.subr.mxu0 %v5783_v1 }
0x1be3   : > { %3742 = vmatpush1.msra.mxu0 %v4848_v56  ;;  %v4890_v56 = vld [vmem:[%s7303_s10 + $0x2e8] sm:$0xff] }
0x1be4   : > { %3743 = vmatprep.subr.mxu0 %v5783_v1 }
0x1be5   : > { %3744 = vmatpush1.msra.mxu0 %v4847_v57  ;;  %v4889_v57 = vld [vmem:[%s7303_s10 + $0x2e0] sm:$0xff] }
0x1be6   : > { %3745 = vmatprep.subr.mxu0 %v5783_v1 }
0x1be7   : > { %3746 = vmatpush1.msra.mxu0 %v4846_v58  ;;  %v4888_v58 = vld [vmem:[%s7303_s10 + $0x2d8] sm:$0xff] }
0x1be8   : > { %3747 = vmatprep.subr.mxu0 %v5783_v1 }
0x1be9   : > { %3748 = vmatpush1.msra.mxu0 %v4845_v62 }
0x1bea   : > { %3749 = vmatprep.subr.mxu0 %v5783_v1 }
0x1beb   : > { %3750 = vmatpush1.msra.mxu0 %v4844_v63 }
0x1bec   : > { %3751 = vmatprep.subr.mxu0 %v5783_v1 }
0x1bed   : > { %3752 = vmatpush1.msra.mxu0 %v4843_v51 }
0x1bee   : > { %3783 = vmatprep.subr.mxu0 %v5783_v1 }
0x1bef   : > { %3784 = vmatpush2.msra.mxu0 %v4859_v2  ;;  %v4884_v2 = vld [vmem:[%s7303_s10 + $0x2b8] sm:$0xff] }
0x1bf0   : > { %4081 = vmatprep.subr.mxu0 %v5783_v1 }
0x1c8e   : > { %v7010_v59 = vpop.f32.mrf.mxu0 }
0x1c8f   : > { %v3593_v60 = vmul.f32 %v7010_v59, %v7010_v59 }
0x1c90   : > { %v5245_v61 = vpop.f32.mrf.mxu0 }
0x1c91   : > { %4842 = vmatmul.mubr.msk.f32.vlgmr.msra.gmra.mxu1 %vm615_vm1, %v3593_v60  ;;  %v4886_v60 = vld [vmem:[%s7303_s10 + $0x2c8] sm:$0xff]  ;;  %v4885_v61 = vld [vmem:[%s7303_s10 + $0x2c0] sm:$0xff] }
0x1c92   : > { %5247 = vmatpush3.msra.mxu1 %v6805_v47  ;;  %5248 = vmatprep.mubr.msk.f32.mxu1 %vm5784_vm0, %v5783_v1 }
0x1c93   : > { %5251 = vmatprep.subr.mxu1 %v5783_v1 }
0x1d51   : > { %v3693_v44 = vpop.f32.mrf.mxu1 }
0x1d52   : > { %v3694_v12 = vadd.f32 %v3693_v44, %v3617_v5  ;;  %v4898_v5 = vld [vmem:[%s7303_s10 + $0x328] sm:$0xff] }
0x1d53   : > { %v3695_v6 = vpop.f32.mrf.mxu1 }
0x1d54   : > { %v3696_v7 = vadd.f32 %v3695_v6, %v3621_v4  ;;  %v3698_v9 = vmax.f32 %v3694_v12, 0.0  ;;  %v4880_v4 = vld [vmem:[%s7302_s9 + $0xa] sm:$0x3] }
0x1d55   : > { %v3977_v44 = vrot.slane %v4880_v4, %v6272_v10  ;;  %v3981_v12 = vrot.slane %v4880_v4, %v6277_v13  ;;  %v4239_v10 = vld [vmem:[%s7305_s12 + $0x38] sm:$0xff] }
0x1d56   : > { %v3699_v8 = vmax.f32 %v3696_v7, 0.0 }
0x1d58   : > { %4860 = vmatprep.mubr.msk.f32.mxu0 %vm778_vm2, %v3699_v8 }
0x1d59   : > { %3786 = vmatmul.mubr.f32.vlgmr.msra.gmra.mxu0 %v3698_v9 }
0x1d5a   : > { %4082 = vmatpush1.msra.mxu0 %v4897_v49 }
0x1d5b   : > { %4083 = vmatprep.subr.mxu0 %v5783_v1 }
0x1d5c   : > { %4084 = vmatpush1.msra.mxu0 %v4896_v50 }
0x1d5d   : > { %4085 = vmatprep.subr.mxu0 %v5783_v1 }
0x1d5e   : > { %4086 = vmatpush1.msra.mxu0 %v4895_v52 }
0x1d5f   : > { %4087 = vmatprep.subr.mxu0 %v5783_v1 }
0x1d60   : > { %4088 = vmatpush1.msra.mxu0 %v4894_v53 }
0x1d61   : > { %4089 = vmatprep.subr.mxu0 %v5783_v1 }
0x1d62   : > { %4090 = vmatpush1.msra.mxu0 %v4893_v0 }
0x1d63   : > { %4091 = vmatprep.subr.mxu0 %v5783_v1 }
0x1d64   : > { %4092 = vmatpush1.msra.mxu0 %v4892_v54 }
0x1d65   : > { %4093 = vmatprep.subr.mxu0 %v5783_v1 }
0x1d66   : > { %4094 = vmatpush1.msra.mxu0 %v4891_v55 }
0x1d67   : > { %4095 = vmatprep.subr.mxu0 %v5783_v1 }
0x1d68   : > { %4096 = vmatpush1.msra.mxu0 %v4890_v56 }
0x1d69   : > { %4097 = vmatprep.subr.mxu0 %v5783_v1 }
0x1d6a   : > { %4098 = vmatpush1.msra.mxu0 %v4889_v57 }
0x1d6b   : > { %4099 = vmatprep.subr.mxu0 %v5783_v1 }
0x1d6c   : > { %4100 = vmatpush1.msra.mxu0 %v4888_v58 }
0x1d6d   : > { %4101 = vmatprep.subr.mxu0 %v5783_v1 }
0x1e19   : > { %v3787_v11 = vpop.f32.mrf.mxu0 }
0x1e1a   : > { %v4861_v15 = vmul.f32 -1.442695, %v3787_v11 }
0x1e1b   : > { %v3789_v16 = vpop.f32.mrf.mxu0 }
0x1e1c   : > { %5481 = vpow2.f32 %v4861_v15 }
0x1e29   : > { %v5482_v18 = vpop.eup %5481 }
0x1e2a   : > { %v3794_v19 = vadd.f32 1.0, %v5482_v18 }
0x1e2c   : > { %5483 = vrcp.f32 %v3794_v19 }
0x1e39   : > { %v5484_v21 = vpop.eup %5483 }
0x1e3a   : > { %5249 = vmatmul.mubr.msk.f32.vlgmr.msra.gmra.mxu1 %vm778_vm2, %v5484_v21 }
0x1e3b   : > { %5252 = vmatpush3.msra.mxu1 %v3879_v20  ;;  %5267 = vmatprep.mubr.msk.f32.mxu1 %vm5784_vm0, %v5783_v1 }
0x1e3c   : > { %5253 = vmatprep.subr.mxu1 %v5783_v1 }
0x1e3d   : > { %5254 = vmatpush3.msra.mxu1 %v3878_v14  ;;  %v4238_v14 = vld [vmem:[%s7305_s12 + $0x30] sm:$0xff] }
0x1e3e   : > { %5255 = vmatprep.subr.mxu1 %v5783_v1 }
0x1e3f   : > { %5256 = vmatpush3.msra.mxu1 %v3877_v22  ;;  %v4237_v22 = vld [vmem:[%s7305_s12 + $0x28] sm:$0xff] }
0x1e40   : > { %5257 = vmatprep.subr.mxu1 %v5783_v1 }
0x1e41   : > { %5258 = vmatpush3.msra.mxu1 %v3876_v23  ;;  %v4236_v23 = vld [vmem:[%s7305_s12 + $0x20] sm:$0xff] }
0x1e42   : > { %5259 = vmatprep.subr.mxu1 %v5783_v1 }
0x1e43   : > { %5260 = vmatpush3.msra.mxu1 %v3875_v24  ;;  %v4235_v24 = vld [vmem:[%s7305_s12 + $0x18] sm:$0xff] }
0x1e44   : > { %5261 = vmatprep.subr.mxu1 %v5783_v1 }
0x1e45   : > { %5262 = vmatpush3.msra.mxu1 %v3874_v25  ;;  %v4234_v25 = vld [vmem:[%s7305_s12 + $0x10] sm:$0xff] }
0x1e46   : > { %5263 = vmatprep.subr.mxu1 %v5783_v1 }
0x1e47   : > { %5264 = vmatpush3.msra.mxu1 %v3873_v26  ;;  %v4233_v26 = vld [vmem:[%s7305_s12 + $0x8] sm:$0xff] }
0x1e48   : > { %5265 = vmatprep.subr.mxu1 %v5783_v1 }
0x1e49   : > { %5266 = vmatpush3.msra.mxu1 %v3872_v27  ;;  %v4232_v27 = vld [vmem:[%s7305_s12] sm:$0xff] }
0x1e4a   : > { %4003 = vmatprep.subr.mxu1 %v4879_v28 }
0x1efa   : > { %v3866_v17 = vpop.f32.mrf.mxu1 }
0x1efb   : > { %v3870_v29 = vmul.f32 %v3866_v17, %v7010_v59  ;;  %v4887_v59 = vld [vmem:[%s7303_s10 + $0x2d0] sm:$0xff] }
0x1efc   : > { %v5250_v31 = vpop.f32.mrf.mxu1  ;;  %4102 = vmatpush1.msra.mxu0 %v4887_v59 }
0x1efd   : > { %5268 = vmatmul.mubr.msk.f32.vlgmr.msra.gmra.mxu1 %vm615_vm1, %v3870_v29  ;;  %4103 = vmatprep.subr.mxu0 %v5783_v1  ;;  %v4317_v31 = vld [vmem:[%s7353_s15 + $0x18] sm:$0xff] }
0x1efe   : > { %4004 = vmatpush1.msra.mxu1 %v4878_v30  ;;  %4051 = vmatprep.mubr.f32.mxu1 %v5783_v1 }
0x1eff   : > { %4005 = vmatprep.subr.mxu1 %v4877_v32  ;;  %4104 = vmatpush1.msra.mxu0 %v4886_v60  ;;  %v4316_v32 = vld [vmem:[%s7353_s15 + $0x10] sm:$0xff] }
0x1f00   : > { %4006 = vmatpush1.msra.mxu1 %v4876_v33  ;;  %4105 = vmatprep.subr.mxu0 %v5783_v1  ;;  %v4314_v33 = vld [vmem:[%s7353_s15] sm:$0xff] }
0x1f01   : > { %4007 = vmatprep.subr.mxu1 %v4875_v34  ;;  %4106 = vmatpush1.msra.mxu0 %v4885_v61 }
0x1f02   : > { %4008 = vmatpush1.msra.mxu1 %v4874_v35  ;;  %4107 = vmatprep.subr.mxu0 %v5783_v1 }
0x1f03   : > { %4009 = vmatprep.subr.mxu1 %v4873_v36  ;;  %4108 = vmatpush1.msra.mxu0 %v4884_v2  ;;  %v4392_v36 = vld [vmem:[#allocation15] sm:$0xff] }
0x1f04   : > { %4010 = vmatpush1.msra.mxu1 %v4872_v37  ;;  %4109 = vmatprep.subr.mxu0 %v5783_v1 }
0x1f05   : > { %4011 = vmatprep.subr.mxu1 %v4871_v38  ;;  %4110 = vmatpush1.msra.mxu0 %v4883_v3 }
0x1f06   : > { %4012 = vmatpush1.msra.mxu1 %v4870_v40  ;;  %4111 = vmatprep.subr.mxu0 %v5783_v1 }
0x1f07   : > { %4013 = vmatprep.subr.mxu1 %v4869_v41 }
0x1f08   : > { %4014 = vmatpush1.msra.mxu1 %v4868_v42 }
0x1f09   : > { %4015 = vmatprep.subr.mxu1 %v4867_v43 }
0x1f0a   : > { %4016 = vmatpush1.msra.mxu1 %v4866_v45 }
0x1f0b   : > { %4017 = vmatprep.subr.mxu1 %v4865_v46 }
0x1f0c   : > { %4018 = vmatpush1.msra.mxu1 %v4864_v48 }
0x1f0d   : > { %5270 = vmatprep.subr.mxu1 %v5783_v1 }
0x1fbd   : > { %v7155_v62 = vpop.f32.mrf.mxu1 }
0x1fbe   : > { %v3953_v63 = vmul.f32 %v7155_v62, %v7155_v62 }
0x1fbf   : > { %v5269_v51 = vpop.f32.mrf.mxu1 }
0x1fc0   : > { %4881 = vmatmul.mubr.msk.f32.vlgmr.msra.gmra.mxu1 %vm615_vm1, %v3953_v63 }
0x1fc1   : > { %5271 = vmatpush3.msra.mxu1 %v6805_v47  ;;  %5272 = vmatprep.mubr.msk.f32.mxu1 %vm5784_vm0, %v5783_v1  ;;  %v4882_v47 = vld [vmem:[%s7303_s10 + $0x2a8] sm:$0xff] }
0x1fc2   : > { %5275 = vmatprep.subr.mxu1 %v5783_v1  ;;  %4112 = vmatpush1.msra.mxu0 %v4882_v47 }
0x1fc3   : > { %4143 = vmatprep.subr.mxu0 %v5783_v1 }
0x1fc4   : > { %4144 = vmatpush2.msra.mxu0 %v4898_v5 }
0x2080   : > { %v4053_v6 = vpop.f32.mrf.mxu1 }
0x2081   : > { %v4054_v7 = vadd.f32 %v4053_v6, %v3977_v44 }
0x2082   : > { %v4055_v8 = vpop.f32.mrf.mxu1 }
0x2083   : > { %v4056_v9 = vadd.f32 %v4055_v8, %v3981_v12  ;;  %v4058_v15 = vmax.f32 %v4054_v7, 0.0 }
0x2085   : > { %v4059_v11 = vmax.f32 %v4056_v9, 0.0 }
0x2087   : > { %4899 = vmatprep.mubr.msk.f32.mxu0 %vm778_vm2, %v4059_v11 }
0x2088   : > { %4146 = vmatmul.mubr.f32.vlgmr.msra.gmra.mxu0 %v4058_v15 }
0x2148   : > { %v4147_v16 = vpop.f32.mrf.mxu0 }
0x2149   : > { %v4900_v18 = vmul.f32 -1.442695, %v4147_v16 }
0x214a   : > { %v4149_v19 = vpop.f32.mrf.mxu0 }
0x214b   : > { %5485 = vpow2.f32 %v4900_v18 }
0x2158   : > { %v5486_v20 = vpop.eup %5485 }
0x2159   : > { %v4154_v21 = vadd.f32 1.0, %v5486_v20 }
0x215b   : > { %5487 = vrcp.f32 %v4154_v21 }
0x2168   : > { %v5488_v13 = vpop.eup %5487 }
0x2169   : > { %5273 = vmatmul.mubr.msk.f32.vlgmr.msra.gmra.mxu1 %vm778_vm2, %v5488_v13 }
0x216a   : > { %5276 = vmatpush3.msra.mxu1 %v4239_v10  ;;  %5291 = vmatprep.mubr.msk.f32.mxu1 %vm5784_vm0, %v5783_v1 }
0x216b   : > { %5277 = vmatprep.subr.mxu1 %v5783_v1 }
0x216c   : > { %5278 = vmatpush3.msra.mxu1 %v4238_v14 }
0x216d   : > { %5279 = vmatprep.subr.mxu1 %v5783_v1 }
0x216e   : > { %5280 = vmatpush3.msra.mxu1 %v4237_v22 }
0x216f   : > { %5281 = vmatprep.subr.mxu1 %v5783_v1 }
0x2170   : > { %5282 = vmatpush3.msra.mxu1 %v4236_v23 }
0x2171   : > { %5283 = vmatprep.subr.mxu1 %v5783_v1 }
0x2172   : > { %5284 = vmatpush3.msra.mxu1 %v4235_v24 }
0x2173   : > { %5285 = vmatprep.subr.mxu1 %v5783_v1 }
0x2174   : > { %5286 = vmatpush3.msra.mxu1 %v4234_v25 }
0x2175   : > { %5287 = vmatprep.subr.mxu1 %v5783_v1 }
0x2176   : > { %5288 = vmatpush3.msra.mxu1 %v4233_v26 }
0x2177   : > { %5289 = vmatprep.subr.mxu1 %v5783_v1 }
0x2178   : > { %5290 = vmatpush3.msra.mxu1 %v4232_v27 }
0x2179   : > { %5294 = vmatprep.subr.mxu1 %v5783_v1 }
0x2229   : > { %v4226_v28 = vpop.f32.mrf.mxu1 }
0x222a   : > { %v4230_v17 = vmul.f32 %v4226_v28, %v7155_v62 }
0x222b   : > { %v5274_v29 = vpop.f32.mrf.mxu1 }
0x222c   : > { %v4231_v30 = vadd.f32 %v4230_v17, %v6944_v39  ;;  %v4315_v39 = vld [vmem:[%s7353_s15 + $0x8] sm:$0xff] }
0x222e   : > { %5292 = vmatmul.mubr.msk.f32.vlgmr.msra.gmra.mxu1 %vm615_vm1, %v4231_v30 }
0x222f   : > { %5295 = vmatpush3.msra.mxu1 %v4317_v31  ;;  %5302 = vmatprep.mubr.msk.f32.mxu1 %vm5784_vm0, %v5783_v1 }
0x2230   : > { %5296 = vmatprep.subr.mxu1 %v5783_v1 }
0x2231   : > { %5297 = vmatpush3.msra.mxu1 %v4316_v32 }
0x2232   : > { %5298 = vmatprep.subr.mxu1 %v5783_v1 }
0x2233   : > { %5299 = vmatpush3.msra.mxu1 %v4315_v39 }
0x2234   : > { %5300 = vmatprep.subr.mxu1 %v5783_v1 }
0x2235   : > { %5301 = vmatpush3.msra.mxu1 %v4314_v33 }
0x2236   : > { %5305 = vmatprep.subr.mxu1 %v5783_v1 }
0x22ee   : > { %v4309_v34 = vpop.f32.mrf.mxu1 }
0x22ef   : > { %v4313_v35 = vmul.f32 %v4309_v34, %v4309_v34 }
0x22f0   : > { %v5293_v37 = vpop.f32.mrf.mxu1 }
0x22f1   : > { %5303 = vmatmul.mubr.msk.f32.vlgmr.msra.gmra.mxu1 %vm4318_vm3, %v4313_v35 }
0x22f2   : > { %5306 = vmatpush3.msra.mxu1 %v4392_v36  ;;  %5307 = vmatprep.mubr.msk.f32.mxu1 %vm5784_vm0, %v5783_v1 }
0x23b1   : > { %v4388_v38 = vpop.f32.mrf.mxu1 }
0x23b2   : > { %5308 = vmatmul.mubr.msk.f32.vlgmr.msra.gmra.mxu1 %vm778_vm2, %v4388_v38 }
0x23b3   : > { %v5304_v40 = vpop.f32.mrf.mxu1 }
0x2472   : > { %v4462_v41 = vpop.f32.mrf.mxu1 }
0x2473   : > { %4466 = vst [vmem:[%s604_s30] sm:$0xff] %v4462_v41 }
0x2474   : > { %v5309_v1 = vpop.f32.mrf.mxu1 }
0x2475   : > { %5702 = shalt.err (!%p5699_p3)
}
0x2476   : > { %s5703_s13 = scalar_lea.hbm %s7252_s25, 128  ;;  %s5707_s27 = scalar_lea.hbm %s7354_s4, 256 }
0x2477   : > { %p5704_p10 = scmp.ne.s32.totalorder %s7252_s25, %s5703_s13  ;;  %p5708_p7 = scmp.lt.s32.totalorder %s7252_s25, %s7354_s4 }
0x2478   : > { %p5709_p2 = scmp.lt.s32.totalorder %s5707_s27, %s5703_s13 }
0x2479   : > { %p5705_p6 = pnand %p5704_p10, %p7355_p11 }
0x247a   : > { %p5710_p9 = por %p5709_p2, %p5708_p7 }
0x247b   : > { %p5706_p13 = pneg %p5705_p6 }
0x247d   : > { %p5711_p12 = pnand %p5710_p9, %p5706_p13 }
0x247f   : > { %5714 = shalt.err (!%p5711_p12)
}
0x2480   : > { %5340 = dma.vmem_to_hbm [thread:$0]  (%p7355_p11), %s7247_s17, 128, %s7252_s25, %s4468_s26  }
0x2481 PF: > { %s4493_s14 = sand.u32 1, %s5757_s18   ;;  %p7356_p0 = scmp.ne.s32.totalorder %s7341_s23, 0 }
0x2482   : > { %p7357_p5 = scmp.ge.s32.totalorder %s5769_s21, 2  ;;  %s4494_s3 = scalar_lea.sflag [#allocation4], %s4493_s14 }
0x2484   : > { %p5369_p8 = pnand %p7357_p5, %p7356_p0 }
0x2486   : > { %p5370_p4 = pneg %p5369_p8 }
0x2488   : > { %5752 = dma.done.wait (%p5370_p4), %s4494_s3, 128  }
0x2489   : > { %5754 = vsyncadd (%p5370_p4), %s4494_s3, 4294967168  ;;  %s7358_s22 = sld [smem:[#allocation23_spill]]  ;;  %p32_p1 = scmp.ge.s32.totalorder %s5983_s28, 4  }
0x248a   : > { %s7359_s18 = smov %s5761_s19  ;;  %s7360_s19 = smov %s5765_s20 }
0x248b   : > { %s7362_s21 = smov %s5983_s28  ;;  %34 = sbr.rel (!%p32_p1) target bundleno = 19 (0x13), region = 182 }
0x248f   : > { %s7361_s20 = smov %s7358_s22 }
0x2490   :  { %4499 = vsyncpa [#allocation3], 1 }
0x2491   :  { %4501 = vsyncpa [#allocation3 + $0x1], 1 }
0x2492   :  { %4502 = vsyncpa [#allocation8], 1 }
0x2493   :  { %4503 = vsyncpa [#allocation11], 1 }
0x2494   :  { %4504 = vsyncpa [#allocation14], 1 }
0x2495   :  { %4505 = vsyncpa [#allocation4], 1 }
0x2496   :  { %4507 = vsyncpa [#allocation4 + $0x1], 1 }
0x2497   :  { %4508 = vsyncpa [#allocation5], 1 }
0x2498   :  { %4510 = vsyncpa [#allocation5 + $0x1], 1 }

</bundles_post_ra>
